<compile_context>
chip_gen: v7x
topology: tpu7x:2x2x1
jax: 0.10.0
libtpu: 0.0.40
codegen_flags: <defaults>
</compile_context>

<pallas_src>
import functools

import jax
import jax.numpy as jnp
import numpy as np
from jax.experimental import pallas as pl
from jax.experimental.pallas import tpu as pltpu

EPS = 1e-5
LANE = 128      # channel dim padded to a multiple of the 128-lane vreg width
TILE_M = 256    # output spatial positions (rows) per matmul grid step
NCORES = 2      # leading "parallel" axis: M tiles split across v7x TensorCores


def _round_up(x, m):
    return (x + m - 1) // m * m


def _vmem_budget(step_bytes):
    """Scoped-VMEM limit: double-buffered pipeline + headroom, capped at 75%
    of the physical VMEM of the current generation (v7x has only 64 MiB)."""
    cap = 128 << 20
    try:
        info = pltpu.get_tpu_info()
        cap = int(getattr(info, "vmem_capacity_bytes", cap) or cap)
    except Exception:
        pass
    ceiling = (cap * 3) // 4
    want = 3 * int(step_bytes) + (8 << 20)
    return int(max(min(want, ceiling), min(16 << 20, ceiling)))


def _pick_tc(K, c_pad, w_itemsize, budget_bytes=8 << 20):
    """Widest channel tile (best MXU fill on v6e/v7x, least W re-streaming)
    whose weight tile still fits comfortably in VMEM."""
    for tc in (c_pad, 512, 256, 128):
        if tc <= c_pad and c_pad % tc == 0 and K * tc * w_itemsize <= budget_bytes:
            return tc
    return LANE


def _pick_epilogue_rows(m_pad):
    for tm in (2048, 1024, 512, 256, 128, 64, 32, 16, 8):
        if m_pad % tm == 0:
            return tm
    return m_pad


# ---------------------------------------------------------------------------
# Pallas kernels
# ---------------------------------------------------------------------------
def _make_matmul_stats_kernel(tm, tc, nc):
    """Pass 1: y = patches @ W on the MXU (f32 accumulation) plus per-channel
    sum / sum-of-squares, accumulated across the (arbitrary) m/c grid axes
    into an 8-sublane-row stats block that stays resident per core."""

    def kernel(a_ref, w_ref, y_ref, sum_ref, ssq_ref):
        mi = pl.program_id(1)
        ci = pl.program_id(2)

        @pl.when(jnp.logical_and(mi == 0, ci == 0))
        def _():
            sum_ref[...] = jnp.zeros_like(sum_ref)
            ssq_ref[...] = jnp.zeros_like(ssq_ref)

        y = jnp.dot(a_ref[...], w_ref[...], preferred_element_type=jnp.float32)
        y_ref[...] = y.astype(y_ref.dtype)

        # Partial sums in 8-sublane bins (pure vreg adds, no XLU reduction);
        # host side finishes the reduction over the 8 rows (+2 cores).
        y3 = y.reshape(tm // 8, 8, tc)
        ps = jnp.sum(y3, axis=0)            # (8, tc) f32
        pq = jnp.sum(y3 * y3, axis=0)       # (8, tc) f32

        if nc == 1:
            sum_ref[...] += ps
            ssq_ref[...] += pq
        else:
            off = pl.multiple_of(ci * tc, LANE)
            sum_ref[:, pl.ds(off, tc)] += ps
            ssq_ref[:, pl.ds(off, tc)] += pq

    return kernel


def _affine_add_relu_kernel(y_ref, s_ref, t_ref, r_ref, rs_ref, rt_ref, o_ref):
    """Block epilogue: bn2 affine + shortcut affine + residual add + relu."""
    out = y_ref[...].astype(jnp.float32) * s_ref[...] + t_ref[...]
    out = out + (r_ref[...].astype(jnp.float32) * rs_ref[...] + rt_ref[...])
    o_ref[...] = jnp.maximum(out, 0.0).astype(o_ref.dtype)


# ---------------------------------------------------------------------------
# Pallas-call wrappers
# ---------------------------------------------------------------------------
def matmul_stats(a, w, *, out_dtype=None, tm=TILE_M):
    """a: (M, K) patches in compute dtype; w: (K, c_pad), c_pad % 128 == 0.
    Returns y (m_pad, c_pad) in `out_dtype`, plus per-channel sum and
    sum-of-squares partials of shape (NCORES*8, c_pad) f32 (reduce on host)."""
    M, K = a.shape
    kw_, c_pad = w.shape
    assert kw_ == K and c_pad % LANE == 0
    out_dtype = out_dtype or jnp.float32

    a_itm = jnp.dtype(a.dtype).itemsize
    w_itm = jnp.dtype(w.dtype).itemsize
    y_itm = jnp.dtype(out_dtype).itemsize

    tc = _pick_tc(K, c_pad, w_itm)
    nc = c_pad // tc
    m_pad = _round_up(M, NCORES * tm)
    nm_core = m_pad // tm // NCORES
    a_p = a if m_pad == M else jnp.pad(a, ((0, m_pad - M), (0, 0)))

    kernel = _make_matmul_stats_kernel(tm, tc, nc)

    step_bytes = (tm * K * a_itm + K * tc * w_itm + tm * tc * y_itm
                  + 2 * 8 * c_pad * 4)
    cost = pl.CostEstimate(
        flops=2 * m_pad * K * c_pad,
        transcendentals=0,
        bytes_accessed=(m_pad * K * a_itm + K * c_pad * w_itm
                        + m_pad * c_pad * y_itm + 2 * NCORES * 8 * c_pad * 4))

    y, ssum, sssq = pl.pallas_call(
        kernel,
        out_shape=(jax.ShapeDtypeStruct((m_pad, c_pad), out_dtype),
                   jax.ShapeDtypeStruct((NCORES * 8, c_pad), jnp.float32),
                   jax.ShapeDtypeStruct((NCORES * 8, c_pad), jnp.float32)),
        grid=(NCORES, nm_core, nc),
        in_specs=[
            # A depends only on (core, m): stays resident across the c sweep.
            pl.BlockSpec((tm, K), lambda p, mi, ci: (p * nm_core + mi, 0)),
            pl.BlockSpec((K, tc), lambda p, mi, ci: (0, ci)),
        ],
        out_specs=(
            pl.BlockSpec((tm, tc), lambda p, mi, ci: (p * nm_core + mi, ci)),
            pl.BlockSpec((8, c_pad), lambda p, mi, ci: (p, 0)),
            pl.BlockSpec((8, c_pad), lambda p, mi, ci: (p, 0)),
        ),
        compiler_params=pltpu.CompilerParams(
            dimension_semantics=("parallel", "arbitrary", "arbitrary"),
            vmem_limit_bytes=_vmem_budget(step_bytes)),
        cost_estimate=cost,
    )(a_p, w)
    return y, ssum, sssq


def affine_add_relu(y, scale, shift, res, res_scale, res_shift):
    """Fused block epilogue, pure HBM-streaming pass with large row tiles."""
    m_pad, c_pad = y.shape
    tm = _pick_epilogue_rows(m_pad)
    row = pl.BlockSpec((tm, c_pad), lambda mi: (mi, 0))
    vec = pl.BlockSpec((1, c_pad), lambda mi: (0, 0))
    itm = jnp.dtype(y.dtype).itemsize
    step_bytes = 3 * tm * c_pad * itm + 4 * c_pad * 4
    return pl.pallas_call(
        _affine_add_relu_kernel,
        out_shape=jax.ShapeDtypeStruct((m_pad, c_pad), y.dtype),
        grid=(m_pad // tm,),
        in_specs=[row, vec, vec, row, vec, vec],
        out_specs=row,
        compiler_params=pltpu.CompilerParams(
            dimension_semantics=("parallel",),
            vmem_limit_bytes=_vmem_budget(step_bytes)),
    )(y, scale, shift, res, res_scale, res_shift)


def bn_scale_shift(ssum, sssq, count, gamma, beta):
    """Fold BatchNorm (batch stats, biased variance, eps=1e-5) + affine into a
    single per-channel scale/shift. ssum/sssq are per-core/sublane partials."""
    s = jnp.sum(ssum, axis=0, keepdims=True)    # (1, c_pad)
    q = jnp.sum(sssq, axis=0, keepdims=True)
    mean = s / count
    var = jnp.maximum(q / count - mean * mean, 0.0)
    scale = gamma * jax.lax.rsqrt(var + EPS)
    shift = beta - mean * scale
    return scale, shift


# ---------------------------------------------------------------------------
# Glue: im2col + one-time weight repacking (plain JAX)
# ---------------------------------------------------------------------------
def im2col_3x3(x_nhwc, stride):
    """(N, H, W, C) -> (N*Ho*Wo, 9*C), (kh, kw, c) column ordering.
    Emitted directly in x's dtype (bf16 in the perf path)."""
    N, H, W, C = x_nhwc.shape
    xp = jnp.pad(x_nhwc, ((0, 0), (1, 1), (1, 1), (0, 0)))
    Ho = (H + 2 - 3) // stride + 1
    Wo = (W + 2 - 3) // stride + 1
    taps = []
    for kh in range(3):
        for kw in range(3):
            taps.append(
                xp[:, kh:kh + stride * (Ho - 1) + 1:stride,
                      kw:kw + stride * (Wo - 1) + 1:stride, :])
    patches = jnp.stack(taps, axis=3)                 # (N, Ho, Wo, 9, C)
    return patches.reshape(N * Ho * Wo, 9 * C), Ho, Wo


def repack_w3x3(w_oihw):
    """(Cout, Cin, 3, 3) -> (9*Cin, Cout), matching im2col column ordering."""
    return jnp.transpose(w_oihw, (2, 3, 1, 0)).reshape(-1, w_oihw.shape[0])


def repack_w1x1(w_oihw):
    """(Cout, Cin, 1, 1) -> (Cin, Cout)."""
    return jnp.transpose(w_oihw[:, :, 0, 0], (1, 0))


def prepare_params(params, *, compute_dtype=jnp.bfloat16):
    """One-time weight repack: torch OIHW -> matmul layout, output channels
    zero-padded to 128 lanes, conv2 input channels padded too (so the padded
    activation flows through the block unchanged), operands in compute dtype."""
    planes = int(params["w1"].shape[0])
    cin = int(params["w1"].shape[1])
    c_pad = _round_up(planes, LANE)

    def pad_cols(w):    # (K, planes) -> (K, c_pad)
        return jnp.pad(w, ((0, 0), (0, c_pad - planes))).astype(compute_dtype)

    def pad_vec(v):     # (planes,) or (1, planes) -> (1, c_pad) f32
        v = jnp.asarray(v, jnp.float32).reshape(1, -1)
        return jnp.pad(v, ((0, 0), (0, c_pad - planes)))

    # conv2 consumes the c_pad-wide activation directly -> pad its K dim.
    w2_kpad = jnp.pad(params["w2"], ((0, 0), (0, c_pad - planes), (0, 0), (0, 0)))

    prep = {
        "planes": planes, "cin": cin, "c_pad": c_pad, "dtype": compute_dtype,
        "w1": pad_cols(repack_w3x3(params["w1"])),
        "g1": pad_vec(params["g1"]), "b1": pad_vec(params["b1"]),
        "w2": pad_cols(repack_w3x3(w2_kpad)),
        "g2": pad_vec(params["g2"]), "b2": pad_vec(params["b2"]),
        # identity-shortcut "affine": scale 1 on real channels, 0 on padding
        "id_s": pad_vec(jnp.ones((planes,), jnp.float32)),
        "id_t": jnp.zeros((1, c_pad), jnp.float32),
    }
    if "w_sc" in params:
        prep["w_sc"] = pad_cols(repack_w1x1(params["w_sc"]))
        prep["g_sc"] = pad_vec(params["g_sc"])
        prep["b_sc"] = pad_vec(params["b_sc"])
    return prep


# ---------------------------------------------------------------------------
# BasicBlock forward (Pallas)
# ---------------------------------------------------------------------------
def basic_block_forward(x_nchw, prep, *, stride):
    cd = prep["dtype"]
    planes, cin, c_pad = prep["planes"], prep["cin"], prep["c_pad"]

    x = jnp.transpose(x_nchw, (0, 2, 3, 1)).astype(jnp.float32)   # NHWC
    N, H, W, _ = x.shape

    # conv1 (3x3, stride) -- patches emitted directly in compute dtype
    a1, Ho, Wo = im2col_3x3(x.astype(cd), stride)
    M = N * Ho * Wo
    y1, s1, q1 = matmul_stats(a1, prep["w1"], out_dtype=cd)
    m_pad = y1.shape[0]
    sc1, sh1 = bn_scale_shift(s1, q1, float(M), prep["g1"], prep["b1"])

    # bn1 affine + relu in plain JAX: XLA fuses it into conv2's im2col gather,
    # so out1 never makes a separate HBM round trip. Channels stay c_pad wide.
    out1_nhwc = jnp.maximum(y1[:M].astype(jnp.float32) * sc1 + sh1, 0.0)
    out1_nhwc = out1_nhwc.astype(cd).reshape(N, Ho, Wo, c_pad)

    # shortcut: 1x1 conv (raw matmul output; its BN affine is fused into the
    # block epilogue) or identity (scale 1 / shift 0 on real channels).
    if stride != 1 or cin != planes:
        a_sc = x[:, ::stride, ::stride, :].reshape(M, cin).astype(cd)
        res, ss, qs = matmul_stats(a_sc, prep["w_sc"], out_dtype=cd)
        r_s, r_t = bn_scale_shift(ss, qs, float(M), prep["g_sc"], prep["b_sc"])
    else:
        xf = x.reshape(M, cin).astype(cd)
        res = jnp.pad(xf, ((0, m_pad - M), (0, c_pad - cin)))
        r_s, r_t = prep["id_s"], prep["id_t"]

    # conv2 (3x3, stride 1) + bn2 + shortcut-BN + add + relu (fused epilogue)
    a2, _, _ = im2col_3x3(out1_nhwc, 1)
    y2, s2, q2 = matmul_stats(a2, prep["w2"], out_dtype=cd)
    sc2, sh2 = bn_scale_shift(s2, q2, float(M), prep["g2"], prep["b2"])
    out2 = affine_add_relu(y2, sc2, sh2, res, r_s, r_t)            # (m_pad, c_pad)
    out2 = out2[:M, :planes].reshape(N, Ho, Wo, planes)
    return jnp.transpose(out2, (0, 3, 1, 2)).astype(jnp.float32)   # NCHW


# ---------------------------------------------------------------------------
# Pure-JAX reference (for the correctness check)
# ---------------------------------------------------------------------------
def _ref_conv(x, w, stride, pad, dtype):
    return jax.lax.conv_general_dilated(
        x.astype(dtype), w.astype(dtype), (stride, stride),
        [(pad, pad), (pad, pad)],
        dimension_numbers=("NCHW", "OIHW", "NCHW"),
        preferred_element_type=jnp.float32)


def _ref_bn(y, g, b):
    mean = y.mean(axis=(0, 2, 3), keepdims=True)
    var = jnp.square(y - mean).mean(axis=(0, 2, 3), keepdims=True)
    return (y - mean) * jax.lax.rsqrt(var + EPS) * g.reshape(1, -1, 1, 1) \
        + b.reshape(1, -1, 1, 1)


def basic_block_reference(x, params, *, stride, conv_dtype=jnp.float32):
    out = jax.nn.relu(_ref_bn(_ref_conv(x, params["w1"], stride, 1, conv_dtype),
                              params["g1"][0], params["b1"][0]))
    out = _ref_bn(_ref_conv(out, params["w2"], 1, 1, conv_dtype),
                  params["g2"][0], params["b2"][0])
    cin, planes = params["w1"].shape[1], params["w1"].shape[0]
    if stride != 1 or cin != planes:
        sc = _ref_bn(_ref_conv(x, params["w_sc"], stride, 0, conv_dtype),
                     params["g_sc"][0], params["b_sc"][0])
    else:
        sc = x
    return jax.nn.relu(out + sc)


# ---------------------------------------------------------------------------
if __name__ == "__main__":
    # (in_planes, planes, stride): projection shortcut / identity / strided projection
    configs = [(4, 8, 1), (8, 8, 1), (4, 8, 2)]
    N, H, W = 2, 16, 16

    for (in_planes, planes, stride) in configs:
        ks = jax.random.split(jax.random.PRNGKey(0), 10)
        params = {
            "w1": jax.random.normal(ks[0], (planes, in_planes, 3, 3), jnp.float32) * 0.1,
            "g1": 1.0 + 0.1 * jax.random.normal(ks[1], (1, planes), jnp.float32),
            "b1": 0.1 * jax.random.normal(ks[2], (1, planes), jnp.float32),
            "w2": jax.random.normal(ks[3], (planes, planes, 3, 3), jnp.float32) * 0.1,
            "g2": 1.0 + 0.1 * jax.random.normal(ks[4], (1, planes), jnp.float32),
            "b2": 0.1 * jax.random.normal(ks[5], (1, planes), jnp.float32),
        }
        if stride != 1 or in_planes != planes:
            params["w_sc"] = jax.random.normal(
                ks[6], (planes, in_planes, 1, 1), jnp.float32) * 0.1
            params["g_sc"] = 1.0 + 0.1 * jax.random.normal(ks[7], (1, planes), jnp.float32)
            params["b_sc"] = 0.1 * jax.random.normal(ks[8], (1, planes), jnp.float32)

        x = jax.random.normal(ks[9], (N, in_planes, H, W), jnp.float32)

        # f32 compute path: tight structural check (tiling / stats / fusion).
        prep32 = prepare_params(params, compute_dtype=jnp.float32)
        fwd32 = jax.jit(functools.partial(basic_block_forward, prep=prep32, stride=stride))
        out32 = jax.block_until_ready(fwd32(x))
        ref32 = jax.block_until_ready(
            basic_block_reference(x, params, stride=stride, conv_dtype=jnp.float32))
        np.testing.assert_allclose(np.asarray(out32), np.asarray(ref32),
                                   rtol=1e-3, atol=1e-3)

        # bf16 compute path (performance default): bf16 patches / y / activations,
        # f32 stats accumulation; checked vs a bf16-consistent reference.
        prep16 = prepare_params(params, compute_dtype=jnp.bfloat16)
        fwd16 = jax.jit(functools.partial(basic_block_forward, prep=prep16, stride=stride))
        out16 = jax.block_until_ready(fwd16(x))
        ref16 = jax.block_until_ready(
            basic_block_reference(x, params, stride=stride, conv_dtype=jnp.bfloat16))
        np.testing.assert_allclose(np.asarray(out16), np.asarray(ref16),
                                   rtol=2e-2, atol=2e-2)

    print("KERNEL_OK")
</pallas_src>

<mosaic_0001>
module attributes {stable_mosaic.version = 11 : i64} {
  func.func @kernel(%arg0: i32, %arg1: i32, %arg2: i32, %arg3: memref<256x36xf32, #tpu.memory_space<vmem>>, %arg4: memref<36x128xf32, #tpu.memory_space<vmem>>, %arg5: memref<256x128xf32, #tpu.memory_space<vmem>>, %arg6: memref<8x128xf32, #tpu.memory_space<vmem>>, %arg7: memref<8x128xf32, #tpu.memory_space<vmem>>) attributes {dimension_semantics = [#tpu.dimension_semantics<parallel>, #tpu.dimension_semantics<arbitrary>, #tpu.dimension_semantics<arbitrary>], iteration_bounds = array<i64: 2, 1, 1>, scalar_prefetch = 0 : i64, scratch_operands = 0 : i64, tpu.core_type = #tpu.core_type<tc>, window_params = [{transform_indices = @transform_0, window_bounds = array<i64: 256, 36>}, {transform_indices = @transform_1, window_bounds = array<i64: 36, 128>}, {transform_indices = @transform_2, window_bounds = array<i64: 256, 128>}, {transform_indices = @transform_3, window_bounds = array<i64: 8, 128>}, {transform_indices = @transform_4, window_bounds = array<i64: 8, 128>}]} {
    %c0_i32 = arith.constant 0 : i32
    %0 = arith.cmpi eq, %arg1, %c0_i32 : i32
    %c0_i32_0 = arith.constant 0 : i32
    %1 = arith.cmpi eq, %arg2, %c0_i32_0 : i32
    %2 = arith.andi %0, %1 : i1
    %3 = arith.extui %2 : i1 to i32
    %c0_i32_1 = arith.constant 0 : i32
    %4 = arith.cmpi ne, %3, %c0_i32_1 : i32
    scf.if %4 {
      %cst_17 = arith.constant 0.000000e+00 : f32
      %19 = vector.broadcast %cst_17 : f32 to vector<8x128xf32>
      %c0_18 = arith.constant 0 : index
      %c0_19 = arith.constant 0 : index
      %20 = vector.load %arg6[%c0_18, %c0_19] : memref<8x128xf32, #tpu.memory_space<vmem>>, vector<8x128xf32>
      tpu.vector_store %arg6[%c0_18, %c0_19], %19 {strides = array<i32>} : memref<8x128xf32, #tpu.memory_space<vmem>>, vector<8x128xf32>,
      %cst_20 = arith.constant 0.000000e+00 : f32
      %21 = vector.broadcast %cst_20 : f32 to vector<8x128xf32>
      %c0_21 = arith.constant 0 : index
      %c0_22 = arith.constant 0 : index
      %22 = vector.load %arg7[%c0_21, %c0_22] : memref<8x128xf32, #tpu.memory_space<vmem>>, vector<8x128xf32>
      tpu.vector_store %arg7[%c0_21, %c0_22], %21 {strides = array<i32>} : memref<8x128xf32, #tpu.memory_space<vmem>>, vector<8x128xf32>,
    } else {
    }
    %c0 = arith.constant 0 : index
    %c0_2 = arith.constant 0 : index
    %5 = vector.load %arg3[%c0, %c0_2] : memref<256x36xf32, #tpu.memory_space<vmem>>, vector<256x36xf32>
    %c0_3 = arith.constant 0 : index
    %c0_4 = arith.constant 0 : index
    %6 = vector.load %arg4[%c0_3, %c0_4] : memref<36x128xf32, #tpu.memory_space<vmem>>, vector<36x128xf32>
    %cst = arith.constant dense<0.000000e+00> : vector<256x128xf32>
    %7 = tpu.matmul %5, %6, %cst {dimension_numbers = #tpu.dot_dimension_numbers<[1], [0], [0], [1], [0, 0, 1, 1], [], []>} : vector<256x36xf32>, vector<36x128xf32>, vector<256x128xf32> -> vector<256x128xf32>
    %c0_5 = arith.constant 0 : index
    %c0_6 = arith.constant 0 : index
    %8 = vector.load %arg5[%c0_5, %c0_6] : memref<256x128xf32, #tpu.memory_space<vmem>>, vector<256x128xf32>
    tpu.vector_store %arg5[%c0_5, %c0_6], %7 {strides = array<i32>} : memref<256x128xf32, #tpu.memory_space<vmem>>, vector<256x128xf32>,
    %9 = vector.shape_cast %7 : vector<256x128xf32> to vector<32x8x128xf32>
    %cst_7 = arith.constant dense<0.000000e+00> : vector<8x128xf32>
    %10 = vector.multi_reduction <add>, %9, %cst_7 [0] : vector<32x8x128xf32> to vector<8x128xf32>
    %11 = arith.mulf %9, %9 : vector<32x8x128xf32>
    %cst_8 = arith.constant dense<0.000000e+00> : vector<8x128xf32>
    %12 = vector.multi_reduction <add>, %11, %cst_8 [0] : vector<32x8x128xf32> to vector<8x128xf32>
    %c0_9 = arith.constant 0 : index
    %c0_10 = arith.constant 0 : index
    %13 = vector.load %arg6[%c0_9, %c0_10] : memref<8x128xf32, #tpu.memory_space<vmem>>, vector<8x128xf32>
    %14 = arith.addf %13, %10 : vector<8x128xf32>
    %c0_11 = arith.constant 0 : index
    %c0_12 = arith.constant 0 : index
    %15 = vector.load %arg6[%c0_11, %c0_12] : memref<8x128xf32, #tpu.memory_space<vmem>>, vector<8x128xf32>
    tpu.vector_store %arg6[%c0_11, %c0_12], %14 {strides = array<i32>} : memref<8x128xf32, #tpu.memory_space<vmem>>, vector<8x128xf32>,
    %c0_13 = arith.constant 0 : index
    %c0_14 = arith.constant 0 : index
    %16 = vector.load %arg7[%c0_13, %c0_14] : memref<8x128xf32, #tpu.memory_space<vmem>>, vector<8x128xf32>
    %17 = arith.addf %16, %12 : vector<8x128xf32>
    %c0_15 = arith.constant 0 : index
    %c0_16 = arith.constant 0 : index
    %18 = vector.load %arg7[%c0_15, %c0_16] : memref<8x128xf32, #tpu.memory_space<vmem>>, vector<8x128xf32>
    tpu.vector_store %arg7[%c0_15, %c0_16], %17 {strides = array<i32>} : memref<8x128xf32, #tpu.memory_space<vmem>>, vector<8x128xf32>,
    return
  }
  func.func @transform_0(%arg0: i32, %arg1: i32, %arg2: i32) -> (i32, i32) {
    %c1_i32 = arith.constant 1 : i32
    %0 = arith.muli %arg0, %c1_i32 : i32
    %1 = arith.addi %0, %arg1 : i32
    %c0_i32 = arith.constant 0 : i32
    %c0_i32_0 = arith.constant 0 : i32
    return %1, %c0_i32 : i32, i32
  }
  func.func @transform_1(%arg0: i32, %arg1: i32, %arg2: i32) -> (i32, i32) {
    %c0_i32 = arith.constant 0 : i32
    %c0_i32_0 = arith.constant 0 : i32
    return %c0_i32, %arg2 : i32, i32
  }
  func.func @transform_2(%arg0: i32, %arg1: i32, %arg2: i32) -> (i32, i32) {
    %c1_i32 = arith.constant 1 : i32
    %0 = arith.muli %arg0, %c1_i32 : i32
    %1 = arith.addi %0, %arg1 : i32
    %c0_i32 = arith.constant 0 : i32
    return %1, %arg2 : i32, i32
  }
  func.func @transform_3(%arg0: i32, %arg1: i32, %arg2: i32) -> (i32, i32) {
    %c0_i32 = arith.constant 0 : i32
    %c0_i32_0 = arith.constant 0 : i32
    return %arg0, %c0_i32 : i32, i32
  }
  func.func @transform_4(%arg0: i32, %arg1: i32, %arg2: i32) -> (i32, i32) {
    %c0_i32 = arith.constant 0 : i32
    %c0_i32_0 = arith.constant 0 : i32
    return %arg0, %c0_i32 : i32, i32
  }
}

module attributes {stable_mosaic.version = 11 : i64} {
  func.func @kernel(%arg0: i32, %arg1: i32, %arg2: i32, %arg3: memref<256x1152xf32, #tpu.memory_space<vmem>>, %arg4: memref<1152x128xf32, #tpu.memory_space<vmem>>, %arg5: memref<256x128xf32, #tpu.memory_space<vmem>>, %arg6: memref<8x128xf32, #tpu.memory_space<vmem>>, %arg7: memref<8x128xf32, #tpu.memory_space<vmem>>) attributes {dimension_semantics = [#tpu.dimension_semantics<parallel>, #tpu.dimension_semantics<arbitrary>, #tpu.dimension_semantics<arbitrary>], iteration_bounds = array<i64: 2, 1, 1>, scalar_prefetch = 0 : i64, scratch_operands = 0 : i64, tpu.core_type = #tpu.core_type<tc>, window_params = [{transform_indices = @transform_0, window_bounds = array<i64: 256, 1152>}, {transform_indices = @transform_1, window_bounds = array<i64: 1152, 128>}, {transform_indices = @transform_2, window_bounds = array<i64: 256, 128>}, {transform_indices = @transform_3, window_bounds = array<i64: 8, 128>}, {transform_indices = @transform_4, window_bounds = array<i64: 8, 128>}]} {
    %c0_i32 = arith.constant 0 : i32
    %0 = arith.cmpi eq, %arg1, %c0_i32 : i32
    %c0_i32_0 = arith.constant 0 : i32
    %1 = arith.cmpi eq, %arg2, %c0_i32_0 : i32
    %2 = arith.andi %0, %1 : i1
    %3 = arith.extui %2 : i1 to i32
    %c0_i32_1 = arith.constant 0 : i32
    %4 = arith.cmpi ne, %3, %c0_i32_1 : i32
    scf.if %4 {
      %cst_17 = arith.constant 0.000000e+00 : f32
      %19 = vector.broadcast %cst_17 : f32 to vector<8x128xf32>
      %c0_18 = arith.constant 0 : index
      %c0_19 = arith.constant 0 : index
      %20 = vector.load %arg6[%c0_18, %c0_19] : memref<8x128xf32, #tpu.memory_space<vmem>>, vector<8x128xf32>
      tpu.vector_store %arg6[%c0_18, %c0_19], %19 {strides = array<i32>} : memref<8x128xf32, #tpu.memory_space<vmem>>, vector<8x128xf32>,
      %cst_20 = arith.constant 0.000000e+00 : f32
      %21 = vector.broadcast %cst_20 : f32 to vector<8x128xf32>
      %c0_21 = arith.constant 0 : index
      %c0_22 = arith.constant 0 : index
      %22 = vector.load %arg7[%c0_21, %c0_22] : memref<8x128xf32, #tpu.memory_space<vmem>>, vector<8x128xf32>
      tpu.vector_store %arg7[%c0_21, %c0_22], %21 {strides = array<i32>} : memref<8x128xf32, #tpu.memory_space<vmem>>, vector<8x128xf32>,
    } else {
    }
    %c0 = arith.constant 0 : index
    %c0_2 = arith.constant 0 : index
    %5 = vector.load %arg3[%c0, %c0_2] : memref<256x1152xf32, #tpu.memory_space<vmem>>, vector<256x1152xf32>
    %c0_3 = arith.constant 0 : index
    %c0_4 = arith.constant 0 : index
    %6 = vector.load %arg4[%c0_3, %c0_4] : memref<1152x128xf32, #tpu.memory_space<vmem>>, vector<1152x128xf32>
    %cst = arith.constant dense<0.000000e+00> : vector<256x128xf32>
    %7 = tpu.matmul %5, %6, %cst {dimension_numbers = #tpu.dot_dimension_numbers<[1], [0], [0], [1], [0, 0, 1, 1], [], []>} : vector<256x1152xf32>, vector<1152x128xf32>, vector<256x128xf32> -> vector<256x128xf32>
    %c0_5 = arith.constant 0 : index
    %c0_6 = arith.constant 0 : index
    %8 = vector.load %arg5[%c0_5, %c0_6] : memref<256x128xf32, #tpu.memory_space<vmem>>, vector<256x128xf32>
    tpu.vector_store %arg5[%c0_5, %c0_6], %7 {strides = array<i32>} : memref<256x128xf32, #tpu.memory_space<vmem>>, vector<256x128xf32>,
    %9 = vector.shape_cast %7 : vector<256x128xf32> to vector<32x8x128xf32>
    %cst_7 = arith.constant dense<0.000000e+00> : vector<8x128xf32>
    %10 = vector.multi_reduction <add>, %9, %cst_7 [0] : vector<32x8x128xf32> to vector<8x128xf32>
    %11 = arith.mulf %9, %9 : vector<32x8x128xf32>
    %cst_8 = arith.constant dense<0.000000e+00> : vector<8x128xf32>
    %12 = vector.multi_reduction <add>, %11, %cst_8 [0] : vector<32x8x128xf32> to vector<8x128xf32>
    %c0_9 = arith.constant 0 : index
    %c0_10 = arith.constant 0 : index
    %13 = vector.load %arg6[%c0_9, %c0_10] : memref<8x128xf32, #tpu.memory_space<vmem>>, vector<8x128xf32>
    %14 = arith.addf %13, %10 : vector<8x128xf32>
    %c0_11 = arith.constant 0 : index
    %c0_12 = arith.constant 0 : index
    %15 = vector.load %arg6[%c0_11, %c0_12] : memref<8x128xf32, #tpu.memory_space<vmem>>, vector<8x128xf32>
    tpu.vector_store %arg6[%c0_11, %c0_12], %14 {strides = array<i32>} : memref<8x128xf32, #tpu.memory_space<vmem>>, vector<8x128xf32>,
    %c0_13 = arith.constant 0 : index
    %c0_14 = arith.constant 0 : index
    %16 = vector.load %arg7[%c0_13, %c0_14] : memref<8x128xf32, #tpu.memory_space<vmem>>, vector<8x128xf32>
    %17 = arith.addf %16, %12 : vector<8x128xf32>
    %c0_15 = arith.constant 0 : index
    %c0_16 = arith.constant 0 : index
    %18 = vector.load %arg7[%c0_15, %c0_16] : memref<8x128xf32, #tpu.memory_space<vmem>>, vector<8x128xf32>
    tpu.vector_store %arg7[%c0_15, %c0_16], %17 {strides = array<i32>} : memref<8x128xf32, #tpu.memory_space<vmem>>, vector<8x128xf32>,
    return
  }
  func.func @transform_0(%arg0: i32, %arg1: i32, %arg2: i32) -> (i32, i32) {
    %c1_i32 = arith.constant 1 : i32
    %0 = arith.muli %arg0, %c1_i32 : i32
    %1 = arith.addi %0, %arg1 : i32
    %c0_i32 = arith.constant 0 : i32
    %c0_i32_0 = arith.constant 0 : i32
    return %1, %c0_i32 : i32, i32
  }
  func.func @transform_1(%arg0: i32, %arg1: i32, %arg2: i32) -> (i32, i32) {
    %c0_i32 = arith.constant 0 : i32
    %c0_i32_0 = arith.constant 0 : i32
    return %c0_i32, %arg2 : i32, i32
  }
  func.func @transform_2(%arg0: i32, %arg1: i32, %arg2: i32) -> (i32, i32) {
    %c1_i32 = arith.constant 1 : i32
    %0 = arith.muli %arg0, %c1_i32 : i32
    %1 = arith.addi %0, %arg1 : i32
    %c0_i32 = arith.constant 0 : i32
    return %1, %arg2 : i32, i32
  }
  func.func @transform_3(%arg0: i32, %arg1: i32, %arg2: i32) -> (i32, i32) {
    %c0_i32 = arith.constant 0 : i32
    %c0_i32_0 = arith.constant 0 : i32
    return %arg0, %c0_i32 : i32, i32
  }
  func.func @transform_4(%arg0: i32, %arg1: i32, %arg2: i32) -> (i32, i32) {
    %c0_i32 = arith.constant 0 : i32
    %c0_i32_0 = arith.constant 0 : i32
    return %arg0, %c0_i32 : i32, i32
  }
}

module attributes {stable_mosaic.version = 11 : i64} {
  func.func @kernel(%arg0: i32, %arg1: i32, %arg2: i32, %arg3: memref<256x4xf32, #tpu.memory_space<vmem>>, %arg4: memref<4x128xf32, #tpu.memory_space<vmem>>, %arg5: memref<256x128xf32, #tpu.memory_space<vmem>>, %arg6: memref<8x128xf32, #tpu.memory_space<vmem>>, %arg7: memref<8x128xf32, #tpu.memory_space<vmem>>) attributes {dimension_semantics = [#tpu.dimension_semantics<parallel>, #tpu.dimension_semantics<arbitrary>, #tpu.dimension_semantics<arbitrary>], iteration_bounds = array<i64: 2, 1, 1>, scalar_prefetch = 0 : i64, scratch_operands = 0 : i64, tpu.core_type = #tpu.core_type<tc>, window_params = [{transform_indices = @transform_0, window_bounds = array<i64: 256, 4>}, {transform_indices = @transform_1, window_bounds = array<i64: 4, 128>}, {transform_indices = @transform_2, window_bounds = array<i64: 256, 128>}, {transform_indices = @transform_3, window_bounds = array<i64: 8, 128>}, {transform_indices = @transform_4, window_bounds = array<i64: 8, 128>}]} {
    %c0_i32 = arith.constant 0 : i32
    %0 = arith.cmpi eq, %arg1, %c0_i32 : i32
    %c0_i32_0 = arith.constant 0 : i32
    %1 = arith.cmpi eq, %arg2, %c0_i32_0 : i32
    %2 = arith.andi %0, %1 : i1
    %3 = arith.extui %2 : i1 to i32
    %c0_i32_1 = arith.constant 0 : i32
    %4 = arith.cmpi ne, %3, %c0_i32_1 : i32
    scf.if %4 {
      %cst_17 = arith.constant 0.000000e+00 : f32
      %19 = vector.broadcast %cst_17 : f32 to vector<8x128xf32>
      %c0_18 = arith.constant 0 : index
      %c0_19 = arith.constant 0 : index
      %20 = vector.load %arg6[%c0_18, %c0_19] : memref<8x128xf32, #tpu.memory_space<vmem>>, vector<8x128xf32>
      tpu.vector_store %arg6[%c0_18, %c0_19], %19 {strides = array<i32>} : memref<8x128xf32, #tpu.memory_space<vmem>>, vector<8x128xf32>,
      %cst_20 = arith.constant 0.000000e+00 : f32
      %21 = vector.broadcast %cst_20 : f32 to vector<8x128xf32>
      %c0_21 = arith.constant 0 : index
      %c0_22 = arith.constant 0 : index
      %22 = vector.load %arg7[%c0_21, %c0_22] : memref<8x128xf32, #tpu.memory_space<vmem>>, vector<8x128xf32>
      tpu.vector_store %arg7[%c0_21, %c0_22], %21 {strides = array<i32>} : memref<8x128xf32, #tpu.memory_space<vmem>>, vector<8x128xf32>,
    } else {
    }
    %c0 = arith.constant 0 : index
    %c0_2 = arith.constant 0 : index
    %5 = vector.load %arg3[%c0, %c0_2] : memref<256x4xf32, #tpu.memory_space<vmem>>, vector<256x4xf32>
    %c0_3 = arith.constant 0 : index
    %c0_4 = arith.constant 0 : index
    %6 = vector.load %arg4[%c0_3, %c0_4] : memref<4x128xf32, #tpu.memory_space<vmem>>, vector<4x128xf32>
    %cst = arith.constant dense<0.000000e+00> : vector<256x128xf32>
    %7 = tpu.matmul %5, %6, %cst {dimension_numbers = #tpu.dot_dimension_numbers<[1], [0], [0], [1], [0, 0, 1, 1], [], []>} : vector<256x4xf32>, vector<4x128xf32>, vector<256x128xf32> -> vector<256x128xf32>
    %c0_5 = arith.constant 0 : index
    %c0_6 = arith.constant 0 : index
    %8 = vector.load %arg5[%c0_5, %c0_6] : memref<256x128xf32, #tpu.memory_space<vmem>>, vector<256x128xf32>
    tpu.vector_store %arg5[%c0_5, %c0_6], %7 {strides = array<i32>} : memref<256x128xf32, #tpu.memory_space<vmem>>, vector<256x128xf32>,
    %9 = vector.shape_cast %7 : vector<256x128xf32> to vector<32x8x128xf32>
    %cst_7 = arith.constant dense<0.000000e+00> : vector<8x128xf32>
    %10 = vector.multi_reduction <add>, %9, %cst_7 [0] : vector<32x8x128xf32> to vector<8x128xf32>
    %11 = arith.mulf %9, %9 : vector<32x8x128xf32>
    %cst_8 = arith.constant dense<0.000000e+00> : vector<8x128xf32>
    %12 = vector.multi_reduction <add>, %11, %cst_8 [0] : vector<32x8x128xf32> to vector<8x128xf32>
    %c0_9 = arith.constant 0 : index
    %c0_10 = arith.constant 0 : index
    %13 = vector.load %arg6[%c0_9, %c0_10] : memref<8x128xf32, #tpu.memory_space<vmem>>, vector<8x128xf32>
    %14 = arith.addf %13, %10 : vector<8x128xf32>
    %c0_11 = arith.constant 0 : index
    %c0_12 = arith.constant 0 : index
    %15 = vector.load %arg6[%c0_11, %c0_12] : memref<8x128xf32, #tpu.memory_space<vmem>>, vector<8x128xf32>
    tpu.vector_store %arg6[%c0_11, %c0_12], %14 {strides = array<i32>} : memref<8x128xf32, #tpu.memory_space<vmem>>, vector<8x128xf32>,
    %c0_13 = arith.constant 0 : index
    %c0_14 = arith.constant 0 : index
    %16 = vector.load %arg7[%c0_13, %c0_14] : memref<8x128xf32, #tpu.memory_space<vmem>>, vector<8x128xf32>
    %17 = arith.addf %16, %12 : vector<8x128xf32>
    %c0_15 = arith.constant 0 : index
    %c0_16 = arith.constant 0 : index
    %18 = vector.load %arg7[%c0_15, %c0_16] : memref<8x128xf32, #tpu.memory_space<vmem>>, vector<8x128xf32>
    tpu.vector_store %arg7[%c0_15, %c0_16], %17 {strides = array<i32>} : memref<8x128xf32, #tpu.memory_space<vmem>>, vector<8x128xf32>,
    return
  }
  func.func @transform_0(%arg0: i32, %arg1: i32, %arg2: i32) -> (i32, i32) {
    %c1_i32 = arith.constant 1 : i32
    %0 = arith.muli %arg0, %c1_i32 : i32
    %1 = arith.addi %0, %arg1 : i32
    %c0_i32 = arith.constant 0 : i32
    %c0_i32_0 = arith.constant 0 : i32
    return %1, %c0_i32 : i32, i32
  }
  func.func @transform_1(%arg0: i32, %arg1: i32, %arg2: i32) -> (i32, i32) {
    %c0_i32 = arith.constant 0 : i32
    %c0_i32_0 = arith.constant 0 : i32
    return %c0_i32, %arg2 : i32, i32
  }
  func.func @transform_2(%arg0: i32, %arg1: i32, %arg2: i32) -> (i32, i32) {
    %c1_i32 = arith.constant 1 : i32
    %0 = arith.muli %arg0, %c1_i32 : i32
    %1 = arith.addi %0, %arg1 : i32
    %c0_i32 = arith.constant 0 : i32
    return %1, %arg2 : i32, i32
  }
  func.func @transform_3(%arg0: i32, %arg1: i32, %arg2: i32) -> (i32, i32) {
    %c0_i32 = arith.constant 0 : i32
    %c0_i32_0 = arith.constant 0 : i32
    return %arg0, %c0_i32 : i32, i32
  }
  func.func @transform_4(%arg0: i32, %arg1: i32, %arg2: i32) -> (i32, i32) {
    %c0_i32 = arith.constant 0 : i32
    %c0_i32_0 = arith.constant 0 : i32
    return %arg0, %c0_i32 : i32, i32
  }
}

module attributes {stable_mosaic.version = 11 : i64} {
  func.func @_affine_add_relu_kernel(%arg0: i32, %arg1: memref<512x128xf32, #tpu.memory_space<vmem>>, %arg2: memref<1x128xf32, #tpu.memory_space<vmem>>, %arg3: memref<1x128xf32, #tpu.memory_space<vmem>>, %arg4: memref<512x128xf32, #tpu.memory_space<vmem>>, %arg5: memref<1x128xf32, #tpu.memory_space<vmem>>, %arg6: memref<1x128xf32, #tpu.memory_space<vmem>>, %arg7: memref<512x128xf32, #tpu.memory_space<vmem>>) attributes {dimension_semantics = [#tpu.dimension_semantics<parallel>], iteration_bounds = array<i64: 1>, scalar_prefetch = 0 : i64, scratch_operands = 0 : i64, tpu.core_type = #tpu.core_type<tc>, window_params = [{transform_indices = @transform_0, window_bounds = array<i64: 512, 128>}, {pipeline_mode = #tpu.pipeline_mode<synchronous>, transform_indices = @transform_1, window_bounds = array<i64: 1, 128>}, {pipeline_mode = #tpu.pipeline_mode<synchronous>, transform_indices = @transform_2, window_bounds = array<i64: 1, 128>}, {transform_indices = @transform_3, window_bounds = array<i64: 512, 128>}, {pipeline_mode = #tpu.pipeline_mode<synchronous>, transform_indices = @transform_4, window_bounds = array<i64: 1, 128>}, {pipeline_mode = #tpu.pipeline_mode<synchronous>, transform_indices = @transform_5, window_bounds = array<i64: 1, 128>}, {transform_indices = @transform_6, window_bounds = array<i64: 512, 128>}]} {
    %c0 = arith.constant 0 : index
    %c0_0 = arith.constant 0 : index
    %0 = vector.load %arg1[%c0, %c0_0] : memref<512x128xf32, #tpu.memory_space<vmem>>, vector<512x128xf32>
    %c0_1 = arith.constant 0 : index
    %c0_2 = arith.constant 0 : index
    %1 = vector.load %arg2[%c0_1, %c0_2] : memref<1x128xf32, #tpu.memory_space<vmem>>, vector<1x128xf32>
    %2 = vector.broadcast %1 : vector<1x128xf32> to vector<512x128xf32>
    %3 = arith.mulf %0, %2 : vector<512x128xf32>
    %c0_3 = arith.constant 0 : index
    %c0_4 = arith.constant 0 : index
    %4 = vector.load %arg3[%c0_3, %c0_4] : memref<1x128xf32, #tpu.memory_space<vmem>>, vector<1x128xf32>
    %5 = vector.broadcast %4 : vector<1x128xf32> to vector<512x128xf32>
    %6 = arith.addf %3, %5 : vector<512x128xf32>
    %c0_5 = arith.constant 0 : index
    %c0_6 = arith.constant 0 : index
    %7 = vector.load %arg4[%c0_5, %c0_6] : memref<512x128xf32, #tpu.memory_space<vmem>>, vector<512x128xf32>
    %c0_7 = arith.constant 0 : index
    %c0_8 = arith.constant 0 : index
    %8 = vector.load %arg5[%c0_7, %c0_8] : memref<1x128xf32, #tpu.memory_space<vmem>>, vector<1x128xf32>
    %9 = vector.broadcast %8 : vector<1x128xf32> to vector<512x128xf32>
    %10 = arith.mulf %7, %9 : vector<512x128xf32>
    %c0_9 = arith.constant 0 : index
    %c0_10 = arith.constant 0 : index
    %11 = vector.load %arg6[%c0_9, %c0_10] : memref<1x128xf32, #tpu.memory_space<vmem>>, vector<1x128xf32>
    %12 = vector.broadcast %11 : vector<1x128xf32> to vector<512x128xf32>
    %13 = arith.addf %10, %12 : vector<512x128xf32>
    %14 = arith.addf %6, %13 : vector<512x128xf32>
    %cst = arith.constant 0.000000e+00 : f32
    %15 = vector.broadcast %cst : f32 to vector<512x128xf32>
    %16 = arith.maximumf %14, %15 : vector<512x128xf32>
    %c0_11 = arith.constant 0 : index
    %c0_12 = arith.constant 0 : index
    %17 = vector.load %arg7[%c0_11, %c0_12] : memref<512x128xf32, #tpu.memory_space<vmem>>, vector<512x128xf32>
    tpu.vector_store %arg7[%c0_11, %c0_12], %16 {strides = array<i32>} : memref<512x128xf32, #tpu.memory_space<vmem>>, vector<512x128xf32>,
    return
  }
  func.func @transform_0(%arg0: i32) -> (i32, i32) {
    %c0_i32 = arith.constant 0 : i32
    %c0_i32_0 = arith.constant 0 : i32
    return %arg0, %c0_i32 : i32, i32
  }
  func.func @transform_1(%arg0: i32) -> (i32, i32) {
    %c0_i32 = arith.constant 0 : i32
    %c0_i32_0 = arith.constant 0 : i32
    %c0_i32_1 = arith.constant 0 : i32
    return %c0_i32, %c0_i32_0 : i32, i32
  }
  func.func @transform_2(%arg0: i32) -> (i32, i32) {
    %c0_i32 = arith.constant 0 : i32
    %c0_i32_0 = arith.constant 0 : i32
    %c0_i32_1 = arith.constant 0 : i32
    return %c0_i32, %c0_i32_0 : i32, i32
  }
  func.func @transform_3(%arg0: i32) -> (i32, i32) {
    %c0_i32 = arith.constant 0 : i32
    %c0_i32_0 = arith.constant 0 : i32
    return %arg0, %c0_i32 : i32, i32
  }
  func.func @transform_4(%arg0: i32) -> (i32, i32) {
    %c0_i32 = arith.constant 0 : i32
    %c0_i32_0 = arith.constant 0 : i32
    %c0_i32_1 = arith.constant 0 : i32
    return %c0_i32, %c0_i32_0 : i32, i32
  }
  func.func @transform_5(%arg0: i32) -> (i32, i32) {
    %c0_i32 = arith.constant 0 : i32
    %c0_i32_0 = arith.constant 0 : i32
    %c0_i32_1 = arith.constant 0 : i32
    return %c0_i32, %c0_i32_0 : i32, i32
  }
  func.func @transform_6(%arg0: i32) -> (i32, i32) {
    %c0_i32 = arith.constant 0 : i32
    %c0_i32_0 = arith.constant 0 : i32
    return %arg0, %c0_i32 : i32, i32
  }
}

</mosaic_0001>

<bundles_post_ra>
// kernel: basic_block_forward.4
= control target key start
LH: loop header
LB: loop body
LE: loop exit
PB: predicated region body
PF: predicated region fallthrough
CT: control target
= control target key end

     0   :  { %10 = vsyncpa [#allocation3], 0  ;;  %s1222_s15 = smov 0   ;;  %s1224_s16 = smov 0   ;;  %s1490_s0 = inlined_call_operand.vmem [shape: f32[512,36], index: 0, kind: input, shape index: {}]   ;;  %s1491_s1 = inlined_call_operand.hbm [shape: f32[36,128], index: 1, kind: input, shape index: {}]   ;;  %s1492_s2 = inlined_call_operand.vmem [shape: f32[512,128], index: 2, kind: output, shape index: {0}]   ;;  %s1493_s3 = inlined_call_operand.vmem [shape: f32[16,128], index: 3, kind: output, shape index: {1}]   ;;  %s1494_s4 = inlined_call_operand.vmem [shape: f32[16,128], index: 4, kind: output, shape index: {2}]  }
   0x1   :  { %s1226_s17 = smov 0  }
   0x2 LB: > { %s943_s18 = sadd.s32 4294967295, %s1192_s17   ;;  %s35_s19 = sadd.s32 1, %s1188_s16  ;;  %s1192_s17 = sphi %s1226_s17, %s16_s17   ;;  %s1188_s16 = sphi %s1224_s16, %s1504_s16   ;;  %s1184_s15 = sphi %s1222_s15, %s1503_s15  }
   0x3   : > { %p37_p0 = scmp.ge.s32.totalorder %s35_s19, 2  ;;  %p945_p1 = scmp.ge.s32.totalorder %s1192_s17, 1 }
   0x4   : > { %p176_p2 = scmp.lt.s32.totalorder %s1192_s17, 3  ;;  %p1247_p4 = scmp.eq.s32.totalorder %s943_s18, 0 }
   0x5   : > { %s1506_s19 = smov (%p37_p0, %s35_s19), 0  ;;  %s1194_s22 = smov [#allocation2]  }
   0x6   : > { %p1243_p3 = pnand %p945_p1, %p176_p2  ;;  %s190_s23 = sshll.u32 %s1194_s22, 4  ;;  %s191_s23 = int_to_ptr.vmem [resolvable:$true] %s190_s23 }
   0x7   : > { %s1499_s21 = scalar_select %p1247_p4, 1, 0 }
   0x8   : > { %s1498_s20 = scalar_select %p1243_p3, 1, 0 }
   0x9   : > { %p1104_p5 = pneg %p1243_p3  ;;  %s1138_s27 = scalar_lea.hbm %s1491_s1, 640 }
   0xa   : > { %p1139_p7 = scmp.ne.s32.totalorder %s1491_s1, %s1138_s27  ;;  %p1145_p11 = scmp.lt.u32.totalorder %s1138_s27, %s1491_s1 }
   0xb   : > { %p1255_p6 = pnand %p1247_p4, %p1104_p5 }
   0xd   : > { %p1140_p8 = pneg %p1255_p6 }
   0xf   : > { %p1141_p9 = pnand %p1140_p8, %p1139_p7 }
  0x11   : > { %p1142_p10 = pneg %p1141_p9 }
  0x13   : > { %p1147_p12 = pnand %p1145_p11, %p1142_p10 }
  0x15   : > { %1150 = shalt.err (!%p1147_p12)
}
  0x16   : > { %s1151_s6 = scalar_lea.vmem %s191_s23, 640  ;;  %p1159_p2 = scmp.lt.s32.totalorder %s191_s23, %s191_s23 }
  0x17   : > { %p1152_p13 = scmp.ne.s32.totalorder %s191_s23, %s1151_s6  ;;  %p1160_p5 = scmp.lt.s32.totalorder %s1151_s6, %s1151_s6 }
  0x19   : > { %p1154_p0 = pnand %p1152_p13, %p1140_p8  ;;  %p1161_p4 = por %p1160_p5, %p1159_p2 }
  0x1b   : > { %p1155_p1 = pneg %p1154_p0 }
  0x1d   : > { %p1162_p3 = pnand %p1161_p4, %p1155_p1 }
  0x1f   : > { %1165 = shalt.err (!%p1162_p3)
}
  0x20   : > { %s1195_s7 = smov 128   ;;  %s1196_s8 = smov 8  }
  0x21   : > { %1107 = dma.hbm_to_vmem [thread:$0]  (!%p1255_p6), %s1491_s1, 640, %s191_s23, [#allocation3], %s1195_s7, %s1195_s7, %s1196_s8  }
  0x22   : > { %p1501_p7 = scmp.ne.s32.totalorder %s1498_s20, 0 }
  0x23   : > { %p1502_p9 = scmp.ne.s32.totalorder (!%p1501_p7), %s1499_s21, 0 }
  0x24   : > { %217 = sbr.rel (%p1501_p7) target bundleno = 337 (0x151), region = 28 }
  0x2b   : > { %1179 = dma.done.wait (%p1502_p9), [#allocation3], 640  }
  0x2c   : > { %1181 = vsyncadd (%p1502_p9), [#allocation3], 4294966656  ;;  %s950_s11 = sshll.u32 %s1184_s15, 5  ;;  %vm328_vm0 = vcmask 293888   ;;  %v323_v0 = vld [vmem:[#allocation2] sm:$0xff]  ;;  %v324_v1 = vld [vmem:[#allocation2 + $0x8] sm:$0xff] }
  0x2d   : > { %p258_p3 = scmp.lt.s32.totalorder %s950_s11, 63  ;;  %v325_v2 = vld [vmem:[#allocation2 + $0x10] sm:$0xff]  ;;  %v1086_v3 = vpack.c.bf16 %v324_v1, %v323_v0  ;;  %v326_v4 = vld [vmem:[#allocation2 + $0x18] sm:$0xff]  ;;  %v327_v7 = vld [vmem:[#allocation2 + $0x20] sm:$0xf]  ;;  %vm425_vm1 = vcmask 1043456  }
  0x2e   : > { %v1090_v6 = vpack.c.bf16 %v326_v4, %v325_v2  ;;  %p275_p4 = scmp.lt.s32.totalorder %s1184_s15, 1 }
  0x2f   : > { %s1508_s11 = smov (!%p258_p3, %s950_s11), 63  ;;  %1087 = vmatprep.subr.bf16.mxu0 %v1086_v3  ;;  %1094 = vmatprep.subr.bf16.mxu1 %v1086_v3 }
  0x30   : > { %s951_s12 = sshll.u32 %s1508_s11, 3  ;;  %1089 = vmatpush3.bf16.msra.mxu0 %v1086_v3  ;;  %1097 = vmatpush3.bf16.msra.mxu1 %v1086_v3  ;;  %s1510_s15 = smov (!%p275_p4, %s1184_s15), 1 }
  0x31   : > { %s1290_s18 = scalar_lea.vmem %s1490_s0, %s951_s12  ;;  %1091 = vmatprep.subr.bf16.mxu0 %v1090_v6  ;;  %1095 = vmatprep.subr.bf16.mxu1 %v1090_v6  ;;  %s1361_s22 = scalar_lea.vmem %s1492_s2, %s951_s12 }
  0x32   : > { %v291_v5 = vld [vmem:[%s1290_s18] sm:$0xff]  ;;  %v292_v9 = vld [vmem:[%s1290_s18 + $0x8] sm:$0xff]  ;;  %v293_v11 = vld [vmem:[%s1290_s18 + $0x10] sm:$0xff]  ;;  %s954_s23 = sshll.u32 %s1510_s15, 3 }
  0x33   : > { %1038 = vmatprep.mubr.msk.f32.mxu0 %vm328_vm0, %v291_v5  ;;  %v307_v8 = vld [vmem:[%s1290_s18 + $0x80] sm:$0xff]  ;;  %v308_v10 = vld [vmem:[%s1290_s18 + $0x88] sm:$0xff]  ;;  %v309_v12 = vld [vmem:[%s1290_s18 + $0x90] sm:$0xff]  ;;  %s278_s26 = scalar_lea.vmem %s1493_s3, %s954_s23  ;;  %s282_s29 = scalar_lea.vmem %s1494_s4, %s954_s23 }
  0x34   : > { %1093 = vmatpush3.bf16.msra.mxu0 %v1090_v6  ;;  %1098 = vmatpush3.bf16.msra.mxu1 %v1090_v6  ;;  %v294_v13 = vld [vmem:[%s1290_s18 + $0x18] sm:$0xff]  ;;  %v295_v15 = vld [vmem:[%s1290_s18 + $0x20] sm:$0xff]  ;;  %v296_v17 = vld [vmem:[%s1290_s18 + $0x28] sm:$0xff] }
  0x35   : > { %1036 = vmatprep.subr.msk.mxu0 %vm425_vm1, %v327_v7  ;;  %1096 = vmatprep.subr.msk.mxu1 %vm425_vm1, %v327_v7  ;;  %v310_v14 = vld [vmem:[%s1290_s18 + $0x98] sm:$0xff]  ;;  %v311_v16 = vld [vmem:[%s1290_s18 + $0xa0] sm:$0xff]  ;;  %v312_v18 = vld [vmem:[%s1290_s18 + $0xa8] sm:$0xff] }
  0x36   : > { %1062 = vmatprep.mubr.msk.f32.mxu1 %vm328_vm0, %v307_v8  ;;  %v297_v19 = vld [vmem:[%s1290_s18 + $0x30] sm:$0xff]  ;;  %v298_v21 = vld [vmem:[%s1290_s18 + $0x38] sm:$0xff]  ;;  %v299_v23 = vld [vmem:[%s1290_s18 + $0x40] sm:$0xff] }
  0x37   : > { %v313_v20 = vld [vmem:[%s1290_s18 + $0xb0] sm:$0xff]  ;;  %v314_v22 = vld [vmem:[%s1290_s18 + $0xb8] sm:$0xff]  ;;  %v315_v24 = vld [vmem:[%s1290_s18 + $0xc0] sm:$0xff] }
  0x38   : > { %1037 = vmatpush3.msk.msra.mxu0 %vm425_vm1, %v327_v7  ;;  %1099 = vmatpush3.msk.msra.mxu1 %vm425_vm1, %v327_v7  ;;  %v300_v25 = vld [vmem:[%s1290_s18 + $0x48] sm:$0xff]  ;;  %v301_v27 = vld [vmem:[%s1290_s18 + $0x50] sm:$0xff]  ;;  %v302_v29 = vld [vmem:[%s1290_s18 + $0x58] sm:$0xff] }
  0x39   : > { %1039 = vmatmul.mubr.msk.f32.vlgmr.msra.gmra.mrb[0].mxu0 %vm328_vm0, %v292_v9  ;;  %1063 = vmatmul.mubr.msk.f32.vlgmr.msra.gmra.mrb[0].mxu1 %vm328_vm0, %v308_v10  ;;  %v316_v26 = vld [vmem:[%s1290_s18 + $0xc8] sm:$0xff]  ;;  %v317_v28 = vld [vmem:[%s1290_s18 + $0xd0] sm:$0xff]  ;;  %v318_v30 = vld [vmem:[%s1290_s18 + $0xd8] sm:$0xff] }
  0x3a   : > { %1041 = vmatprep.mubr.msk.f32.mxu0 %vm328_vm0, %v293_v11  ;;  %1065 = vmatprep.mubr.msk.f32.mxu1 %vm328_vm0, %v309_v12  ;;  %v303_v31 = vld [vmem:[%s1290_s18 + $0x60] sm:$0xff]  ;;  %v304_v33 = vld [vmem:[%s1290_s18 + $0x68] sm:$0xff]  ;;  %v305_v35 = vld [vmem:[%s1290_s18 + $0x70] sm:$0xff] }
  0x3b   : > { %v319_v32 = vld [vmem:[%s1290_s18 + $0xe0] sm:$0xff]  ;;  %v320_v34 = vld [vmem:[%s1290_s18 + $0xe8] sm:$0xff]  ;;  %v321_v36 = vld [vmem:[%s1290_s18 + $0xf0] sm:$0xff] }
  0x3c   : > { %v306_v37 = vld [vmem:[%s1290_s18 + $0x78] sm:$0xff] }
  0x3d   : > { %1042 = vmatmul.mubr.msk.f32.gmra.mrb[2].mxu0 %vm328_vm0, %v294_v13  ;;  %1066 = vmatmul.mubr.msk.f32.gmra.mrb[2].mxu1 %vm328_vm0, %v310_v14  ;;  %v322_v38 = vld [vmem:[%s1290_s18 + $0xf8] sm:$0xff] }
  0x3e   : > { %1044 = vmatprep.mubr.msk.f32.mxu0 %vm328_vm0, %v295_v15  ;;  %1068 = vmatprep.mubr.msk.f32.mxu1 %vm328_vm0, %v311_v16 }
  0x41   : > { %1045 = vmatmul.mubr.msk.f32.gmra.mrb[4].mxu0 %vm328_vm0, %v296_v17  ;;  %1069 = vmatmul.mubr.msk.f32.gmra.mrb[4].mxu1 %vm328_vm0, %v312_v18 }
  0x42   : > { %1047 = vmatprep.mubr.msk.f32.mxu0 %vm328_vm0, %v297_v19  ;;  %1071 = vmatprep.mubr.msk.f32.mxu1 %vm328_vm0, %v313_v20 }
  0x45   : > { %1048 = vmatmul.mubr.msk.f32.gmra.mrb[6].mxu0 %vm328_vm0, %v298_v21  ;;  %1072 = vmatmul.mubr.msk.f32.gmra.mrb[6].mxu1 %vm328_vm0, %v314_v22 }
  0x46   : > { %1050 = vmatprep.mubr.msk.f32.mxu0 %vm328_vm0, %v299_v23  ;;  %1074 = vmatprep.mubr.msk.f32.mxu1 %vm328_vm0, %v315_v24 }
  0x49   : > { %1051 = vmatmul.mubr.msk.f32.gmra.mrb[8].mxu0 %vm328_vm0, %v300_v25  ;;  %1075 = vmatmul.mubr.msk.f32.gmra.mrb[8].mxu1 %vm328_vm0, %v316_v26 }
  0x4a   : > { %1053 = vmatprep.mubr.msk.f32.mxu0 %vm328_vm0, %v301_v27  ;;  %1077 = vmatprep.mubr.msk.f32.mxu1 %vm328_vm0, %v317_v28 }
  0x4d   : > { %1054 = vmatmul.mubr.msk.f32.gmra.mrb[10].mxu0 %vm328_vm0, %v302_v29  ;;  %1078 = vmatmul.mubr.msk.f32.gmra.mrb[10].mxu1 %vm328_vm0, %v318_v30 }
  0x4e   : > { %1056 = vmatprep.mubr.msk.f32.mxu0 %vm328_vm0, %v303_v31  ;;  %1080 = vmatprep.mubr.msk.f32.mxu1 %vm328_vm0, %v319_v32 }
  0x51   : > { %1057 = vmatmul.mubr.msk.f32.gmra.mrb[12].mxu0 %vm328_vm0, %v304_v33  ;;  %1081 = vmatmul.mubr.msk.f32.gmra.mrb[12].mxu1 %vm328_vm0, %v320_v34 }
  0x52   : > { %1059 = vmatprep.mubr.msk.f32.mxu0 %vm328_vm0, %v305_v35  ;;  %1083 = vmatprep.mubr.msk.f32.mxu1 %vm328_vm0, %v321_v36 }
  0x55   : > { %1060 = vmatmul.mubr.msk.f32.gmra.mrb[14].mxu0 %vm328_vm0, %v306_v37  ;;  %1084 = vmatmul.mubr.msk.f32.gmra.mrb[14].mxu1 %vm328_vm0, %v322_v38 }
 0x10c   : > { %v1040_v39 = vpop.f32.mrb[0].mxu0  ;;  %v1363_v40 = vpop.f32.mrb[0].mxu1 }
 0x10d   : > { %655 = vst [vmem:[%s1361_s22 + $0x8] sm:$0xff] %v1040_v39  ;;  %v718_v41 = vmul.f32 %v1040_v39, %v1040_v39  ;;  %v495_v42 = vpop.f32.mrb[1].mxu0  ;;  %671 = vst [vmem:[%s1361_s22 + $0x88] sm:$0xff] %v1363_v40  ;;  %v1368_v43 = vpop.f32.mrb[1].mxu1 }
 0x10e   : > { %654 = vst [vmem:[%s1361_s22] sm:$0xff] %v495_v42  ;;  %v686_v44 = vadd.f32 %v1040_v39, %v495_v42  ;;  %v717_v45 = vmul.f32 %v495_v42, %v495_v42  ;;  %670 = vst [vmem:[%s1361_s22 + $0x80] sm:$0xff] %v1368_v43 }
 0x110   : > { %v749_v46 = vadd.f32 %v718_v41, %v717_v45  ;;  %v1043_v47 = vpop.f32.mrb[2].mxu0  ;;  %v1373_v48 = vpop.f32.mrb[2].mxu1 }
 0x111   : > { %657 = vst [vmem:[%s1361_s22 + $0x18] sm:$0xff] %v1043_v47  ;;  %v505_v49 = vpop.f32.mrb[3].mxu0  ;;  %673 = vst [vmem:[%s1361_s22 + $0x98] sm:$0xff] %v1373_v48  ;;  %v1378_v50 = vpop.f32.mrb[3].mxu1  ;;  %v720_v53 = vmul.f32 %v1043_v47, %v1043_v47 }
 0x112   : > { %656 = vst [vmem:[%s1361_s22 + $0x10] sm:$0xff] %v505_v49  ;;  %v687_v51 = vadd.f32 %v686_v44, %v505_v49  ;;  %v719_v52 = vmul.f32 %v505_v49, %v505_v49  ;;  %672 = vst [vmem:[%s1361_s22 + $0x90] sm:$0xff] %v1378_v50 }
 0x114   : > { %v750_v54 = vadd.f32 %v749_v46, %v719_v52  ;;  %v1046_v55 = vpop.f32.mrb[4].mxu0  ;;  %v688_v56 = vadd.f32 %v1043_v47, %v687_v51  ;;  %v1383_v57 = vpop.f32.mrb[4].mxu1 }
 0x115   : > { %659 = vst [vmem:[%s1361_s22 + $0x28] sm:$0xff] %v1046_v55  ;;  %v515_v58 = vpop.f32.mrb[5].mxu0  ;;  %675 = vst [vmem:[%s1361_s22 + $0xa8] sm:$0xff] %v1383_v57  ;;  %v1388_v59 = vpop.f32.mrb[5].mxu1  ;;  %v722_v63 = vmul.f32 %v1046_v55, %v1046_v55 }
 0x116   : > { %658 = vst [vmem:[%s1361_s22 + $0x20] sm:$0xff] %v515_v58  ;;  %v689_v60 = vadd.f32 %v688_v56, %v515_v58  ;;  %v721_v61 = vmul.f32 %v515_v58, %v515_v58  ;;  %v751_v62 = vadd.f32 %v750_v54, %v720_v53  ;;  %674 = vst [vmem:[%s1361_s22 + $0xa0] sm:$0xff] %v1388_v59 }
 0x117   : > { %v733_v56 = vmul.f32 %v1368_v43, %v1368_v43 }
 0x118   : > { %v752_v0 = vadd.f32 %v751_v62, %v721_v61  ;;  %v1049_v1 = vpop.f32.mrb[6].mxu0  ;;  %v690_v2 = vadd.f32 %v1046_v55, %v689_v60  ;;  %v1393_v3 = vpop.f32.mrb[6].mxu1  ;;  %v734_v61 = vmul.f32 %v1363_v40, %v1363_v40 }
 0x119   : > { %661 = vst [vmem:[%s1361_s22 + $0x38] sm:$0xff] %v1049_v1  ;;  %v525_v4 = vpop.f32.mrb[7].mxu0  ;;  %677 = vst [vmem:[%s1361_s22 + $0xb8] sm:$0xff] %v1393_v3  ;;  %v1398_v5 = vpop.f32.mrb[7].mxu1  ;;  %v724_v9 = vmul.f32 %v1049_v1, %v1049_v1 }
 0x11a   : > { %660 = vst [vmem:[%s1361_s22 + $0x30] sm:$0xff] %v525_v4  ;;  %v691_v6 = vadd.f32 %v690_v2, %v525_v4  ;;  %v723_v7 = vmul.f32 %v525_v4, %v525_v4  ;;  %v753_v8 = vadd.f32 %v752_v0, %v722_v63  ;;  %676 = vst [vmem:[%s1361_s22 + $0xb0] sm:$0xff] %v1398_v5 }
 0x11b   : > { %v735_v0 = vmul.f32 %v1378_v50, %v1378_v50  ;;  %v736_v4 = vmul.f32 %v1373_v48, %v1373_v48 }
 0x11c   : > { %v754_v10 = vadd.f32 %v753_v8, %v723_v7  ;;  %v1052_v11 = vpop.f32.mrb[8].mxu0  ;;  %v692_v12 = vadd.f32 %v1049_v1, %v691_v6  ;;  %v1403_v13 = vpop.f32.mrb[8].mxu1 }
 0x11d   : > { %663 = vst [vmem:[%s1361_s22 + $0x48] sm:$0xff] %v1052_v11  ;;  %v535_v14 = vpop.f32.mrb[9].mxu0  ;;  %679 = vst [vmem:[%s1361_s22 + $0xc8] sm:$0xff] %v1403_v13  ;;  %v1408_v15 = vpop.f32.mrb[9].mxu1  ;;  %v726_v19 = vmul.f32 %v1052_v11, %v1052_v11 }
 0x11e   : > { %662 = vst [vmem:[%s1361_s22 + $0x40] sm:$0xff] %v535_v14  ;;  %v693_v16 = vadd.f32 %v692_v12, %v535_v14  ;;  %v725_v17 = vmul.f32 %v535_v14, %v535_v14  ;;  %v755_v18 = vadd.f32 %v754_v10, %v724_v9  ;;  %678 = vst [vmem:[%s1361_s22 + $0xc0] sm:$0xff] %v1408_v15 }
 0x120   : > { %v756_v20 = vadd.f32 %v755_v18, %v725_v17  ;;  %v1055_v21 = vpop.f32.mrb[10].mxu0  ;;  %v694_v22 = vadd.f32 %v1052_v11, %v693_v16  ;;  %v1413_v23 = vpop.f32.mrb[10].mxu1  ;;  %v741_v17 = vmul.f32 %v1408_v15, %v1408_v15 }
 0x121   : > { %665 = vst [vmem:[%s1361_s22 + $0x58] sm:$0xff] %v1055_v21  ;;  %v545_v24 = vpop.f32.mrb[11].mxu0  ;;  %681 = vst [vmem:[%s1361_s22 + $0xd8] sm:$0xff] %v1413_v23  ;;  %v1418_v25 = vpop.f32.mrb[11].mxu1  ;;  %v728_v29 = vmul.f32 %v1055_v21, %v1055_v21 }
 0x122   : > { %664 = vst [vmem:[%s1361_s22 + $0x50] sm:$0xff] %v545_v24  ;;  %v695_v26 = vadd.f32 %v694_v22, %v545_v24  ;;  %v727_v27 = vmul.f32 %v545_v24, %v545_v24  ;;  %v757_v28 = vadd.f32 %v756_v20, %v726_v19  ;;  %680 = vst [vmem:[%s1361_s22 + $0xd0] sm:$0xff] %v1418_v25 }
 0x123   : > { %v742_v19 = vmul.f32 %v1403_v13, %v1403_v13 }
 0x124   : > { %v758_v30 = vadd.f32 %v757_v28, %v727_v27  ;;  %v1058_v31 = vpop.f32.mrb[12].mxu0  ;;  %v696_v32 = vadd.f32 %v1055_v21, %v695_v26  ;;  %v1423_v33 = vpop.f32.mrb[12].mxu1  ;;  %v743_v21 = vmul.f32 %v1418_v25, %v1418_v25 }
 0x125   : > { %667 = vst [vmem:[%s1361_s22 + $0x68] sm:$0xff] %v1058_v31  ;;  %v555_v34 = vpop.f32.mrb[13].mxu0  ;;  %683 = vst [vmem:[%s1361_s22 + $0xe8] sm:$0xff] %v1423_v33  ;;  %v635_v35 = vpop.f32.mrb[13].mxu1  ;;  %v730_v39 = vmul.f32 %v1058_v31, %v1058_v31 }
 0x126   : > { %666 = vst [vmem:[%s1361_s22 + $0x60] sm:$0xff] %v555_v34  ;;  %v697_v36 = vadd.f32 %v696_v32, %v555_v34  ;;  %v729_v37 = vmul.f32 %v555_v34, %v555_v34  ;;  %v759_v38 = vadd.f32 %v758_v30, %v728_v29  ;;  %682 = vst [vmem:[%s1361_s22 + $0xe0] sm:$0xff] %v635_v35 }
 0x127   : > { %v745_v27 = vmul.f32 %v635_v35, %v635_v35 }
 0x128   : > { %v760_v41 = vadd.f32 %v759_v38, %v729_v37  ;;  %v1061_v42 = vpop.f32.mrb[14].mxu0  ;;  %v698_v44 = vadd.f32 %v1058_v31, %v697_v36  ;;  %v1085_v45 = vpop.f32.mrb[14].mxu1 }
 0x129   : > { %669 = vst [vmem:[%s1361_s22 + $0x78] sm:$0xff] %v1061_v42  ;;  %v565_v46 = vpop.f32.mrb[15].mxu0  ;;  %685 = vst [vmem:[%s1361_s22 + $0xf8] sm:$0xff] %v1085_v45  ;;  %v645_v47 = vpop.f32.mrb[15].mxu1  ;;  %v732_v53 = vmul.f32 %v1061_v42, %v1061_v42  ;;  %v748_v36 = vmul.f32 %v1085_v45, %v1085_v45 }
 0x12a   : > { %668 = vst [vmem:[%s1361_s22 + $0x70] sm:$0xff] %v565_v46  ;;  %v699_v49 = vadd.f32 %v698_v44, %v565_v46  ;;  %v731_v51 = vmul.f32 %v565_v46, %v565_v46  ;;  %v761_v52 = vadd.f32 %v760_v41, %v730_v39  ;;  %684 = vst [vmem:[%s1361_s22 + $0xf0] sm:$0xff] %v645_v47 }
 0x12b   : > { %v747_v32 = vmul.f32 %v645_v47, %v645_v47 }
 0x12c   : > { %v700_v54 = vadd.f32 %v1061_v42, %v699_v49  ;;  %v762_v55 = vadd.f32 %v761_v52, %v731_v51 }
 0x12e   : > { %v763_v58 = vadd.f32 %v762_v55, %v732_v53  ;;  %v701_v60 = vadd.f32 %v700_v54, %v1368_v43  ;;  %v737_v43 = vmul.f32 %v1388_v59, %v1388_v59 }
 0x130   : > { %v764_v62 = vadd.f32 %v763_v58, %v733_v56  ;;  %v702_v63 = vadd.f32 %v1363_v40, %v701_v60  ;;  %v738_v40 = vmul.f32 %v1383_v57, %v1383_v57 }
 0x132   : > { %v703_v1 = vadd.f32 %v702_v63, %v1378_v50  ;;  %v765_v2 = vadd.f32 %v764_v62, %v734_v61  ;;  %v739_v50 = vmul.f32 %v1398_v5, %v1398_v5 }
 0x134   : > { %v766_v6 = vadd.f32 %v765_v2, %v735_v0  ;;  %v704_v7 = vadd.f32 %v1373_v48, %v703_v1  ;;  %v740_v48 = vmul.f32 %v1393_v3, %v1393_v3 }
 0x136   : > { %v705_v8 = vadd.f32 %v704_v7, %v1388_v59  ;;  %v767_v9 = vadd.f32 %v766_v6, %v736_v4 }
 0x138   : > { %v768_v10 = vadd.f32 %v767_v9, %v737_v43  ;;  %v706_v11 = vadd.f32 %v1383_v57, %v705_v8 }
 0x13a   : > { %v707_v12 = vadd.f32 %v706_v11, %v1398_v5  ;;  %v769_v14 = vadd.f32 %v768_v10, %v738_v40 }
 0x13c   : > { %v770_v16 = vadd.f32 %v769_v14, %v739_v50  ;;  %v708_v59 = vadd.f32 %v1393_v3, %v707_v12  ;;  %v744_v3 = vmul.f32 %v1413_v23, %v1413_v23 }
 0x13e   : > { %v709_v18 = vadd.f32 %v708_v59, %v1408_v15  ;;  %v771_v57 = vadd.f32 %v770_v16, %v740_v48 }
 0x140   : > { %v772_v20 = vadd.f32 %v771_v57, %v741_v17  ;;  %v710_v5 = vadd.f32 %v1403_v13, %v709_v18  ;;  %v746_v13 = vmul.f32 %v1423_v33, %v1423_v33 }
 0x142   : > { %v711_v22 = vadd.f32 %v710_v5, %v1418_v25  ;;  %v773_v24 = vadd.f32 %v772_v20, %v742_v19 }
 0x144   : > { %v774_v26 = vadd.f32 %v773_v24, %v743_v21  ;;  %v712_v15 = vadd.f32 %v1413_v23, %v711_v22 }
 0x146   : > { %v713_v28 = vadd.f32 %v712_v15, %v635_v35  ;;  %v775_v29 = vadd.f32 %v774_v26, %v744_v3 }
 0x148   : > { %v776_v30 = vadd.f32 %v775_v29, %v745_v27  ;;  %v714_v31 = vadd.f32 %v1423_v33, %v713_v28 }
 0x14a   : > { %v715_v25 = vadd.f32 %v714_v31, %v645_v47  ;;  %v777_v34 = vadd.f32 %v776_v30, %v746_v13 }
 0x14c   : > { %v716_v37 = vadd.f32 %v1085_v45, %v715_v25  ;;  %v778_v38 = vadd.f32 %v777_v34, %v747_v32 }
 0x14e   : > { %v779_v23 = vadd.f32 %v778_v38, %v748_v36  ;;  %782 = vst [vmem:[%s278_s26] sm:$0xff] %v716_v37 }
 0x150   : > { %785 = vst [vmem:[%s282_s29] sm:$0xff] %v779_v23 }
 0x151 PF: > { %s16_s17 = sadd.s32 1, %s1192_s17   ;;  %s1503_s15 = smov %s1188_s16 }
 0x152   : > { %p13_p6 = scmp.ge.s32.totalorder %s16_s17, 4   ;;  %s1504_s16 = smov %s1506_s19 }
 0x154   :  { %15 = sbr.rel (!%p13_p6) target bundleno = 2 (0x2), region = 92 }
 0x15b   :  { %845 = vsyncpa [#allocation3], 1 }
 0x15c   :  { %847 = vsyncpa [#allocation3 + $0x1], 1 }

// kernel: basic_block_forward.6
= control target key start
LH: loop header
LB: loop body
LE: loop exit
PB: predicated region body
PF: predicated region fallthrough
CT: control target
= control target key end

     0   :  { %s2747_s15 = smov 0   ;;  %s2749_s16 = smov 0   ;;  %s4044_s0 = inlined_call_operand.vmem [shape: f32[512,1152], index: 0, kind: input, shape index: {}]   ;;  %s4045_s1 = inlined_call_operand.vmem [shape: f32[1152,128], index: 1, kind: input, shape index: {}]   ;;  %s4046_s2 = inlined_call_operand.vmem [shape: f32[512,128], index: 2, kind: output, shape index: {0}]   ;;  %s4047_s3 = inlined_call_operand.vmem [shape: f32[16,128], index: 3, kind: output, shape index: {1}]   ;;  %s4048_s4 = inlined_call_operand.vmem [shape: f32[16,128], index: 4, kind: output, shape index: {2}]  }
   0x1   :  { %s2751_s17 = smov 0  }
   0x2 LB: > { %s34_s18 = sadd.s32 1, %s2715_s16  ;;  %p2141_p0 = scmp.ge.s32.totalorder %s2719_s17, 1  ;;  %s2719_s17 = sphi %s2751_s17, %s15_s17   ;;  %s2715_s16 = sphi %s2749_s16, %s4050_s16   ;;  %s2711_s15 = sphi %s2747_s15, %s4049_s15  }
   0x3   : > { %p36_p1 = scmp.ge.s32.totalorder %s34_s18, 2  ;;  %p205_p2 = scmp.lt.s32.totalorder %s2719_s17, 3 }
   0x5   : > { %s4052_s18 = smov (%p36_p1, %s34_s18), 0  ;;  %p206_p3 = pnand %p2141_p0, %p205_p2 }
   0x6   : > { %v577_v0 = vld [vmem:[%s4045_s1] sm:$0xff] (!%p206_p3)  ;;  %v578_v1 = vld [vmem:[%s4045_s1 + $0x8] sm:$0xff] (!%p206_p3)  ;;  %v2721_v3 = vmov (!%p206_p3), 0.0|0.0   ;;  %v579_v6 = vld [vmem:[%s4045_s1 + $0x10] sm:$0xff] (!%p206_p3)  ;;  %s2142_s9 = sshll.u32 (!%p206_p3), %s2711_s15, 5  ;;  %p273_p5 = scmp.lt.s32.totalorder (!%p206_p3), %s2711_s15, 1 }
   0x7   : > { %209 = sbr.rel (%p206_p3) target bundleno = 626 (0x272), region = 28  ;;  %v609_v2 = vld [vmem:[%s4045_s1 + $0x100] sm:$0xff] (!%p206_p3)  ;;  %2278 = vmatprep.subr.bf16.mxu1 (!%p206_p3), %v2721_v3  ;;  %2326 = vmatprep.subr.bf16.mxu0 (!%p206_p3), %v2721_v3  ;;  %v2279_v4 = vpack.c.bf16 (!%p206_p3), %v578_v1, %v577_v0  ;;  %v610_v5 = vld [vmem:[%s4045_s1 + $0x108] sm:$0xff] (!%p206_p3)  ;;  %v580_v7 = vld [vmem:[%s4045_s1 + $0x18] sm:$0xff] (!%p206_p3)  ;;  %p251_p4 = scmp.lt.s32.totalorder (!%p206_p3), %s2142_s9, 63 }
   0x8   : > { %v2327_v8 = vpack.c.bf16 (!%p206_p3), %v610_v5, %v609_v2  ;;  %v611_v9 = vld [vmem:[%s4045_s1 + $0x110] sm:$0xff] (!%p206_p3)  ;;  %v612_v10 = vld [vmem:[%s4045_s1 + $0x118] sm:$0xff] (!%p206_p3)  ;;  %v2282_v11 = vpack.c.bf16 (!%p206_p3), %v580_v7, %v579_v6  ;;  %v581_v13 = vld [vmem:[%s4045_s1 + $0x20] sm:$0xff] (!%p206_p3) }
   0x9   : > { %2280 = vmatpush1.bf16.msra.mxu1 (!%p206_p3), %v2279_v4  ;;  %v2330_v12 = vpack.c.bf16 (!%p206_p3), %v612_v10, %v611_v9  ;;  %v582_v14 = vld [vmem:[%s4045_s1 + $0x28] sm:$0xff] (!%p206_p3)  ;;  %v613_v15 = vld [vmem:[%s4045_s1 + $0x120] sm:$0xff] (!%p206_p3)  ;;  %v583_v19 = vld [vmem:[%s4045_s1 + $0x30] sm:$0xff] (!%p206_p3) }
   0xa   : > { %2328 = vmatpush1.bf16.msra.mxu0 (!%p206_p3), %v2327_v8  ;;  %2281 = vmatprep.subr.bf16.mxu1 (!%p206_p3), %v2721_v3  ;;  %v614_v16 = vld [vmem:[%s4045_s1 + $0x128] sm:$0xff] (!%p206_p3)  ;;  %v2285_v17 = vpack.c.bf16 (!%p206_p3), %v582_v14, %v581_v13  ;;  %v584_v20 = vld [vmem:[%s4045_s1 + $0x38] sm:$0xff] (!%p206_p3)  ;;  %v615_v21 = vld [vmem:[%s4045_s1 + $0x130] sm:$0xff] (!%p206_p3) }
   0xb   : > { %2329 = vmatprep.subr.bf16.mxu0 (!%p206_p3), %v2721_v3  ;;  %v2333_v18 = vpack.c.bf16 (!%p206_p3), %v614_v16, %v613_v15  ;;  %v616_v22 = vld [vmem:[%s4045_s1 + $0x138] sm:$0xff] (!%p206_p3)  ;;  %v2288_v23 = vpack.c.bf16 (!%p206_p3), %v584_v20, %v583_v19  ;;  %v585_v25 = vld [vmem:[%s4045_s1 + $0x40] sm:$0xff] (!%p206_p3)  ;;  %v586_v26 = vld [vmem:[%s4045_s1 + $0x48] sm:$0xff] (!%p206_p3) }
   0xc   : > { %v2336_v24 = vpack.c.bf16 (!%p206_p3), %v616_v22, %v615_v21  ;;  %v617_v27 = vld [vmem:[%s4045_s1 + $0x140] sm:$0xff] (!%p206_p3)  ;;  %v618_v28 = vld [vmem:[%s4045_s1 + $0x148] sm:$0xff] (!%p206_p3)  ;;  %v2291_v29 = vpack.c.bf16 (!%p206_p3), %v586_v26, %v585_v25  ;;  %v587_v31 = vld [vmem:[%s4045_s1 + $0x50] sm:$0xff] (!%p206_p3) }
   0xd   : > { %2283 = vmatpush1.bf16.msra.mxu1 (!%p206_p3), %v2282_v11  ;;  %v2339_v30 = vpack.c.bf16 (!%p206_p3), %v618_v28, %v617_v27  ;;  %v588_v32 = vld [vmem:[%s4045_s1 + $0x58] sm:$0xff] (!%p206_p3)  ;;  %v619_v33 = vld [vmem:[%s4045_s1 + $0x150] sm:$0xff] (!%p206_p3)  ;;  %v589_v37 = vld [vmem:[%s4045_s1 + $0x60] sm:$0xff] (!%p206_p3) }
   0xe   : > { %2331 = vmatpush1.bf16.msra.mxu0 %v2330_v12  ;;  %2284 = vmatprep.subr.bf16.mxu1 %v2721_v3  ;;  %s4054_s9 = smov (!%p251_p4, %s2142_s9), 63  ;;  %v620_v34 = vld [vmem:[%s4045_s1 + $0x158] sm:$0xff]  ;;  %v2294_v35 = vpack.c.bf16 %v588_v32, %v587_v31  ;;  %v590_v38 = vld [vmem:[%s4045_s1 + $0x68] sm:$0xff]  ;;  %v621_v39 = vld [vmem:[%s4045_s1 + $0x160] sm:$0xff]  ;;  %s4056_s15 = smov (!%p273_p5, %s2711_s15), 1 }
   0xf   : > { %2332 = vmatprep.subr.bf16.mxu0 %v2721_v3  ;;  %s2670_s13 = smul.u32 72, %s4054_s9  ;;  %v2342_v36 = vpack.c.bf16 %v620_v34, %v619_v33  ;;  %v622_v40 = vld [vmem:[%s4045_s1 + $0x168] sm:$0xff]  ;;  %v2297_v43 = vpack.c.bf16 %v590_v38, %v589_v37  ;;  %v591_v45 = vld [vmem:[%s4045_s1 + $0x70] sm:$0xff]  ;;  %v592_v46 = vld [vmem:[%s4045_s1 + $0x78] sm:$0xff] }
  0x10   : > { %v2345_v44 = vpack.c.bf16 %v622_v40, %v621_v39  ;;  %v623_v47 = vld [vmem:[%s4045_s1 + $0x170] sm:$0xff]  ;;  %v624_v48 = vld [vmem:[%s4045_s1 + $0x178] sm:$0xff]  ;;  %v2300_v49 = vpack.c.bf16 %v592_v46, %v591_v45  ;;  %v593_v51 = vld [vmem:[%s4045_s1 + $0x80] sm:$0xff] }
  0x11   : > { %2286 = vmatpush1.bf16.msra.mxu1 %v2285_v17  ;;  %s2856_s28 = scalar_lea.vmem %s4044_s0, %s2670_s13  ;;  %v2348_v50 = vpack.c.bf16 %v624_v48, %v623_v47  ;;  %v594_v52 = vld [vmem:[%s4045_s1 + $0x88] sm:$0xff]  ;;  %v625_v53 = vld [vmem:[%s4045_s1 + $0x180] sm:$0xff]  ;;  %v595_v57 = vld [vmem:[%s4045_s1 + $0x90] sm:$0xff] }
  0x12   : > { %2334 = vmatpush1.bf16.msra.mxu0 %v2333_v18  ;;  %2287 = vmatprep.subr.bf16.mxu1 %v2721_v3  ;;  %v290_v41 = vld [vmem:[%s2856_s28 + $0x8] sm:$0xff]  ;;  %v292_v42 = vld [vmem:[%s2856_s28 + $0x18] sm:$0xff]  ;;  %v2303_v55 = vpack.c.bf16 %v594_v52, %v593_v51  ;;  %v627_v59 = vld [vmem:[%s4045_s1 + $0x190] sm:$0xff] }
  0x13   : > { %2335 = vmatprep.subr.bf16.mxu0 %v2721_v3  ;;  %785 = vmatprep.mubr.f32.mxu1 %v290_v41  ;;  %v626_v54 = vld [vmem:[%s4045_s1 + $0x188] sm:$0xff]  ;;  %v596_v58 = vld [vmem:[%s4045_s1 + $0x98] sm:$0xff]  ;;  %v597_v63 = vld [vmem:[%s4045_s1 + $0xa0] sm:$0xff] }
  0x14   : > { %1010 = vmatprep.mubr.f32.mxu0 %v292_v42  ;;  %v2351_v56 = vpack.c.bf16 %v626_v54, %v625_v53  ;;  %v628_v60 = vld [vmem:[%s4045_s1 + $0x198] sm:$0xff]  ;;  %v2306_v61 = vpack.c.bf16 %v596_v58, %v595_v57  ;;  %v598_v0 = vld [vmem:[%s4045_s1 + $0xa8] sm:$0xff]  ;;  %v629_v1 = vld [vmem:[%s4045_s1 + $0x1a0] sm:$0xff] }
  0x15   : > { %2289 = vmatpush1.bf16.msra.mxu1 %v2288_v23  ;;  %v2354_v62 = vpack.c.bf16 %v628_v60, %v627_v59  ;;  %v630_v2 = vld [vmem:[%s4045_s1 + $0x1a8] sm:$0xff]  ;;  %v2309_v4 = vpack.c.bf16 %v598_v0, %v597_v63  ;;  %v599_v6 = vld [vmem:[%s4045_s1 + $0xb0] sm:$0xff]  ;;  %v600_v7 = vld [vmem:[%s4045_s1 + $0xb8] sm:$0xff] }
  0x16   : > { %2337 = vmatpush1.bf16.msra.mxu0 %v2336_v24  ;;  %2290 = vmatprep.subr.bf16.mxu1 %v2721_v3  ;;  %v2357_v5 = vpack.c.bf16 %v630_v2, %v629_v1  ;;  %v631_v8 = vld [vmem:[%s4045_s1 + $0x1b0] sm:$0xff]  ;;  %v632_v9 = vld [vmem:[%s4045_s1 + $0x1b8] sm:$0xff]  ;;  %v2312_v10 = vpack.c.bf16 %v600_v7, %v599_v6  ;;  %v601_v12 = vld [vmem:[%s4045_s1 + $0xc0] sm:$0xff] }
  0x17   : > { %2338 = vmatprep.subr.bf16.mxu0 %v2721_v3  ;;  %v2360_v11 = vpack.c.bf16 %v632_v9, %v631_v8  ;;  %v602_v13 = vld [vmem:[%s4045_s1 + $0xc8] sm:$0xff]  ;;  %v633_v14 = vld [vmem:[%s4045_s1 + $0x1c0] sm:$0xff]  ;;  %v603_v18 = vld [vmem:[%s4045_s1 + $0xd0] sm:$0xff] }
  0x18   : > { %v634_v15 = vld [vmem:[%s4045_s1 + $0x1c8] sm:$0xff]  ;;  %v2315_v16 = vpack.c.bf16 %v602_v13, %v601_v12  ;;  %v604_v19 = vld [vmem:[%s4045_s1 + $0xd8] sm:$0xff]  ;;  %v635_v20 = vld [vmem:[%s4045_s1 + $0x1d0] sm:$0xff] }
  0x19   : > { %2292 = vmatpush1.bf16.msra.mxu1 %v2291_v29  ;;  %v2363_v17 = vpack.c.bf16 %v634_v15, %v633_v14  ;;  %v636_v21 = vld [vmem:[%s4045_s1 + $0x1d8] sm:$0xff]  ;;  %v2318_v22 = vpack.c.bf16 %v604_v19, %v603_v18  ;;  %v605_v24 = vld [vmem:[%s4045_s1 + $0xe0] sm:$0xff]  ;;  %v606_v25 = vld [vmem:[%s4045_s1 + $0xe8] sm:$0xff] }
  0x1a   : > { %2340 = vmatpush1.bf16.msra.mxu0 %v2339_v30  ;;  %2293 = vmatprep.subr.bf16.mxu1 %v2721_v3  ;;  %v2366_v23 = vpack.c.bf16 %v636_v21, %v635_v20  ;;  %v637_v26 = vld [vmem:[%s4045_s1 + $0x1e0] sm:$0xff]  ;;  %v638_v27 = vld [vmem:[%s4045_s1 + $0x1e8] sm:$0xff]  ;;  %v2321_v28 = vpack.c.bf16 %v606_v25, %v605_v24  ;;  %v607_v30 = vld [vmem:[%s4045_s1 + $0xf0] sm:$0xff] }
  0x1b   : > { %2341 = vmatprep.subr.bf16.mxu0 %v2721_v3  ;;  %v2369_v29 = vpack.c.bf16 %v638_v27, %v637_v26  ;;  %v608_v31 = vld [vmem:[%s4045_s1 + $0xf8] sm:$0xff]  ;;  %v639_v32 = vld [vmem:[%s4045_s1 + $0x1f0] sm:$0xff]  ;;  %v642_v37 = vld [vmem:[%s4045_s1 + $0x208] sm:$0xff] }
  0x1c   : > { %v640_v33 = vld [vmem:[%s4045_s1 + $0x1f8] sm:$0xff]  ;;  %v2324_v34 = vpack.c.bf16 %v608_v31, %v607_v30  ;;  %v673_v38 = vld [vmem:[%s4045_s1 + $0x300] sm:$0xff]  ;;  %v674_v39 = vld [vmem:[%s4045_s1 + $0x308] sm:$0xff] }
  0x1d   : > { %2295 = vmatpush1.bf16.msra.mxu1 %v2294_v35  ;;  %v2372_v35 = vpack.c.bf16 %v640_v33, %v639_v32  ;;  %v289_v40 = vld [vmem:[%s2856_s28] sm:$0xff]  ;;  %v291_v41 = vld [vmem:[%s2856_s28 + $0x10] sm:$0xff]  ;;  %v644_v46 = vld [vmem:[%s4045_s1 + $0x218] sm:$0xff]  ;;  %v3026_v47 = vpack.c.bf16 %v674_v39, %v673_v38 }
  0x1e   : > { %2343 = vmatpush1.bf16.msra.mxu0 %v2342_v36  ;;  %2296 = vmatprep.subr.bf16.mxu1 %v2721_v3  ;;  %v641_v36 = vld [vmem:[%s4045_s1 + $0x200] sm:$0xff]  ;;  %v643_v45 = vld [vmem:[%s4045_s1 + $0x210] sm:$0xff]  ;;  %v300_v51 = vld [vmem:[%s2856_s28 + $0x58] sm:$0xff] }
  0x1f   : > { %2344 = vmatprep.subr.bf16.mxu0 %v2721_v3  ;;  %v2375_v42 = vpack.c.bf16 %v642_v37, %v641_v36  ;;  %v675_v48 = vld [vmem:[%s4045_s1 + $0x310] sm:$0xff]  ;;  %v308_v52 = vld [vmem:[%s2856_s28 + $0x98] sm:$0xff]  ;;  %v2378_v53 = vpack.c.bf16 %v644_v46, %v643_v45  ;;  %v310_v54 = vld [vmem:[%s2856_s28 + $0xa8] sm:$0xff] }
  0x20   : > { %v677_v58 = vld [vmem:[%s4045_s1 + $0x320] sm:$0xff]  ;;  %v678_v59 = vld [vmem:[%s4045_s1 + $0x328] sm:$0xff]  ;;  %v307_v60 = vld [vmem:[%s2856_s28 + $0x90] sm:$0xff] }
  0x21   : > { %2298 = vmatpush1.bf16.msra.mxu1 %v2297_v43  ;;  %v299_v43 = vld [vmem:[%s2856_s28 + $0x50] sm:$0xff]  ;;  %v648_v2 = vld [vmem:[%s4045_s1 + $0x238] sm:$0xff]  ;;  %v318_v8 = vld [vmem:[%s2856_s28 + $0xe8] sm:$0xff] }
  0x22   : > { %2346 = vmatpush1.bf16.msra.mxu0 %v2345_v44  ;;  %2299 = vmatprep.subr.bf16.mxu1 %v2721_v3  ;;  %v301_v44 = vld [vmem:[%s2856_s28 + $0x60] sm:$0xff]  ;;  %v319_v0 = vld [vmem:[%s2856_s28 + $0xf0] sm:$0xff]  ;;  %v680_v6 = vld [vmem:[%s4045_s1 + $0x338] sm:$0xff] }
  0x23   : > { %2347 = vmatprep.subr.bf16.mxu0 %v2721_v3  ;;  %v647_v1 = vld [vmem:[%s4045_s1 + $0x230] sm:$0xff]  ;;  %v316_v7 = vld [vmem:[%s2856_s28 + $0xd8] sm:$0xff]  ;;  %v326_v9 = vld [vmem:[%s2856_s28 + $0x128] sm:$0xff] }
  0x24   : > { %v649_v12 = vld [vmem:[%s4045_s1 + $0x240] sm:$0xff]  ;;  %v650_v13 = vld [vmem:[%s4045_s1 + $0x248] sm:$0xff]  ;;  %v327_v18 = vld [vmem:[%s2856_s28 + $0x130] sm:$0xff] }
  0x25   : > { %2301 = vmatpush1.bf16.msra.mxu1 %v2300_v49  ;;  %v676_v49 = vld [vmem:[%s4045_s1 + $0x318] sm:$0xff]  ;;  %v681_v15 = vld [vmem:[%s4045_s1 + $0x340] sm:$0xff]  ;;  %v335_v19 = vld [vmem:[%s2856_s28 + $0x170] sm:$0xff]  ;;  %v2387_v20 = vpack.c.bf16 %v650_v13, %v649_v12 }
  0x26   : > { %2349 = vmatpush1.bf16.msra.mxu0 %v2348_v50  ;;  %2302 = vmatprep.subr.bf16.mxu1 %v2721_v3  ;;  %v298_v50 = vld [vmem:[%s2856_s28 + $0x48] sm:$0xff]  ;;  %v3046_v57 = vpack.c.bf16 %v676_v49, %v675_v48  ;;  %v337_v21 = vld [vmem:[%s2856_s28 + $0x180] sm:$0xff]  ;;  %v683_v25 = vld [vmem:[%s4045_s1 + $0x350] sm:$0xff] }
  0x27   : > { %2350 = vmatprep.subr.bf16.mxu0 %v2721_v3  ;;  %v684_v26 = vld [vmem:[%s4045_s1 + $0x358] sm:$0xff]  ;;  %v334_v27 = vld [vmem:[%s2856_s28 + $0x168] sm:$0xff]  ;;  %v653_v32 = vld [vmem:[%s4045_s1 + $0x260] sm:$0xff] }
  0x28   : > { %v346_v31 = vld [vmem:[%s2856_s28 + $0x1c8] sm:$0xff]  ;;  %v343_v37 = vld [vmem:[%s2856_s28 + $0x1b0] sm:$0xff]  ;;  %v345_v38 = vld [vmem:[%s2856_s28 + $0x1c0] sm:$0xff] }
  0x29   : > { %2304 = vmatpush1.bf16.msra.mxu1 %v2303_v55  ;;  %v645_v55 = vld [vmem:[%s4045_s1 + $0x220] sm:$0xff]  ;;  %v654_v33 = vld [vmem:[%s4045_s1 + $0x268] sm:$0xff]  ;;  %v687_v45 = vld [vmem:[%s4045_s1 + $0x370] sm:$0xff] }
  0x2a   : > { %2352 = vmatpush1.bf16.msra.mxu0 %v2351_v56  ;;  %2305 = vmatprep.subr.bf16.mxu1 %v2721_v3  ;;  %v646_v56 = vld [vmem:[%s4045_s1 + $0x228] sm:$0xff]  ;;  %v353_v39 = vld [vmem:[%s2856_s28 + $0x200] sm:$0xff]  ;;  %v688_v46 = vld [vmem:[%s4045_s1 + $0x378] sm:$0xff] }
  0x2b   : > { %2353 = vmatprep.subr.bf16.mxu0 %v2721_v3  ;;  %v2381_v63 = vpack.c.bf16 %v646_v56, %v645_v55  ;;  %v686_v36 = vld [vmem:[%s4045_s1 + $0x368] sm:$0xff]  ;;  %v352_v48 = vld [vmem:[%s2856_s28 + $0x1f8] sm:$0xff]  ;;  %v3172_v55 = vpack.c.bf16 %v688_v46, %v687_v45  ;;  %v689_v56 = vld [vmem:[%s4045_s1 + $0x380] sm:$0xff] }
  0x2c   : > { %v354_v49 = vld [vmem:[%s2856_s28 + $0x208] sm:$0xff]  ;;  %v661_v12 = vld [vmem:[%s4045_s1 + $0x2a0] sm:$0xff]  ;;  %v667_v46 = vld [vmem:[%s4045_s1 + $0x2d0] sm:$0xff] }
  0x2d   : > { %2307 = vmatpush1.bf16.msra.mxu1 %v2306_v61  ;;  %v309_v61 = vld [vmem:[%s2856_s28 + $0xa0] sm:$0xff]  ;;  %v662_v13 = vld [vmem:[%s4045_s1 + $0x2a8] sm:$0xff] }
  0x2e   : > { %2355 = vmatpush1.bf16.msra.mxu0 %v2354_v62  ;;  %2308 = vmatprep.subr.bf16.mxu1 %v2721_v3  ;;  %v317_v62 = vld [vmem:[%s2856_s28 + $0xe0] sm:$0xff] }
  0x2f   : > { %2356 = vmatprep.subr.bf16.mxu0 %v2721_v3  ;;  %v409_v45 = vld [vmem:[%s2856_s28 + $0x3c0] sm:$0xff] }
  0x31   : > { %2310 = vmatpush1.bf16.msra.mxu1 %v2309_v4  ;;  %v3067_v4 = vpack.c.bf16 %v678_v59, %v677_v58  ;;  %v690_v58 = vld [vmem:[%s4045_s1 + $0x388] sm:$0xff]  ;;  %v361_v59 = vld [vmem:[%s2856_s28 + $0x240] sm:$0xff] }
  0x32   : > { %2358 = vmatpush1.bf16.msra.mxu0 %v2357_v5  ;;  %2311 = vmatprep.subr.bf16.mxu1 %v2721_v3  ;;  %v679_v5 = vld [vmem:[%s4045_s1 + $0x330] sm:$0xff] }
  0x33   : > { %2359 = vmatprep.subr.bf16.mxu0 %v2721_v3  ;;  %v3088_v14 = vpack.c.bf16 %v680_v6, %v679_v5  ;;  %v691_v5 = vld [vmem:[%s4045_s1 + $0x390] sm:$0xff]  ;;  %v692_v6 = vld [vmem:[%s4045_s1 + $0x398] sm:$0xff] }
  0x35   : > { %2313 = vmatpush1.bf16.msra.mxu1 %v2312_v10  ;;  %v2384_v10 = vpack.c.bf16 %v648_v2, %v647_v1  ;;  %v660_v1 = vld [vmem:[%s4045_s1 + $0x298] sm:$0xff]  ;;  %v3193_v2 = vpack.c.bf16 %v690_v58, %v689_v56  ;;  %v418_v58 = vld [vmem:[%s2856_s28 + $0x408] sm:$0xff] }
  0x36   : > { %2361 = vmatpush1.bf16.msra.mxu0 %v2360_v11  ;;  %2314 = vmatprep.subr.bf16.mxu1 %v2721_v3  ;;  %v328_v11 = vld [vmem:[%s2856_s28 + $0x138] sm:$0xff] }
  0x37   : > { %2362 = vmatprep.subr.bf16.mxu0 %v2721_v3 }
  0x39   : > { %2316 = vmatpush1.bf16.msra.mxu1 %v2315_v16  ;;  %v682_v16 = vld [vmem:[%s4045_s1 + $0x348] sm:$0xff] }
  0x3a   : > { %2364 = vmatpush1.bf16.msra.mxu0 %v2363_v17  ;;  %2317 = vmatprep.subr.bf16.mxu1 %v2721_v3  ;;  %v325_v17 = vld [vmem:[%s2856_s28 + $0x120] sm:$0xff]  ;;  %v3109_v24 = vpack.c.bf16 %v682_v16, %v681_v15  ;;  %v3214_v15 = vpack.c.bf16 %v692_v6, %v691_v5 }
  0x3b   : > { %2365 = vmatprep.subr.bf16.mxu0 %v2721_v3  ;;  %v693_v16 = vld [vmem:[%s4045_s1 + $0x3a0] sm:$0xff] }
  0x3c   : > { %v425_v5 = vld [vmem:[%s2856_s28 + $0x440] sm:$0xff] }
  0x3d   : > { %2319 = vmatpush1.bf16.msra.mxu1 %v2318_v22  ;;  %v651_v22 = vld [vmem:[%s4045_s1 + $0x250] sm:$0xff] }
  0x3e   : > { %2367 = vmatpush1.bf16.msra.mxu0 %v2366_v23  ;;  %2320 = vmatprep.subr.bf16.mxu1 %v2721_v3  ;;  %v652_v23 = vld [vmem:[%s4045_s1 + $0x258] sm:$0xff] }
  0x3f   : > { %2368 = vmatprep.subr.bf16.mxu0 %v2721_v3  ;;  %v2390_v30 = vpack.c.bf16 %v652_v23, %v651_v22  ;;  %v391_v22 = vld [vmem:[%s2856_s28 + $0x330] sm:$0xff] }
  0x40   : > { %v663_v23 = vld [vmem:[%s4045_s1 + $0x2b0] sm:$0xff] }
  0x41   : > { %2322 = vmatpush1.bf16.msra.mxu1 %v2321_v28  ;;  %v336_v28 = vld [vmem:[%s2856_s28 + $0x178] sm:$0xff] }
  0x42   : > { %2370 = vmatpush1.bf16.msra.mxu0 %v2369_v29  ;;  %2323 = vmatprep.subr.bf16.mxu1 %v2721_v3  ;;  %v344_v29 = vld [vmem:[%s2856_s28 + $0x1b8] sm:$0xff] }
  0x43   : > { %2371 = vmatprep.subr.bf16.mxu0 %v2721_v3 }
  0x45   : > { %2325 = vmatpush1.bf16.msra.mxu1 %v2324_v34  ;;  %v3130_v34 = vpack.c.bf16 %v684_v26, %v683_v25  ;;  %v664_v25 = vld [vmem:[%s4045_s1 + $0x2b8] sm:$0xff] }
  0x46   : > { %2373 = vmatpush1.bf16.msra.mxu0 %v2372_v35  ;;  %2502 = vmatprep.subr.bf16.mxu1 %v2721_v3  ;;  %v685_v35 = vld [vmem:[%s4045_s1 + $0x360] sm:$0xff] }
  0x47   : > { %2374 = vmatprep.subr.bf16.mxu0 %v2721_v3 }
  0x48   : > { %786 = vmatmul.mubr.f32.vlgmr.msra.gmra.mrb[0].mxu1 %v289_v40  ;;  %v2393_v40 = vpack.c.bf16 %v654_v33, %v653_v32  ;;  %v2408_v32 = vpack.c.bf16 %v664_v25, %v663_v23  ;;  %v400_v33 = vld [vmem:[%s2856_s28 + $0x378] sm:$0xff]  ;;  %v433_v25 = vld [vmem:[%s2856_s28 + $0x480] sm:$0xff] }
  0x49   : > { %1011 = vmatmul.mubr.f32.vlgmr.msra.gmra.mrb[0].mxu0 %v291_v41  ;;  %790 = vmatprep.mubr.f32.mxu1 %v299_v43  ;;  %v355_v41 = vld [vmem:[%s2856_s28 + $0x210] sm:$0xff]  ;;  %v656_v43 = vld [vmem:[%s4045_s1 + $0x278] sm:$0xff] }
  0x4a   : > { %2376 = vmatpush1.bf16.msra.mxu0 %v2375_v42  ;;  %1015 = vmatprep.mubr.f32.mxu0 %v301_v44  ;;  %v655_v42 = vld [vmem:[%s4045_s1 + $0x270] sm:$0xff]  ;;  %v3151_v44 = vpack.c.bf16 %v686_v36, %v685_v35  ;;  %v665_v35 = vld [vmem:[%s4045_s1 + $0x2c0] sm:$0xff]  ;;  %v666_v36 = vld [vmem:[%s4045_s1 + $0x2c8] sm:$0xff] }
  0x4b   : > { %2377 = vmatprep.subr.bf16.mxu0 %v2721_v3  ;;  %2518 = vmatpush1.bf16.msra.mxu1 %v3026_v47 }
  0x4c   : > { %791 = vmatmul.mubr.f32.gmra.mrb[2].mxu1 %v298_v50  ;;  %2503 = vmatprep.subr.bf16.mxu1 %v2721_v3  ;;  %v362_v50 = vld [vmem:[%s2856_s28 + $0x248] sm:$0xff] }
  0x4d   : > { %1016 = vmatmul.mubr.f32.gmra.mrb[2].mxu0 %v300_v51  ;;  %795 = vmatprep.mubr.f32.mxu1 %v308_v52  ;;  %v2396_v51 = vpack.c.bf16 %v656_v43, %v655_v42  ;;  %v364_v52 = vld [vmem:[%s2856_s28 + $0x258] sm:$0xff]  ;;  %v407_v42 = vld [vmem:[%s2856_s28 + $0x3b0] sm:$0xff]  ;;  %v2411_v43 = vpack.c.bf16 %v666_v36, %v665_v35  ;;  %v453_v36 = vld [vmem:[%s2856_s28 + $0x520] sm:$0xff] }
  0x4e   : > { %1020 = vmatprep.mubr.f32.mxu0 %v310_v54  ;;  %2379 = vmatpush1.bf16.msra.mxu0 %v2378_v53  ;;  %v657_v53 = vld [vmem:[%s4045_s1 + $0x280] sm:$0xff]  ;;  %v658_v54 = vld [vmem:[%s4045_s1 + $0x288] sm:$0xff]  ;;  %v451_v35 = vld [vmem:[%s2856_s28 + $0x510] sm:$0xff] }
  0x4f   : > { %2380 = vmatprep.subr.bf16.mxu0 %v2721_v3  ;;  %2519 = vmatpush1.bf16.msra.mxu1 %v3046_v57 }
  0x50   : > { %796 = vmatmul.mubr.f32.gmra.mrb[4].mxu1 %v307_v60  ;;  %2504 = vmatprep.subr.bf16.mxu1 %v2721_v3  ;;  %v363_v60 = vld [vmem:[%s2856_s28 + $0x250] sm:$0xff] }
  0x51   : > { %1021 = vmatmul.mubr.f32.gmra.mrb[4].mxu0 %v309_v61  ;;  %800 = vmatprep.mubr.f32.mxu1 %v317_v62  ;;  %v371_v61 = vld [vmem:[%s2856_s28 + $0x290] sm:$0xff]  ;;  %v2399_v62 = vpack.c.bf16 %v658_v54, %v657_v53  ;;  %v408_v53 = vld [vmem:[%s2856_s28 + $0x3b8] sm:$0xff] }
  0x52   : > { %1025 = vmatprep.mubr.f32.mxu0 %v319_v0  ;;  %2382 = vmatpush1.bf16.msra.mxu0 %v2381_v63  ;;  %v373_v63 = vld [vmem:[%s2856_s28 + $0x2a0] sm:$0xff]  ;;  %v659_v0 = vld [vmem:[%s4045_s1 + $0x290] sm:$0xff]  ;;  %v416_v54 = vld [vmem:[%s2856_s28 + $0x3f8] sm:$0xff] }
  0x53   : > { %2383 = vmatprep.subr.bf16.mxu0 %v2721_v3  ;;  %2520 = vmatpush1.bf16.msra.mxu1 %v3067_v4 }
  0x54   : > { %801 = vmatmul.mubr.f32.gmra.mrb[6].mxu1 %v316_v7  ;;  %2505 = vmatprep.subr.bf16.mxu1 %v2721_v3  ;;  %v370_v7 = vld [vmem:[%s2856_s28 + $0x288] sm:$0xff] }
  0x55   : > { %1026 = vmatmul.mubr.f32.gmra.mrb[6].mxu0 %v318_v8  ;;  %805 = vmatprep.mubr.f32.mxu1 %v326_v9  ;;  %v372_v8 = vld [vmem:[%s2856_s28 + $0x298] sm:$0xff] }
  0x56   : > { %1030 = vmatprep.mubr.f32.mxu0 %v328_v11  ;;  %2385 = vmatpush1.bf16.msra.mxu0 %v2384_v10  ;;  %v380_v9 = vld [vmem:[%s2856_s28 + $0x2d8] sm:$0xff]  ;;  %v2402_v10 = vpack.c.bf16 %v660_v1, %v659_v0  ;;  %v382_v11 = vld [vmem:[%s2856_s28 + $0x2e8] sm:$0xff]  ;;  %v415_v0 = vld [vmem:[%s2856_s28 + $0x3f0] sm:$0xff] }
  0x57   : > { %2386 = vmatprep.subr.bf16.mxu0 %v2721_v3  ;;  %2521 = vmatpush1.bf16.msra.mxu1 %v3088_v14  ;;  %v417_v1 = vld [vmem:[%s2856_s28 + $0x400] sm:$0xff] }
  0x58   : > { %806 = vmatmul.mubr.f32.gmra.mrb[8].mxu1 %v325_v17  ;;  %2506 = vmatprep.subr.bf16.mxu1 %v2721_v3  ;;  %v694_v17 = vld [vmem:[%s4045_s1 + $0x3a8] sm:$0xff] }
  0x59   : > { %1031 = vmatmul.mubr.f32.gmra.mrb[8].mxu0 %v327_v18  ;;  %810 = vmatprep.mubr.f32.mxu1 %v335_v19  ;;  %v379_v18 = vld [vmem:[%s2856_s28 + $0x2d0] sm:$0xff]  ;;  %v381_v19 = vld [vmem:[%s2856_s28 + $0x2e0] sm:$0xff]  ;;  %v3235_v26 = vpack.c.bf16 %v694_v17, %v693_v16  ;;  %v706_v17 = vld [vmem:[%s4045_s1 + $0x408] sm:$0xff] }
  0x5a   : > { %1035 = vmatprep.mubr.f32.mxu0 %v337_v21  ;;  %2388 = vmatpush1.bf16.msra.mxu0 %v2387_v20  ;;  %v389_v20 = vld [vmem:[%s2856_s28 + $0x320] sm:$0xff]  ;;  %v2405_v21 = vpack.c.bf16 %v662_v13, %v661_v12  ;;  %v704_v12 = vld [vmem:[%s4045_s1 + $0x3f8] sm:$0xff] }
  0x5b   : > { %2389 = vmatprep.subr.bf16.mxu0 %v2721_v3  ;;  %2522 = vmatpush1.bf16.msra.mxu1 %v3109_v24  ;;  %v424_v13 = vld [vmem:[%s2856_s28 + $0x438] sm:$0xff]  ;;  %v705_v16 = vld [vmem:[%s4045_s1 + $0x400] sm:$0xff] }
  0x5c   : > { %811 = vmatmul.mubr.f32.gmra.mrb[10].mxu1 %v334_v27  ;;  %2507 = vmatprep.subr.bf16.mxu1 %v2721_v3  ;;  %v695_v27 = vld [vmem:[%s4045_s1 + $0x3b0] sm:$0xff]  ;;  %v3343_v23 = vpack.c.bf16 %v706_v17, %v705_v16  ;;  %v525_v17 = vld [vmem:[%s2856_s28 + $0x760] sm:$0xff] }
  0x5d   : > { %1036 = vmatmul.mubr.f32.gmra.mrb[10].mxu0 %v336_v28  ;;  %815 = vmatprep.mubr.f32.mxu1 %v344_v29  ;;  %v696_v28 = vld [vmem:[%s4045_s1 + $0x3b8] sm:$0xff]  ;;  %v523_v16 = vld [vmem:[%s2856_s28 + $0x750] sm:$0xff] }
  0x5e   : > { %1040 = vmatprep.mubr.f32.mxu0 %v346_v31  ;;  %2391 = vmatpush1.bf16.msra.mxu0 %v2390_v30  ;;  %v388_v29 = vld [vmem:[%s2856_s28 + $0x318] sm:$0xff]  ;;  %v390_v30 = vld [vmem:[%s2856_s28 + $0x328] sm:$0xff] }
  0x5f   : > { %2392 = vmatprep.subr.bf16.mxu0 %v2721_v3  ;;  %2523 = vmatpush1.bf16.msra.mxu1 %v3130_v34  ;;  %v398_v31 = vld [vmem:[%s2856_s28 + $0x368] sm:$0xff] }
  0x60   : > { %816 = vmatmul.mubr.f32.gmra.mrb[12].mxu1 %v343_v37  ;;  %2508 = vmatprep.subr.bf16.mxu1 %v2721_v3  ;;  %v3256_v37 = vpack.c.bf16 %v696_v28, %v695_v27  ;;  %v435_v27 = vld [vmem:[%s2856_s28 + $0x490] sm:$0xff] }
  0x61   : > { %1041 = vmatmul.mubr.f32.gmra.mrb[12].mxu0 %v345_v38  ;;  %820 = vmatprep.mubr.f32.mxu1 %v353_v39  ;;  %v697_v38 = vld [vmem:[%s4045_s1 + $0x3c0] sm:$0xff]  ;;  %v698_v39 = vld [vmem:[%s4045_s1 + $0x3c8] sm:$0xff]  ;;  %v443_v28 = vld [vmem:[%s2856_s28 + $0x4d0] sm:$0xff] }
  0x62   : > { %1045 = vmatprep.mubr.f32.mxu0 %v355_v41  ;;  %2394 = vmatpush1.bf16.msra.mxu0 %v2393_v40  ;;  %v397_v40 = vld [vmem:[%s2856_s28 + $0x360] sm:$0xff]  ;;  %v399_v41 = vld [vmem:[%s2856_s28 + $0x370] sm:$0xff] }
  0x63   : > { %2395 = vmatprep.subr.bf16.mxu0 %v2721_v3  ;;  %2524 = vmatpush1.bf16.msra.mxu1 %v3151_v44 }
  0x64   : > { %821 = vmatmul.mubr.f32.gmra.mrb[14].mxu1 %v352_v48  ;;  %2509 = vmatprep.subr.bf16.mxu1 %v2721_v3  ;;  %v668_v48 = vld [vmem:[%s4045_s1 + $0x2d8] sm:$0xff] }
  0x65   : > { %1046 = vmatmul.mubr.f32.gmra.mrb[14].mxu0 %v354_v49  ;;  %825 = vmatprep.mubr.f32.mxu1 %v362_v50  ;;  %v3277_v49 = vpack.c.bf16 %v698_v39, %v697_v38  ;;  %v699_v50 = vld [vmem:[%s4045_s1 + $0x3d0] sm:$0xff]  ;;  %v2414_v56 = vpack.c.bf16 %v668_v48, %v667_v46  ;;  %v461_v38 = vld [vmem:[%s2856_s28 + $0x560] sm:$0xff] }
  0x66   : > { %1050 = vmatprep.mubr.f32.mxu0 %v364_v52  ;;  %2397 = vmatpush1.bf16.msra.mxu0 %v2396_v51  ;;  %v700_v51 = vld [vmem:[%s4045_s1 + $0x3d8] sm:$0xff]  ;;  %v406_v52 = vld [vmem:[%s2856_s28 + $0x3a8] sm:$0xff]  ;;  %v463_v39 = vld [vmem:[%s2856_s28 + $0x570] sm:$0xff] }
  0x67   : > { %2398 = vmatprep.subr.bf16.mxu0 %v2721_v3  ;;  %2525 = vmatpush1.bf16.msra.mxu1 %v3172_v55  ;;  %v471_v46 = vld [vmem:[%s2856_s28 + $0x5b0] sm:$0xff] }
  0x68   : > { %826 = vmatmul.mubr.f32.gmra.mrb[16].mxu1 %v361_v59  ;;  %2510 = vmatprep.subr.bf16.mxu1 %v2721_v3  ;;  %v669_v59 = vld [vmem:[%s4045_s1 + $0x2e0] sm:$0xff]  ;;  %v479_v48 = vld [vmem:[%s2856_s28 + $0x5f0] sm:$0xff] }
  0x69   : > { %1051 = vmatmul.mubr.f32.gmra.mrb[16].mxu0 %v363_v60  ;;  %830 = vmatprep.mubr.f32.mxu1 %v371_v61  ;;  %v670_v60 = vld [vmem:[%s4045_s1 + $0x2e8] sm:$0xff]  ;;  %v3298_v61 = vpack.c.bf16 %v700_v51, %v699_v50  ;;  %v481_v50 = vld [vmem:[%s2856_s28 + $0x600] sm:$0xff] }
  0x6a   : > { %1055 = vmatprep.mubr.f32.mxu0 %v373_v63  ;;  %2400 = vmatpush1.bf16.msra.mxu0 %v2399_v62  ;;  %v701_v62 = vld [vmem:[%s4045_s1 + $0x3e0] sm:$0xff]  ;;  %v702_v63 = vld [vmem:[%s4045_s1 + $0x3e8] sm:$0xff]  ;;  %v2417_v6 = vpack.c.bf16 %v670_v60, %v669_v59  ;;  %v499_v60 = vld [vmem:[%s2856_s28 + $0x690] sm:$0xff] }
  0x6b   : > { %2401 = vmatprep.subr.bf16.mxu0 %v2721_v3  ;;  %2526 = vmatpush1.bf16.msra.mxu1 %v3193_v2  ;;  %v478_v51 = vld [vmem:[%s2856_s28 + $0x5e8] sm:$0xff]  ;;  %v497_v59 = vld [vmem:[%s2856_s28 + $0x680] sm:$0xff] }
  0x6c   : > { %831 = vmatmul.mubr.f32.gmra.mrb[18].mxu1 %v370_v7  ;;  %2511 = vmatprep.subr.bf16.mxu1 %v2721_v3  ;;  %v427_v7 = vld [vmem:[%s2856_s28 + $0x450] sm:$0xff] }
  0x6d   : > { %1056 = vmatmul.mubr.f32.gmra.mrb[18].mxu0 %v372_v8  ;;  %835 = vmatprep.mubr.f32.mxu1 %v380_v9  ;;  %v671_v8 = vld [vmem:[%s4045_s1 + $0x2f0] sm:$0xff]  ;;  %v672_v9 = vld [vmem:[%s4045_s1 + $0x2f8] sm:$0xff] }
  0x6e   : > { %1060 = vmatprep.mubr.f32.mxu0 %v382_v11  ;;  %2403 = vmatpush1.bf16.msra.mxu0 %v2402_v10  ;;  %v3319_v10 = vpack.c.bf16 %v702_v63, %v701_v62  ;;  %v703_v11 = vld [vmem:[%s4045_s1 + $0x3f0] sm:$0xff]  ;;  %v496_v62 = vld [vmem:[%s2856_s28 + $0x678] sm:$0xff]  ;;  %v498_v63 = vld [vmem:[%s2856_s28 + $0x688] sm:$0xff] }
  0x6f   : > { %2404 = vmatprep.subr.bf16.mxu0 %v2721_v3  ;;  %2527 = vmatpush1.bf16.msra.mxu1 %v3214_v15 }
  0x70   : > { %836 = vmatmul.mubr.f32.gmra.mrb[20].mxu1 %v379_v18  ;;  %2512 = vmatprep.subr.bf16.mxu1 %v2721_v3  ;;  %v426_v18 = vld [vmem:[%s2856_s28 + $0x448] sm:$0xff] }
  0x71   : > { %1061 = vmatmul.mubr.f32.gmra.mrb[20].mxu0 %v381_v19  ;;  %840 = vmatprep.mubr.f32.mxu1 %v389_v20  ;;  %v434_v19 = vld [vmem:[%s2856_s28 + $0x488] sm:$0xff]  ;;  %v2420_v20 = vpack.c.bf16 %v672_v9, %v671_v8  ;;  %v517_v8 = vld [vmem:[%s2856_s28 + $0x720] sm:$0xff] }
  0x72   : > { %1065 = vmatprep.mubr.f32.mxu0 %v391_v22  ;;  %2406 = vmatpush1.bf16.msra.mxu0 %v2405_v21  ;;  %v436_v21 = vld [vmem:[%s2856_s28 + $0x498] sm:$0xff]  ;;  %v3340_v22 = vpack.c.bf16 %v704_v12, %v703_v11  ;;  %v514_v9 = vld [vmem:[%s2856_s28 + $0x708] sm:$0xff] }
  0x73   : > { %2407 = vmatprep.subr.bf16.mxu0 %v2721_v3  ;;  %2528 = vmatpush1.bf16.msra.mxu1 %v3235_v26  ;;  %v516_v11 = vld [vmem:[%s2856_s28 + $0x718] sm:$0xff] }
  0x74   : > { %841 = vmatmul.mubr.f32.gmra.mrb[22].mxu1 %v388_v29  ;;  %2513 = vmatprep.subr.bf16.mxu1 %v2721_v3  ;;  %v445_v29 = vld [vmem:[%s2856_s28 + $0x4e0] sm:$0xff]  ;;  %v524_v12 = vld [vmem:[%s2856_s28 + $0x758] sm:$0xff] }
  0x75   : > { %1066 = vmatmul.mubr.f32.gmra.mrb[22].mxu0 %v390_v30  ;;  %845 = vmatprep.mubr.f32.mxu1 %v398_v31  ;;  %v442_v30 = vld [vmem:[%s2856_s28 + $0x4c8] sm:$0xff]  ;;  %v444_v31 = vld [vmem:[%s2856_s28 + $0x4d8] sm:$0xff] }
  0x76   : > { %1070 = vmatprep.mubr.f32.mxu0 %v400_v33  ;;  %2409 = vmatpush1.bf16.msra.mxu0 %v2408_v32  ;;  %v452_v32 = vld [vmem:[%s2856_s28 + $0x518] sm:$0xff]  ;;  %v454_v33 = vld [vmem:[%s2856_s28 + $0x528] sm:$0xff] }
  0x77   : > { %2410 = vmatprep.subr.bf16.mxu0 %v2721_v3  ;;  %2529 = vmatpush1.bf16.msra.mxu1 %v3256_v37 }
  0x78   : > { %846 = vmatmul.mubr.f32.gmra.mrb[24].mxu1 %v397_v40  ;;  %2514 = vmatprep.subr.bf16.mxu1 %v2721_v3  ;;  %v460_v40 = vld [vmem:[%s2856_s28 + $0x558] sm:$0xff] }
  0x79   : > { %1071 = vmatmul.mubr.f32.gmra.mrb[24].mxu0 %v399_v41  ;;  %850 = vmatprep.mubr.f32.mxu1 %v407_v42  ;;  %v462_v41 = vld [vmem:[%s2856_s28 + $0x568] sm:$0xff] }
  0x7a   : > { %1075 = vmatprep.mubr.f32.mxu0 %v409_v45  ;;  %2412 = vmatpush1.bf16.msra.mxu0 %v2411_v43  ;;  %v470_v42 = vld [vmem:[%s2856_s28 + $0x5a8] sm:$0xff]  ;;  %v472_v43 = vld [vmem:[%s2856_s28 + $0x5b8] sm:$0xff]  ;;  %v469_v45 = vld [vmem:[%s2856_s28 + $0x5a0] sm:$0xff] }
  0x7b   : > { %2413 = vmatprep.subr.bf16.mxu0 %v2721_v3  ;;  %2530 = vmatpush1.bf16.msra.mxu1 %v3277_v49 }
  0x7c   : > { %851 = vmatmul.mubr.f32.gmra.mrb[26].mxu1 %v406_v52  ;;  %2515 = vmatprep.subr.bf16.mxu1 %v2721_v3  ;;  %v480_v52 = vld [vmem:[%s2856_s28 + $0x5f8] sm:$0xff] }
  0x7d   : > { %1076 = vmatmul.mubr.f32.gmra.mrb[26].mxu0 %v408_v53  ;;  %855 = vmatprep.mubr.f32.mxu1 %v416_v54  ;;  %v488_v53 = vld [vmem:[%s2856_s28 + $0x638] sm:$0xff]  ;;  %v490_v54 = vld [vmem:[%s2856_s28 + $0x648] sm:$0xff] }
  0x7e   : > { %1080 = vmatprep.mubr.f32.mxu0 %v418_v58  ;;  %2415 = vmatpush1.bf16.msra.mxu0 %v2414_v56  ;;  %v487_v56 = vld [vmem:[%s2856_s28 + $0x630] sm:$0xff]  ;;  %v489_v58 = vld [vmem:[%s2856_s28 + $0x640] sm:$0xff] }
  0x7f   : > { %2416 = vmatprep.subr.bf16.mxu0 %v2721_v3  ;;  %2531 = vmatpush1.bf16.msra.mxu1 %v3298_v61 }
  0x80   : > { %856 = vmatmul.mubr.f32.gmra.mrb[28].mxu1 %v415_v0  ;;  %2516 = vmatprep.subr.bf16.mxu1 %v2721_v3  ;;  %v506_v0 = vld [vmem:[%s2856_s28 + $0x6c8] sm:$0xff] }
  0x81   : > { %1081 = vmatmul.mubr.f32.gmra.mrb[28].mxu0 %v417_v1  ;;  %860 = vmatprep.mubr.f32.mxu1 %v425_v5  ;;  %v508_v1 = vld [vmem:[%s2856_s28 + $0x6d8] sm:$0xff]  ;;  %v505_v5 = vld [vmem:[%s2856_s28 + $0x6c0] sm:$0xff] }
  0x82   : > { %1085 = vmatprep.mubr.f32.mxu0 %v427_v7  ;;  %2418 = vmatpush1.bf16.msra.mxu0 %v2417_v6  ;;  %v507_v6 = vld [vmem:[%s2856_s28 + $0x6d0] sm:$0xff] }
  0x83   : > { %2419 = vmatprep.subr.bf16.mxu0 %v2721_v3  ;;  %2532 = vmatpush1.bf16.msra.mxu1 %v3319_v10  ;;  %v515_v7 = vld [vmem:[%s2856_s28 + $0x710] sm:$0xff] }
  0x84   : > { %861 = vmatmul.mubr.f32.gmra.mrb[30].mxu1 %v424_v13  ;;  %2517 = vmatprep.subr.bf16.mxu1 %v2721_v3  ;;  %v526_v13 = vld [vmem:[%s2856_s28 + $0x768] sm:$0xff] }
  0x85   : > { %1086 = vmatmul.mubr.f32.gmra.mrb[30].mxu0 %v426_v18  ;;  %865 = vmatprep.mubr.f32.mxu1 %v434_v19  ;;  %v533_v18 = vld [vmem:[%s2856_s28 + $0x7a0] sm:$0xff]  ;;  %v535_v19 = vld [vmem:[%s2856_s28 + $0x7b0] sm:$0xff] }
  0x86   : > { %1090 = vmatprep.mubr.f32.mxu0 %v436_v21  ;;  %2421 = vmatpush1.bf16.msra.mxu0 %v2420_v20  ;;  %v532_v20 = vld [vmem:[%s2856_s28 + $0x798] sm:$0xff]  ;;  %v534_v21 = vld [vmem:[%s2856_s28 + $0x7a8] sm:$0xff] }
  0x87   : > { %2533 = vmatpush1.bf16.msra.mxu1 %v3340_v22  ;;  %2422 = vmatprep.subr.bf16.mxu0 %v2721_v3 }
  0x88   : > { %866 = vmatmul.mubr.f32.gmra.mrb[32].mxu1 %v433_v25  ;;  %2471 = vmatprep.subr.bf16.mxu1 %v3343_v23  ;;  %v542_v25 = vld [vmem:[%s2856_s28 + $0x7e8] sm:$0xff] }
  0x89   : > { %1091 = vmatmul.mubr.f32.gmra.mrb[32].mxu0 %v435_v27  ;;  %870 = vmatprep.mubr.f32.mxu1 %v443_v28  ;;  %v544_v27 = vld [vmem:[%s2856_s28 + $0x7f8] sm:$0xff]  ;;  %v541_v28 = vld [vmem:[%s2856_s28 + $0x7e0] sm:$0xff] }
  0x8a   : > { %1095 = vmatprep.mubr.f32.mxu0 %v445_v29  ;;  %v543_v29 = vld [vmem:[%s2856_s28 + $0x7f0] sm:$0xff] }
  0x8c   : > { %871 = vmatmul.mubr.f32.gmra.mrb[34].mxu1 %v442_v30  ;;  %v551_v30 = vld [vmem:[%s2856_s28 + $0x830] sm:$0xff] }
  0x8d   : > { %1096 = vmatmul.mubr.f32.gmra.mrb[34].mxu0 %v444_v31  ;;  %875 = vmatprep.mubr.f32.mxu1 %v452_v32  ;;  %v553_v31 = vld [vmem:[%s2856_s28 + $0x840] sm:$0xff]  ;;  %v550_v32 = vld [vmem:[%s2856_s28 + $0x828] sm:$0xff] }
  0x8e   : > { %1100 = vmatprep.mubr.f32.mxu0 %v454_v33  ;;  %v552_v33 = vld [vmem:[%s2856_s28 + $0x838] sm:$0xff] }
  0x90   : > { %876 = vmatmul.mubr.f32.gmra.mrb[36].mxu1 %v451_v35  ;;  %v560_v35 = vld [vmem:[%s2856_s28 + $0x878] sm:$0xff] }
  0x91   : > { %1101 = vmatmul.mubr.f32.gmra.mrb[36].mxu0 %v453_v36  ;;  %880 = vmatprep.mubr.f32.mxu1 %v461_v38  ;;  %v562_v36 = vld [vmem:[%s2856_s28 + $0x888] sm:$0xff]  ;;  %v559_v38 = vld [vmem:[%s2856_s28 + $0x870] sm:$0xff] }
  0x92   : > { %1105 = vmatprep.mubr.f32.mxu0 %v463_v39  ;;  %v561_v39 = vld [vmem:[%s2856_s28 + $0x880] sm:$0xff] }
  0x94   : > { %881 = vmatmul.mubr.f32.gmra.mrb[38].mxu1 %v460_v40  ;;  %v569_v40 = vld [vmem:[%s2856_s28 + $0x8c0] sm:$0xff] }
  0x95   : > { %1106 = vmatmul.mubr.f32.gmra.mrb[38].mxu0 %v462_v41  ;;  %885 = vmatprep.mubr.f32.mxu1 %v470_v42  ;;  %v571_v41 = vld [vmem:[%s2856_s28 + $0x8d0] sm:$0xff]  ;;  %v568_v42 = vld [vmem:[%s2856_s28 + $0x8b8] sm:$0xff] }
  0x96   : > { %1110 = vmatprep.mubr.f32.mxu0 %v472_v43  ;;  %v570_v43 = vld [vmem:[%s2856_s28 + $0x8c8] sm:$0xff] }
  0x98   : > { %886 = vmatmul.mubr.f32.gmra.mrb[40].mxu1 %v469_v45  ;;  %v368_v45 = vld [vmem:[%s2856_s28 + $0x278] sm:$0xff] }
  0x99   : > { %1111 = vmatmul.mubr.f32.gmra.mrb[40].mxu0 %v471_v46  ;;  %890 = vmatprep.mubr.f32.mxu1 %v479_v48  ;;  %v294_v46 = vld [vmem:[%s2856_s28 + $0x28] sm:$0xff]  ;;  %v367_v48 = vld [vmem:[%s2856_s28 + $0x270] sm:$0xff] }
  0x9a   : > { %1115 = vmatprep.mubr.f32.mxu0 %v481_v50  ;;  %v707_v50 = vld [vmem:[%s4045_s1 + $0x410] sm:$0xff] }
  0x9c   : > { %891 = vmatmul.mubr.f32.gmra.mrb[42].mxu1 %v478_v51  ;;  %v708_v51 = vld [vmem:[%s4045_s1 + $0x418] sm:$0xff] }
  0x9d   : > { %1116 = vmatmul.mubr.f32.gmra.mrb[42].mxu0 %v480_v52  ;;  %895 = vmatprep.mubr.f32.mxu1 %v488_v53  ;;  %v293_v52 = vld [vmem:[%s2856_s28 + $0x20] sm:$0xff] }
  0x9e   : > { %1120 = vmatprep.mubr.f32.mxu0 %v490_v54  ;;  %v377_v53 = vld [vmem:[%s2856_s28 + $0x2c0] sm:$0xff]  ;;  %v303_v54 = vld [vmem:[%s2856_s28 + $0x70] sm:$0xff] }
  0xa0   : > { %896 = vmatmul.mubr.f32.gmra.mrb[44].mxu1 %v487_v56  ;;  %v2474_v56 = vpack.c.bf16 %v708_v51, %v707_v50  ;;  %v365_v50 = vld [vmem:[%s2856_s28 + $0x260] sm:$0xff] }
  0xa1   : > { %1121 = vmatmul.mubr.f32.gmra.mrb[44].mxu0 %v489_v58  ;;  %900 = vmatprep.mubr.f32.mxu1 %v497_v59  ;;  %v376_v58 = vld [vmem:[%s2856_s28 + $0x2b8] sm:$0xff]  ;;  %v709_v59 = vld [vmem:[%s4045_s1 + $0x420] sm:$0xff] }
  0xa2   : > { %1125 = vmatprep.mubr.f32.mxu0 %v499_v60  ;;  %v710_v60 = vld [vmem:[%s4045_s1 + $0x428] sm:$0xff]  ;;  %v449_v51 = vld [vmem:[%s2856_s28 + $0x500] sm:$0xff] }
  0xa4   : > { %901 = vmatmul.mubr.f32.gmra.mrb[46].mxu1 %v496_v62  ;;  %v302_v62 = vld [vmem:[%s2856_s28 + $0x68] sm:$0xff] }
  0xa5   : > { %1126 = vmatmul.mubr.f32.gmra.mrb[46].mxu0 %v498_v63  ;;  %905 = vmatprep.mubr.f32.mxu1 %v506_v0  ;;  %v386_v63 = vld [vmem:[%s2856_s28 + $0x308] sm:$0xff]  ;;  %v312_v0 = vld [vmem:[%s2856_s28 + $0xb8] sm:$0xff] }
  0xa6   : > { %1130 = vmatprep.mubr.f32.mxu0 %v508_v1  ;;  %v2478_v1 = vpack.c.bf16 %v710_v60, %v709_v59  ;;  %v467_v59 = vld [vmem:[%s2856_s28 + $0x590] sm:$0xff]  ;;  %v393_v60 = vld [vmem:[%s2856_s28 + $0x340] sm:$0xff] }
  0xa8   : > { %906 = vmatmul.mubr.f32.gmra.mrb[48].mxu1 %v505_v5  ;;  %v385_v5 = vld [vmem:[%s2856_s28 + $0x300] sm:$0xff] }
  0xa9   : > { %1131 = vmatmul.mubr.f32.gmra.mrb[48].mxu0 %v507_v6  ;;  %910 = vmatprep.mubr.f32.mxu1 %v515_v7  ;;  %v712_v6 = vld [vmem:[%s4045_s1 + $0x438] sm:$0xff]  ;;  %v311_v7 = vld [vmem:[%s2856_s28 + $0xb0] sm:$0xff] }
  0xaa   : > { %1135 = vmatprep.mubr.f32.mxu0 %v517_v8  ;;  %v321_v8 = vld [vmem:[%s2856_s28 + $0x100] sm:$0xff] }
  0xac   : > { %911 = vmatmul.mubr.f32.gmra.mrb[50].mxu1 %v514_v9 }
  0xad   : > { %1136 = vmatmul.mubr.f32.gmra.mrb[50].mxu0 %v516_v11  ;;  %915 = vmatprep.mubr.f32.mxu1 %v524_v12  ;;  %v394_v11 = vld [vmem:[%s2856_s28 + $0x348] sm:$0xff]  ;;  %v713_v12 = vld [vmem:[%s4045_s1 + $0x440] sm:$0xff] }
  0xae   : > { %1140 = vmatprep.mubr.f32.mxu0 %v526_v13  ;;  %v320_v13 = vld [vmem:[%s2856_s28 + $0xf8] sm:$0xff] }
  0xb0   : > { %916 = vmatmul.mubr.f32.gmra.mrb[52].mxu1 %v523_v16  ;;  %v404_v16 = vld [vmem:[%s2856_s28 + $0x398] sm:$0xff] }
  0xb1   : > { %1141 = vmatmul.mubr.f32.gmra.mrb[52].mxu0 %v525_v17  ;;  %920 = vmatprep.mubr.f32.mxu1 %v533_v18  ;;  %v330_v17 = vld [vmem:[%s2856_s28 + $0x148] sm:$0xff] }
  0xb2   : > { %1145 = vmatprep.mubr.f32.mxu0 %v535_v19  ;;  %v403_v19 = vld [vmem:[%s2856_s28 + $0x390] sm:$0xff] }
  0xb4   : > { %921 = vmatmul.mubr.f32.gmra.mrb[54].mxu1 %v532_v20  ;;  %v715_v20 = vld [vmem:[%s4045_s1 + $0x450] sm:$0xff] }
  0xb5   : > { %1146 = vmatmul.mubr.f32.gmra.mrb[54].mxu0 %v534_v21  ;;  %925 = vmatprep.mubr.f32.mxu1 %v542_v25  ;;  %v329_v21 = vld [vmem:[%s2856_s28 + $0x140] sm:$0xff] }
  0xb6   : > { %1150 = vmatprep.mubr.f32.mxu0 %v544_v27  ;;  %v413_v25 = vld [vmem:[%s2856_s28 + $0x3e0] sm:$0xff]  ;;  %v339_v27 = vld [vmem:[%s2856_s28 + $0x190] sm:$0xff] }
  0xb8   : > { %926 = vmatmul.mubr.f32.gmra.mrb[56].mxu1 %v541_v28 }
  0xb9   : > { %1151 = vmatmul.mubr.f32.gmra.mrb[56].mxu0 %v543_v29  ;;  %930 = vmatprep.mubr.f32.mxu1 %v551_v30  ;;  %v412_v29 = vld [vmem:[%s2856_s28 + $0x3d8] sm:$0xff]  ;;  %v717_v30 = vld [vmem:[%s4045_s1 + $0x460] sm:$0xff] }
  0xba   : > { %1155 = vmatprep.mubr.f32.mxu0 %v553_v31  ;;  %v338_v31 = vld [vmem:[%s2856_s28 + $0x188] sm:$0xff] }
  0xbc   : > { %931 = vmatmul.mubr.f32.gmra.mrb[58].mxu1 %v550_v32  ;;  %v422_v32 = vld [vmem:[%s2856_s28 + $0x428] sm:$0xff] }
  0xbd   : > { %1156 = vmatmul.mubr.f32.gmra.mrb[58].mxu0 %v552_v33  ;;  %935 = vmatprep.mubr.f32.mxu1 %v560_v35  ;;  %v348_v33 = vld [vmem:[%s2856_s28 + $0x1d8] sm:$0xff] }
  0xbe   : > { %1160 = vmatprep.mubr.f32.mxu0 %v562_v36  ;;  %v421_v36 = vld [vmem:[%s2856_s28 + $0x420] sm:$0xff] }
  0xc0   : > { %936 = vmatmul.mubr.f32.gmra.mrb[60].mxu1 %v559_v38  ;;  %v719_v38 = vld [vmem:[%s4045_s1 + $0x470] sm:$0xff] }
  0xc1   : > { %1161 = vmatmul.mubr.f32.gmra.mrb[60].mxu0 %v561_v39  ;;  %940 = vmatprep.mubr.f32.mxu1 %v569_v40  ;;  %v347_v39 = vld [vmem:[%s2856_s28 + $0x1d0] sm:$0xff] }
  0xc2   : > { %1165 = vmatprep.mubr.f32.mxu0 %v571_v41  ;;  %v431_v40 = vld [vmem:[%s2856_s28 + $0x470] sm:$0xff]  ;;  %v357_v41 = vld [vmem:[%s2856_s28 + $0x220] sm:$0xff] }
  0xc4   : > { %941 = vmatmul.mubr.f32.gmra.mrb[62].mxu1 %v568_v42 }
  0xc5   : > { %1166 = vmatmul.mubr.f32.gmra.mrb[62].mxu0 %v570_v43  ;;  %1500 = vmatprep.mubr.f32.mxu1 %v368_v45  ;;  %v430_v43 = vld [vmem:[%s2856_s28 + $0x468] sm:$0xff]  ;;  %v356_v45 = vld [vmem:[%s2856_s28 + $0x218] sm:$0xff] }
  0xc6   : > { %1235 = vmatprep.mubr.f32.mxu0 %v294_v46  ;;  %v440_v46 = vld [vmem:[%s2856_s28 + $0x4b8] sm:$0xff] }
  0xc8   : > { %1501 = vmatmul.mubr.f32.vlgmr.msra.gmra.mrb[64].mxu1 %v367_v48  ;;  %v439_v48 = vld [vmem:[%s2856_s28 + $0x4b0] sm:$0xff] }
  0xc9   : > { %1236 = vmatmul.mubr.f32.vlgmr.msra.gmra.mrb[0].mxu0 %v293_v52  ;;  %1505 = vmatprep.mubr.f32.mxu1 %v377_v53  ;;  %v375_v52 = vld [vmem:[%s2856_s28 + $0x2b0] sm:$0xff]  ;;  %v374_v53 = vld [vmem:[%s2856_s28 + $0x2a8] sm:$0xff] }
  0xca   : > { %2424 = vmatpush1.bf16.msra.mxu0 %v3026_v47  ;;  %1240 = vmatprep.mubr.f32.mxu0 %v303_v54  ;;  %v711_v47 = vld [vmem:[%s4045_s1 + $0x430] sm:$0xff]  ;;  %v458_v54 = vld [vmem:[%s2856_s28 + $0x548] sm:$0xff] }
  0xcb   : > { %2425 = vmatprep.subr.bf16.mxu0 %v2721_v3  ;;  %2473 = vmatpush3.bf16.msra.mxu1 %v3343_v23  ;;  %v395_v23 = vld [vmem:[%s2856_s28 + $0x350] sm:$0xff]  ;;  %v2482_v9 = vpack.c.bf16 %v712_v6, %v711_v47  ;;  %v410_v6 = vld [vmem:[%s2856_s28 + $0x3c8] sm:$0xff] }
  0xcc   : > { %1506 = vmatmul.mubr.f32.gmra.mrb[66].mxu1 %v376_v58  ;;  %2475 = vmatprep.subr.bf16.mxu1 %v2474_v56  ;;  %v383_v58 = vld [vmem:[%s2856_s28 + $0x2f0] sm:$0xff] }
  0xcd   : > { %1241 = vmatmul.mubr.f32.gmra.mrb[2].mxu0 %v302_v62  ;;  %1510 = vmatprep.mubr.f32.mxu1 %v386_v63  ;;  %v392_v62 = vld [vmem:[%s2856_s28 + $0x338] sm:$0xff]  ;;  %v411_v47 = vld [vmem:[%s2856_s28 + $0x3d0] sm:$0xff] }
  0xce   : > { %1245 = vmatprep.mubr.f32.mxu0 %v312_v0  ;;  %2427 = vmatpush1.bf16.msra.mxu0 %v3046_v57  ;;  %v714_v57 = vld [vmem:[%s4045_s1 + $0x448] sm:$0xff]  ;;  %v476_v63 = vld [vmem:[%s2856_s28 + $0x5d8] sm:$0xff] }
  0xcf   : > { %2428 = vmatprep.subr.bf16.mxu0 %v2721_v3  ;;  %2477 = vmatpush3.bf16.msra.mxu1 %v2474_v56  ;;  %v2486_v18 = vpack.c.bf16 %v714_v57, %v713_v12  ;;  %v384_v56 = vld [vmem:[%s2856_s28 + $0x2f8] sm:$0xff]  ;;  %v402_v0 = vld [vmem:[%s2856_s28 + $0x388] sm:$0xff] }
  0xd0   : > { %1511 = vmatmul.mubr.f32.gmra.mrb[68].mxu1 %v385_v5  ;;  %2479 = vmatprep.subr.bf16.mxu1 %v2478_v1  ;;  %v485_v5 = vld [vmem:[%s2856_s28 + $0x620] sm:$0xff]  ;;  %v428_v12 = vld [vmem:[%s2856_s28 + $0x458] sm:$0xff] }
  0xd1   : > { %1246 = vmatmul.mubr.f32.gmra.mrb[4].mxu0 %v311_v7  ;;  %1515 = vmatprep.mubr.f32.mxu1 %v395_v23  ;;  %v494_v7 = vld [vmem:[%s2856_s28 + $0x668] sm:$0xff]  ;;  %v420_v23 = vld [vmem:[%s2856_s28 + $0x418] sm:$0xff] }
  0xd2   : > { %1250 = vmatprep.mubr.f32.mxu0 %v321_v8  ;;  %2430 = vmatpush1.bf16.msra.mxu0 %v3067_v4  ;;  %v716_v4 = vld [vmem:[%s4045_s1 + $0x458] sm:$0xff]  ;;  %v419_v8 = vld [vmem:[%s2856_s28 + $0x410] sm:$0xff] }
  0xd3   : > { %2431 = vmatprep.subr.bf16.mxu0 %v2721_v3  ;;  %2481 = vmatpush3.bf16.msra.mxu1 %v2478_v1  ;;  %v2490_v28 = vpack.c.bf16 %v716_v4, %v715_v20  ;;  %v401_v1 = vld [vmem:[%s2856_s28 + $0x380] sm:$0xff]  ;;  %v512_v57 = vld [vmem:[%s2856_s28 + $0x6f8] sm:$0xff] }
  0xd4   : > { %1516 = vmatmul.mubr.f32.gmra.mrb[70].mxu1 %v394_v11  ;;  %2483 = vmatprep.subr.bf16.mxu1 %v2482_v9  ;;  %v429_v11 = vld [vmem:[%s2856_s28 + $0x460] sm:$0xff]  ;;  %v456_v20 = vld [vmem:[%s2856_s28 + $0x538] sm:$0xff] }
  0xd5   : > { %1251 = vmatmul.mubr.f32.gmra.mrb[6].mxu0 %v320_v13  ;;  %1520 = vmatprep.mubr.f32.mxu1 %v404_v16  ;;  %v438_v13 = vld [vmem:[%s2856_s28 + $0x4a8] sm:$0xff]  ;;  %v437_v16 = vld [vmem:[%s2856_s28 + $0x4a0] sm:$0xff] }
  0xd6   : > { %1255 = vmatprep.mubr.f32.mxu0 %v330_v17  ;;  %2433 = vmatpush1.bf16.msra.mxu0 %v3088_v14  ;;  %v718_v14 = vld [vmem:[%s4045_s1 + $0x468] sm:$0xff]  ;;  %v521_v17 = vld [vmem:[%s2856_s28 + $0x740] sm:$0xff] }
  0xd7   : > { %2434 = vmatprep.subr.bf16.mxu0 %v2721_v3  ;;  %2485 = vmatpush3.bf16.msra.mxu1 %v2482_v9  ;;  %v2494_v35 = vpack.c.bf16 %v718_v14, %v717_v30  ;;  %v503_v9 = vld [vmem:[%s2856_s28 + $0x6b0] sm:$0xff]  ;;  %v529_v4 = vld [vmem:[%s2856_s28 + $0x780] sm:$0xff]  ;;  %v474_v30 = vld [vmem:[%s2856_s28 + $0x5c8] sm:$0xff] }
  0xd8   : > { %1521 = vmatmul.mubr.f32.gmra.mrb[72].mxu1 %v403_v19  ;;  %2487 = vmatprep.subr.bf16.mxu1 %v2486_v18  ;;  %v530_v19 = vld [vmem:[%s2856_s28 + $0x788] sm:$0xff]  ;;  %v547_v14 = vld [vmem:[%s2856_s28 + $0x810] sm:$0xff] }
  0xd9   : > { %1256 = vmatmul.mubr.f32.gmra.mrb[8].mxu0 %v329_v21  ;;  %1525 = vmatprep.mubr.f32.mxu1 %v413_v25  ;;  %v539_v21 = vld [vmem:[%s2856_s28 + $0x7d0] sm:$0xff]  ;;  %v465_v25 = vld [vmem:[%s2856_s28 + $0x580] sm:$0xff] }
  0xda   : > { %1260 = vmatprep.mubr.f32.mxu0 %v339_v27  ;;  %2436 = vmatpush1.bf16.msra.mxu0 %v3109_v24  ;;  %v720_v24 = vld [vmem:[%s4045_s1 + $0x478] sm:$0xff]  ;;  %v538_v27 = vld [vmem:[%s2856_s28 + $0x7c8] sm:$0xff] }
  0xdb   : > { %2437 = vmatprep.subr.bf16.mxu0 %v2721_v3  ;;  %2489 = vmatpush3.bf16.msra.mxu1 %v2486_v18  ;;  %v2498_v42 = vpack.c.bf16 %v720_v24, %v719_v38  ;;  %v447_v18 = vld [vmem:[%s2856_s28 + $0x4f0] sm:$0xff]  ;;  %v566_v38 = vld [vmem:[%s2856_s28 + $0x8a8] sm:$0xff]  ;;  %v492_v24 = vld [vmem:[%s2856_s28 + $0x658] sm:$0xff] }
  0xdc   : > { %1526 = vmatmul.mubr.f32.gmra.mrb[74].mxu1 %v412_v29  ;;  %2491 = vmatprep.subr.bf16.mxu1 %v2490_v28  ;;  %v548_v29 = vld [vmem:[%s2856_s28 + $0x818] sm:$0xff] }
  0xdd   : > { %1261 = vmatmul.mubr.f32.gmra.mrb[10].mxu0 %v338_v31  ;;  %1530 = vmatprep.mubr.f32.mxu1 %v422_v32  ;;  %v473_v31 = vld [vmem:[%s2856_s28 + $0x5c0] sm:$0xff] }
  0xde   : > { %1265 = vmatprep.mubr.f32.mxu0 %v348_v33  ;;  %2439 = vmatpush1.bf16.msra.mxu0 %v3130_v34  ;;  %v366_v34 = vld [vmem:[%s2856_s28 + $0x268] sm:$0xff]  ;;  %v557_v32 = vld [vmem:[%s2856_s28 + $0x860] sm:$0xff]  ;;  %v483_v33 = vld [vmem:[%s2856_s28 + $0x610] sm:$0xff] }
  0xdf   : > { %2440 = vmatprep.subr.bf16.mxu0 %v2721_v3  ;;  %2493 = vmatpush3.bf16.msra.mxu1 %v2490_v28  ;;  %v464_v28 = vld [vmem:[%s2856_s28 + $0x578] sm:$0xff] }
  0xe0   : > { %1531 = vmatmul.mubr.f32.gmra.mrb[76].mxu1 %v421_v36  ;;  %2495 = vmatprep.subr.bf16.mxu1 %v2494_v35  ;;  %v482_v36 = vld [vmem:[%s2856_s28 + $0x608] sm:$0xff] }
  0xe1   : > { %1266 = vmatmul.mubr.f32.gmra.mrb[12].mxu0 %v347_v39  ;;  %1535 = vmatprep.mubr.f32.mxu1 %v431_v40 }
  0xe2   : > { %1270 = vmatprep.mubr.f32.mxu0 %v357_v41  ;;  %2442 = vmatpush1.bf16.msra.mxu0 %v3151_v44  ;;  %v448_v44 = vld [vmem:[%s2856_s28 + $0x4f8] sm:$0xff]  ;;  %v565_v41 = vld [vmem:[%s2856_s28 + $0x8a0] sm:$0xff] }
  0xe3   : > { %2443 = vmatprep.subr.bf16.mxu0 %v2721_v3  ;;  %2497 = vmatpush3.bf16.msra.mxu1 %v2494_v35  ;;  %v556_v35 = vld [vmem:[%s2856_s28 + $0x858] sm:$0xff] }
  0xe4   : > { %1536 = vmatmul.mubr.f32.gmra.mrb[78].mxu1 %v430_v43  ;;  %2499 = vmatprep.subr.bf16.mxu1 %v2498_v42  ;;  %v575_v43 = vld [vmem:[%s2856_s28 + $0x8f0] sm:$0xff] }
  0xe5   : > { %1271 = vmatmul.mubr.f32.gmra.mrb[14].mxu0 %v356_v45  ;;  %1540 = vmatprep.mubr.f32.mxu1 %v440_v46  ;;  %v501_v45 = vld [vmem:[%s2856_s28 + $0x6a0] sm:$0xff] }
  0xe6   : > { %1275 = vmatprep.mubr.f32.mxu0 %v366_v34  ;;  %2445 = vmatpush1.bf16.msra.mxu0 %v3172_v55  ;;  %v457_v55 = vld [vmem:[%s2856_s28 + $0x540] sm:$0xff] }
  0xe7   : > { %2446 = vmatprep.subr.bf16.mxu0 %v2721_v3  ;;  %2501 = vmatpush3.bf16.msra.mxu1 %v2498_v42  ;;  %v491_v42 = vld [vmem:[%s2856_s28 + $0x650] sm:$0xff] }
  0xe8   : > { %1541 = vmatmul.mubr.f32.gmra.mrb[80].mxu1 %v439_v48  ;;  %v574_v48 = vld [vmem:[%s2856_s28 + $0x8e8] sm:$0xff] }
  0xe9   : > { %1276 = vmatmul.mubr.f32.gmra.mrb[16].mxu0 %v365_v50  ;;  %1545 = vmatprep.mubr.f32.mxu1 %v449_v51  ;;  %v500_v50 = vld [vmem:[%s2856_s28 + $0x698] sm:$0xff]  ;;  %v297_v51 = vld [vmem:[%s2856_s28 + $0x40] sm:$0xff] }
  0xea   : > { %1280 = vmatprep.mubr.f32.mxu0 %v375_v52  ;;  %2448 = vmatpush1.bf16.msra.mxu0 %v3193_v2  ;;  %v466_v2 = vld [vmem:[%s2856_s28 + $0x588] sm:$0xff] }
  0xeb   : > { %2449 = vmatprep.subr.bf16.mxu0 %v2721_v3  ;;  %v510_v52 = vld [vmem:[%s2856_s28 + $0x6e8] sm:$0xff] }
  0xec   : > { %1546 = vmatmul.mubr.f32.gmra.mrb[82].mxu1 %v448_v44 }
  0xed   : > { %1281 = vmatmul.mubr.f32.gmra.mrb[18].mxu0 %v374_v53  ;;  %1550 = vmatprep.mubr.f32.mxu1 %v458_v54  ;;  %v306_v54 = vld [vmem:[%s2856_s28 + $0x88] sm:$0xff] }
  0xee   : > { %1285 = vmatprep.mubr.f32.mxu0 %v384_v56  ;;  %2451 = vmatpush1.bf16.msra.mxu0 %v3214_v15  ;;  %v475_v15 = vld [vmem:[%s2856_s28 + $0x5d0] sm:$0xff]  ;;  %v509_v56 = vld [vmem:[%s2856_s28 + $0x6e0] sm:$0xff] }
  0xef   : > { %2452 = vmatprep.subr.bf16.mxu0 %v2721_v3 }
  0xf0   : > { %1551 = vmatmul.mubr.f32.gmra.mrb[84].mxu1 %v457_v55  ;;  %v315_v55 = vld [vmem:[%s2856_s28 + $0xd0] sm:$0xff] }
  0xf1   : > { %1286 = vmatmul.mubr.f32.gmra.mrb[20].mxu0 %v383_v58  ;;  %1555 = vmatprep.mubr.f32.mxu1 %v467_v59  ;;  %v519_v58 = vld [vmem:[%s2856_s28 + $0x730] sm:$0xff] }
  0xf2   : > { %1290 = vmatprep.mubr.f32.mxu0 %v393_v60  ;;  %2454 = vmatpush1.bf16.msra.mxu0 %v3235_v26  ;;  %v484_v26 = vld [vmem:[%s2856_s28 + $0x618] sm:$0xff] }
  0xf3   : > { %2455 = vmatprep.subr.bf16.mxu0 %v2721_v3 }
  0xf4   : > { %1556 = vmatmul.mubr.f32.gmra.mrb[86].mxu1 %v466_v2  ;;  %v324_v2 = vld [vmem:[%s2856_s28 + $0x118] sm:$0xff] }
  0xf5   : > { %1291 = vmatmul.mubr.f32.gmra.mrb[22].mxu0 %v392_v62  ;;  %1560 = vmatprep.mubr.f32.mxu1 %v476_v63  ;;  %v518_v62 = vld [vmem:[%s2856_s28 + $0x728] sm:$0xff]  ;;  %v333_v63 = vld [vmem:[%s2856_s28 + $0x160] sm:$0xff] }
  0xf6   : > { %1295 = vmatprep.mubr.f32.mxu0 %v402_v0  ;;  %2457 = vmatpush1.bf16.msra.mxu0 %v3256_v37  ;;  %v493_v37 = vld [vmem:[%s2856_s28 + $0x660] sm:$0xff]  ;;  %v528_v0 = vld [vmem:[%s2856_s28 + $0x778] sm:$0xff] }
  0xf7   : > { %2458 = vmatprep.subr.bf16.mxu0 %v2721_v3 }
  0xf8   : > { %1561 = vmatmul.mubr.f32.gmra.mrb[88].mxu1 %v475_v15 }
  0xf9   : > { %1296 = vmatmul.mubr.f32.gmra.mrb[24].mxu0 %v401_v1  ;;  %1565 = vmatprep.mubr.f32.mxu1 %v485_v5  ;;  %v342_v5 = vld [vmem:[%s2856_s28 + $0x1a8] sm:$0xff] }
  0xfa   : > { %1300 = vmatprep.mubr.f32.mxu0 %v411_v47  ;;  %2460 = vmatpush1.bf16.msra.mxu0 %v3277_v49  ;;  %v502_v49 = vld [vmem:[%s2856_s28 + $0x6a8] sm:$0xff]  ;;  %v527_v47 = vld [vmem:[%s2856_s28 + $0x770] sm:$0xff] }
  0xfb   : > { %2461 = vmatprep.subr.bf16.mxu0 %v2721_v3 }
  0xfc   : > { %1566 = vmatmul.mubr.f32.gmra.mrb[90].mxu1 %v484_v26  ;;  %v351_v26 = vld [vmem:[%s2856_s28 + $0x1f0] sm:$0xff] }
  0xfd   : > { %1301 = vmatmul.mubr.f32.gmra.mrb[26].mxu0 %v410_v6  ;;  %1570 = vmatprep.mubr.f32.mxu1 %v494_v7  ;;  %v537_v6 = vld [vmem:[%s2856_s28 + $0x7c0] sm:$0xff] }
  0xfe   : > { %1305 = vmatprep.mubr.f32.mxu0 %v420_v23  ;;  %2463 = vmatpush1.bf16.msra.mxu0 %v3298_v61  ;;  %v511_v61 = vld [vmem:[%s2856_s28 + $0x6f0] sm:$0xff] }
  0xff   : > { %2464 = vmatprep.subr.bf16.mxu0 %v2721_v3 }
 0x100   : > { %1571 = vmatmul.mubr.f32.gmra.mrb[92].mxu1 %v493_v37  ;;  %v360_v37 = vld [vmem:[%s2856_s28 + $0x238] sm:$0xff] }
 0x101   : > { %1306 = vmatmul.mubr.f32.gmra.mrb[28].mxu0 %v419_v8  ;;  %1575 = vmatprep.mubr.f32.mxu1 %v503_v9  ;;  %v536_v8 = vld [vmem:[%s2856_s28 + $0x7b8] sm:$0xff]  ;;  %v369_v9 = vld [vmem:[%s2856_s28 + $0x280] sm:$0xff] }
 0x102   : > { %1310 = vmatprep.mubr.f32.mxu0 %v429_v11  ;;  %2466 = vmatpush1.bf16.msra.mxu0 %v3319_v10  ;;  %v446_v10 = vld [vmem:[%s2856_s28 + $0x4e8] sm:$0xff] }
 0x103   : > { %2467 = vmatprep.subr.bf16.mxu0 %v2721_v3  ;;  %v520_v3 = vld [vmem:[%s2856_s28 + $0x738] sm:$0xff]  ;;  %v546_v11 = vld [vmem:[%s2856_s28 + $0x808] sm:$0xff] }
 0x104   : > { %1576 = vmatmul.mubr.f32.gmra.mrb[94].mxu1 %v502_v49 }
 0x105   : > { %1311 = vmatmul.mubr.f32.gmra.mrb[30].mxu0 %v428_v12  ;;  %1580 = vmatprep.mubr.f32.mxu1 %v512_v57  ;;  %v378_v57 = vld [vmem:[%s2856_s28 + $0x2c8] sm:$0xff] }
 0x106   : > { %1315 = vmatprep.mubr.f32.mxu0 %v438_v13  ;;  %2469 = vmatpush1.bf16.msra.mxu0 %v3340_v22  ;;  %v455_v22 = vld [vmem:[%s2856_s28 + $0x530] sm:$0xff]  ;;  %v545_v13 = vld [vmem:[%s2856_s28 + $0x800] sm:$0xff] }
 0x108   : > { %1581 = vmatmul.mubr.f32.gmra.mrb[96].mxu1 %v511_v61  ;;  %v387_v61 = vld [vmem:[%s2856_s28 + $0x310] sm:$0xff] }
 0x109   : > { %1316 = vmatmul.mubr.f32.gmra.mrb[32].mxu0 %v437_v16  ;;  %1585 = vmatprep.mubr.f32.mxu1 %v521_v17  ;;  %v555_v16 = vld [vmem:[%s2856_s28 + $0x850] sm:$0xff] }
 0x10a   : > { %1320 = vmatprep.mubr.f32.mxu0 %v447_v18 }
 0x10c   : > { %1586 = vmatmul.mubr.f32.gmra.mrb[98].mxu1 %v520_v3  ;;  %v396_v3 = vld [vmem:[%s2856_s28 + $0x358] sm:$0xff] }
 0x10d   : > { %1321 = vmatmul.mubr.f32.gmra.mrb[34].mxu0 %v446_v10  ;;  %1590 = vmatprep.mubr.f32.mxu1 %v530_v19  ;;  %v554_v10 = vld [vmem:[%s2856_s28 + $0x848] sm:$0xff]  ;;  %v405_v19 = vld [vmem:[%s2856_s28 + $0x3a0] sm:$0xff] }
 0x10e   : > { %1325 = vmatprep.mubr.f32.mxu0 %v456_v20  ;;  %v564_v20 = vld [vmem:[%s2856_s28 + $0x898] sm:$0xff] }
 0x110   : > { %1591 = vmatmul.mubr.f32.gmra.mrb[100].mxu1 %v529_v4 }
 0x111   : > { %1326 = vmatmul.mubr.f32.gmra.mrb[36].mxu0 %v455_v22  ;;  %1595 = vmatprep.mubr.f32.mxu1 %v539_v21  ;;  %v414_v21 = vld [vmem:[%s2856_s28 + $0x3e8] sm:$0xff] }
 0x112   : > { %1330 = vmatprep.mubr.f32.mxu0 %v465_v25  ;;  %v563_v25 = vld [vmem:[%s2856_s28 + $0x890] sm:$0xff] }
 0x114   : > { %1596 = vmatmul.mubr.f32.gmra.mrb[102].mxu1 %v538_v27  ;;  %v423_v27 = vld [vmem:[%s2856_s28 + $0x430] sm:$0xff] }
 0x115   : > { %1331 = vmatmul.mubr.f32.gmra.mrb[38].mxu0 %v464_v28  ;;  %1600 = vmatprep.mubr.f32.mxu1 %v548_v29  ;;  %v573_v28 = vld [vmem:[%s2856_s28 + $0x8e0] sm:$0xff] }
 0x116   : > { %1335 = vmatprep.mubr.f32.mxu0 %v474_v30 }
 0x118   : > { %1601 = vmatmul.mubr.f32.gmra.mrb[104].mxu1 %v547_v14  ;;  %v432_v14 = vld [vmem:[%s2856_s28 + $0x478] sm:$0xff] }
 0x119   : > { %1336 = vmatmul.mubr.f32.gmra.mrb[40].mxu0 %v473_v31  ;;  %1605 = vmatprep.mubr.f32.mxu1 %v557_v32  ;;  %v572_v31 = vld [vmem:[%s2856_s28 + $0x8d8] sm:$0xff]  ;;  %v441_v32 = vld [vmem:[%s2856_s28 + $0x4c0] sm:$0xff] }
 0x11a   : > { %1340 = vmatprep.mubr.f32.mxu0 %v483_v33  ;;  %v296_v33 = vld [vmem:[%s2856_s28 + $0x38] sm:$0xff] }
 0x11b   : > { %v3574_v39 = vpop.f32.mrb[0].mxu1 }
 0x11c   : > { %1606 = vmatmul.mubr.f32.gmra.mrb[106].mxu1 %v556_v35  ;;  %v789_v40 = vpop.f32.mrb[1].mxu1 }
 0x11d   : > { %1341 = vmatmul.mubr.f32.gmra.mrb[42].mxu0 %v482_v36  ;;  %1610 = vmatprep.mubr.f32.mxu1 %v566_v38  ;;  %v450_v38 = vld [vmem:[%s2856_s28 + $0x508] sm:$0xff]  ;;  %v459_v40 = vld [vmem:[%s2856_s28 + $0x550] sm:$0xff] }
 0x11e   : > { %1345 = vmatprep.mubr.f32.mxu0 %v492_v24  ;;  %v295_v24 = vld [vmem:[%s2856_s28 + $0x30] sm:$0xff] }
 0x11f   : > { %v3580_v46 = vpop.f32.mrb[2].mxu1 }
 0x120   : > { %1611 = vmatmul.mubr.f32.gmra.mrb[108].mxu1 %v565_v41  ;;  %v794_v34 = vpop.f32.mrb[3].mxu1  ;;  %v305_v41 = vld [vmem:[%s2856_s28 + $0x80] sm:$0xff] }
 0x121   : > { %1346 = vmatmul.mubr.f32.gmra.mrb[44].mxu0 %v491_v42  ;;  %1615 = vmatprep.mubr.f32.mxu1 %v575_v43  ;;  %v304_v34 = vld [vmem:[%s2856_s28 + $0x78] sm:$0xff] }
 0x122   : > { %1350 = vmatprep.mubr.f32.mxu0 %v501_v45  ;;  %v468_v45 = vld [vmem:[%s2856_s28 + $0x598] sm:$0xff] }
 0x123   : > { %v3586_v44 = vpop.f32.mrb[4].mxu1 }
 0x124   : > { %1616 = vmatmul.mubr.f32.gmra.mrb[110].mxu1 %v574_v48  ;;  %v799_v53 = vpop.f32.mrb[5].mxu1  ;;  %v477_v48 = vld [vmem:[%s2856_s28 + $0x5e0] sm:$0xff] }
 0x125   : > { %1351 = vmatmul.mubr.f32.gmra.mrb[46].mxu0 %v500_v50  ;;  %2230 = vmatprep.mubr.f32.mxu1 %v297_v51  ;;  %v314_v50 = vld [vmem:[%s2856_s28 + $0xc8] sm:$0xff] }
 0x126   : > { %1355 = vmatprep.mubr.f32.mxu0 %v510_v52  ;;  %v486_v53 = vld [vmem:[%s2856_s28 + $0x628] sm:$0xff] }
 0x127   : > { %v3592_v59 = vpop.f32.mrb[6].mxu1 }
 0x128   : > { %2231 = vmatmul.mubr.f32.vlgmr.msra.gmra.mrb[112].mxu1 %v306_v54  ;;  %v804_v60 = vpop.f32.mrb[7].mxu1  ;;  %v313_v54 = vld [vmem:[%s2856_s28 + $0xc0] sm:$0xff] }
 0x129   : > { %1356 = vmatmul.mubr.f32.gmra.mrb[48].mxu0 %v509_v56  ;;  %2233 = vmatprep.mubr.f32.mxu1 %v315_v55  ;;  %v495_v56 = vld [vmem:[%s2856_s28 + $0x670] sm:$0xff] }
 0x12a   : > { %1360 = vmatprep.mubr.f32.mxu0 %v519_v58  ;;  %v323_v55 = vld [vmem:[%s2856_s28 + $0x110] sm:$0xff] }
 0x12b   : > { %v3598_v15 = vpop.f32.mrb[8].mxu1 }
 0x12c   : > { %2234 = vmatmul.mubr.f32.gmra.mrb[114].mxu1 %v324_v2  ;;  %v809_v1 = vpop.f32.mrb[9].mxu1  ;;  %v504_v2 = vld [vmem:[%s2856_s28 + $0x6b8] sm:$0xff] }
 0x12d   : > { %1361 = vmatmul.mubr.f32.gmra.mrb[50].mxu0 %v518_v62  ;;  %2236 = vmatprep.mubr.f32.mxu1 %v333_v63  ;;  %v322_v62 = vld [vmem:[%s2856_s28 + $0x108] sm:$0xff]  ;;  %v513_v63 = vld [vmem:[%s2856_s28 + $0x700] sm:$0xff] }
 0x12e   : > { %1365 = vmatprep.mubr.f32.mxu0 %v528_v0  ;;  %v332_v0 = vld [vmem:[%s2856_s28 + $0x158] sm:$0xff] }
 0x12f   : > { %v3604_v7 = vpop.f32.mrb[10].mxu1 }
 0x130   : > { %2237 = vmatmul.mubr.f32.gmra.mrb[116].mxu1 %v342_v5  ;;  %v814_v23 = vpop.f32.mrb[11].mxu1 }
 0x131   : > { %1366 = vmatmul.mubr.f32.gmra.mrb[52].mxu0 %v527_v47  ;;  %2239 = vmatprep.mubr.f32.mxu1 %v351_v26  ;;  %v522_v47 = vld [vmem:[%s2856_s28 + $0x748] sm:$0xff]  ;;  %v331_v26 = vld [vmem:[%s2856_s28 + $0x150] sm:$0xff]  ;;  %v341_v23 = vld [vmem:[%s2856_s28 + $0x1a0] sm:$0xff] }
 0x132   : > { %1370 = vmatprep.mubr.f32.mxu0 %v537_v6  ;;  %v531_v6 = vld [vmem:[%s2856_s28 + $0x790] sm:$0xff] }
 0x133   : > { %v3610_v49 = vpop.f32.mrb[12].mxu1 }
 0x134   : > { %2240 = vmatmul.mubr.f32.gmra.mrb[118].mxu1 %v360_v37  ;;  %v819_v12 = vpop.f32.mrb[13].mxu1 }
 0x135   : > { %1371 = vmatmul.mubr.f32.gmra.mrb[54].mxu0 %v536_v8  ;;  %2242 = vmatprep.mubr.f32.mxu1 %v369_v9  ;;  %v540_v9 = vld [vmem:[%s2856_s28 + $0x7d8] sm:$0xff]  ;;  %v549_v12 = vld [vmem:[%s2856_s28 + $0x820] sm:$0xff] }
 0x136   : > { %1375 = vmatprep.mubr.f32.mxu0 %v546_v11  ;;  %v340_v11 = vld [vmem:[%s2856_s28 + $0x198] sm:$0xff] }
 0x137   : > { %v3616_v17 = vpop.f32.mrb[14].mxu1 }
 0x138   : > { %2243 = vmatmul.mubr.f32.gmra.mrb[120].mxu1 %v378_v57  ;;  %v824_v18 = vpop.f32.mrb[15].mxu1  ;;  %v350_v57 = vld [vmem:[%s2856_s28 + $0x1e8] sm:$0xff] }
 0x139   : > { %1376 = vmatmul.mubr.f32.gmra.mrb[56].mxu0 %v545_v13  ;;  %2245 = vmatprep.mubr.f32.mxu1 %v387_v61  ;;  %v349_v18 = vld [vmem:[%s2856_s28 + $0x1e0] sm:$0xff] }
 0x13a   : > { %1380 = vmatprep.mubr.f32.mxu0 %v555_v16  ;;  %v558_v16 = vld [vmem:[%s2856_s28 + $0x868] sm:$0xff] }
 0x13b   : > { %v3622_v4 = vpop.f32.mrb[16].mxu1 }
 0x13c   : > { %2246 = vmatmul.mubr.f32.gmra.mrb[122].mxu1 %v396_v3  ;;  %v829_v22 = vpop.f32.mrb[17].mxu1  ;;  %v567_v3 = vld [vmem:[%s2856_s28 + $0x8b0] sm:$0xff] }
 0x13d   : > { %1381 = vmatmul.mubr.f32.gmra.mrb[58].mxu0 %v554_v10  ;;  %2248 = vmatprep.mubr.f32.mxu1 %v405_v19  ;;  %v359_v10 = vld [vmem:[%s2856_s28 + $0x230] sm:$0xff]  ;;  %v576_v22 = vld [vmem:[%s2856_s28 + $0x8f8] sm:$0xff] }
 0x13e   : > { %1385 = vmatprep.mubr.f32.mxu0 %v564_v20 }
 0x13f   : > { %v3628_v29 = vpop.f32.mrb[18].mxu1 }
 0x140   : > { %2249 = vmatmul.mubr.f32.gmra.mrb[124].mxu1 %v414_v21  ;;  %v834_v30 = vpop.f32.mrb[19].mxu1  ;;  %v358_v21 = vld [vmem:[%s2856_s28 + $0x228] sm:$0xff]  ;;  %s2145_s28 = sshll.u32 %s4054_s9, 3  ;;  %s2146_s9 = sshll.u32 %s4056_s15, 3 }
 0x141   : > { %1386 = vmatmul.mubr.f32.gmra.mrb[60].mxu0 %v563_v25  ;;  %2251 = vmatprep.mubr.f32.mxu1 %v423_v27  ;;  %s3792_s5 = scalar_lea.vmem %s4046_s2, %s2145_s28  ;;  %s276_s8 = scalar_lea.vmem %s4047_s3, %s2146_s9 }
 0x142   : > { %1390 = vmatprep.mubr.f32.mxu0 %v573_v28  ;;  %s280_s15 = scalar_lea.vmem %s4048_s4, %s2146_s9 }
 0x143   : > { %v3634_v35 = vpop.f32.mrb[20].mxu1 }
 0x144   : > { %2252 = vmatmul.mubr.f32.gmra.mrb[126].mxu1 %v432_v14  ;;  %v839_v36 = vpop.f32.mrb[21].mxu1 }
 0x145   : > { %1391 = vmatmul.mubr.f32.gmra.mrb[62].mxu0 %v572_v31  ;;  %2254 = vmatprep.mubr.f32.mxu1 %v441_v32 }
 0x146   : > { %1460 = vmatprep.mubr.f32.mxu0 %v296_v33 }
 0x147   : > { %v3640_v42 = vpop.f32.mrb[22].mxu1 }
 0x148   : > { %2255 = vmatmul.mubr.f32.gmra.mrb[128].mxu1 %v450_v38  ;;  %v844_v43 = vpop.f32.mrb[23].mxu1 }
 0x149   : > { %1461 = vmatmul.mubr.f32.vlgmr.msra.gmra.mrb[0].mxu0 %v295_v24  ;;  %2257 = vmatprep.mubr.f32.mxu1 %v459_v40 }
 0x14a   : > { %1465 = vmatprep.mubr.f32.mxu0 %v305_v41 }
 0x14b   : > { %v3646_v51 = vpop.f32.mrb[24].mxu1 }
 0x14c   : > { %2258 = vmatmul.mubr.f32.gmra.mrb[130].mxu1 %v468_v45  ;;  %v849_v52 = vpop.f32.mrb[25].mxu1 }
 0x14d   : > { %1466 = vmatmul.mubr.f32.gmra.mrb[2].mxu0 %v304_v34  ;;  %2260 = vmatprep.mubr.f32.mxu1 %v477_v48 }
 0x14e   : > { %1470 = vmatprep.mubr.f32.mxu0 %v314_v50 }
 0x14f   : > { %v3652_v58 = vpop.f32.mrb[26].mxu1 }
 0x150   : > { %2261 = vmatmul.mubr.f32.gmra.mrb[132].mxu1 %v486_v53  ;;  %v854_v60 = vpop.f32.mrb[27].mxu1 }
 0x151   : > { %1471 = vmatmul.mubr.f32.gmra.mrb[4].mxu0 %v313_v54  ;;  %2263 = vmatprep.mubr.f32.mxu1 %v495_v56 }
 0x152   : > { %1475 = vmatprep.mubr.f32.mxu0 %v323_v55 }
 0x153   : > { %v3658_v1 = vpop.f32.mrb[28].mxu1 }
 0x154   : > { %2264 = vmatmul.mubr.f32.gmra.mrb[134].mxu1 %v504_v2  ;;  %v859_v5 = vpop.f32.mrb[29].mxu1 }
 0x155   : > { %1476 = vmatmul.mubr.f32.gmra.mrb[6].mxu0 %v322_v62  ;;  %2266 = vmatprep.mubr.f32.mxu1 %v513_v63 }
 0x156   : > { %1480 = vmatprep.mubr.f32.mxu0 %v332_v0 }
 0x157   : > { %v3664_v37 = vpop.f32.mrb[30].mxu1 }
 0x158   : > { %2267 = vmatmul.mubr.f32.gmra.mrb[136].mxu1 %v522_v47  ;;  %v864_v8 = vpop.f32.mrb[31].mxu1 }
 0x159   : > { %1481 = vmatmul.mubr.f32.gmra.mrb[8].mxu0 %v331_v26  ;;  %2269 = vmatprep.mubr.f32.mxu1 %v531_v6 }
 0x15a   : > { %1485 = vmatprep.mubr.f32.mxu0 %v341_v23 }
 0x15b   : > { %v3670_v13 = vpop.f32.mrb[32].mxu1 }
 0x15c   : > { %2270 = vmatmul.mubr.f32.gmra.mrb[138].mxu1 %v540_v9  ;;  %v869_v61 = vpop.f32.mrb[33].mxu1 }
 0x15d   : > { %1486 = vmatmul.mubr.f32.gmra.mrb[10].mxu0 %v340_v11  ;;  %2272 = vmatprep.mubr.f32.mxu1 %v549_v12 }
 0x15e   : > { %1490 = vmatprep.mubr.f32.mxu0 %v350_v57 }
 0x15f   : > { %v3676_v19 = vpop.f32.mrb[34].mxu1 }
 0x160   : > { %2273 = vmatmul.mubr.f32.gmra.mrb[140].mxu1 %v558_v16  ;;  %v874_v20 = vpop.f32.mrb[35].mxu1 }
 0x161   : > { %1491 = vmatmul.mubr.f32.gmra.mrb[12].mxu0 %v349_v18  ;;  %2275 = vmatprep.mubr.f32.mxu1 %v567_v3 }
 0x162   : > { %1495 = vmatprep.mubr.f32.mxu0 %v359_v10 }
 0x163   : > { %v3680_v25 = vpop.f32.mrb[36].mxu1 }
 0x164   : > { %2276 = vmatmul.mubr.f32.gmra.mrb[142].mxu1 %v576_v22  ;;  %v879_v27 = vpop.f32.mrb[37].mxu1 }
 0x165   : > { %1496 = vmatmul.mubr.f32.gmra.mrb[14].mxu0 %v358_v21 }
 0x167   : > { %v3682_v28 = vpop.f32.mrb[38].mxu1 }
 0x168   : > { %v884_v30 = vpop.f32.mrb[39].mxu1 }
 0x16b   : > { %v3684_v14 = vpop.f32.mrb[40].mxu1 }
 0x16c   : > { %v889_v31 = vpop.f32.mrb[41].mxu1 }
 0x16f   : > { %v3686_v32 = vpop.f32.mrb[42].mxu1 }
 0x170   : > { %v894_v33 = vpop.f32.mrb[43].mxu1 }
 0x173   : > { %v3688_v36 = vpop.f32.mrb[44].mxu1 }
 0x174   : > { %v899_v38 = vpop.f32.mrb[45].mxu1 }
 0x177   : > { %v3690_v24 = vpop.f32.mrb[46].mxu1 }
 0x178   : > { %v904_v40 = vpop.f32.mrb[47].mxu1 }
 0x17b   : > { %v3692_v41 = vpop.f32.mrb[48].mxu1 }
 0x17c   : > { %v909_v43 = vpop.f32.mrb[49].mxu1 }
 0x17f   : > { %v3694_v45 = vpop.f32.mrb[50].mxu1 }
 0x180   : > { %v914_v34 = vpop.f32.mrb[51].mxu1 }
 0x183   : > { %v3696_v48 = vpop.f32.mrb[52].mxu1 }
 0x184   : > { %v919_v50 = vpop.f32.mrb[53].mxu1 }
 0x187   : > { %v3698_v52 = vpop.f32.mrb[54].mxu1 }
 0x188   : > { %v924_v53 = vpop.f32.mrb[55].mxu1 }
 0x18b   : > { %v3700_v54 = vpop.f32.mrb[56].mxu1 }
 0x18c   : > { %v929_v56 = vpop.f32.mrb[57].mxu1 }
 0x18f   : > { %v3702_v55 = vpop.f32.mrb[58].mxu1 }
 0x190   : > { %v934_v60 = vpop.f32.mrb[59].mxu1 }
 0x193   : > { %v3704_v2 = vpop.f32.mrb[60].mxu1 }
 0x194   : > { %v939_v62 = vpop.f32.mrb[61].mxu1 }
 0x197   : > { %v3706_v63 = vpop.f32.mrb[62].mxu1 }
 0x198   : > { %v944_v0 = vpop.f32.mrb[63].mxu1 }
 0x19b   : > { %v1502_v5 = vpop.f32.mrb[64].mxu1 }
 0x19c   : > { %v1504_v47 = vpop.f32.mrb[65].mxu1 }
 0x19f   : > { %v1507_v26 = vpop.f32.mrb[66].mxu1 }
 0x1a0   : > { %v1509_v6 = vpop.f32.mrb[67].mxu1 }
 0x1a3   : > { %v1512_v23 = vpop.f32.mrb[68].mxu1 }
 0x1a4   : > { %v1514_v8 = vpop.f32.mrb[69].mxu1 }
 0x1a7   : > { %v1517_v9 = vpop.f32.mrb[70].mxu1 }
 0x1a8   : > { %v1519_v11 = vpop.f32.mrb[71].mxu1 }
 0x1ab   : > { %v1522_v12 = vpop.f32.mrb[72].mxu1 }
 0x1ac   : > { %v1524_v57 = vpop.f32.mrb[73].mxu1 }
 0x1af   : > { %v1527_v61 = vpop.f32.mrb[74].mxu1 }
 0x1b0   : > { %v1529_v16 = vpop.f32.mrb[75].mxu1 }
 0x1b3   : > { %v1532_v18 = vpop.f32.mrb[76].mxu1 }
 0x1b4   : > { %v1534_v3 = vpop.f32.mrb[77].mxu1 }
 0x1b7   : > { %v1537_v10 = vpop.f32.mrb[78].mxu1 }
 0x1b8   : > { %v1539_v20 = vpop.f32.mrb[79].mxu1 }
 0x1bb   : > { %v1542_v22 = vpop.f32.mrb[80].mxu1 }
 0x1bc   : > { %v1277_v21 = vpop.f32.mrb[16].mxu0  ;;  %v1544_v27 = vpop.f32.mrb[81].mxu1 }
 0x1bd   : > { %v2542_v30 = vadd.f32 %v1277_v21, %v3622_v4  ;;  %v1279_v31 = vpop.f32.mrb[17].mxu0 }
 0x1bf   : > { %v3709_v33 = vadd.f32 %v2542_v30, %v1502_v5  ;;  %v1547_v38 = vpop.f32.mrb[82].mxu1 }
 0x1c0   : > { %v1282_v40 = vpop.f32.mrb[18].mxu0  ;;  %v1549_v43 = vpop.f32.mrb[83].mxu1 }
 0x1c1   : > { %v2544_v34 = vadd.f32 %v1282_v40, %v3628_v29  ;;  %v1284_v50 = vpop.f32.mrb[19].mxu0 }
 0x1c3   : > { %v3712_v53 = vadd.f32 %v2544_v34, %v1507_v26  ;;  %v1552_v56 = vpop.f32.mrb[84].mxu1 }
 0x1c4   : > { %v1287_v60 = vpop.f32.mrb[20].mxu0  ;;  %v1554_v62 = vpop.f32.mrb[85].mxu1 }
 0x1c5   : > { %v2546_v0 = vadd.f32 %v1287_v60, %v3634_v35  ;;  %v1289_v47 = vpop.f32.mrb[21].mxu0 }
 0x1c7   : > { %v3715_v6 = vadd.f32 %v2546_v0, %v1512_v23  ;;  %v1557_v4 = vpop.f32.mrb[86].mxu1 }
 0x1c8   : > { %v1292_v8 = vpop.f32.mrb[22].mxu0  ;;  %v1559_v5 = vpop.f32.mrb[87].mxu1 }
 0x1c9   : > { %v2548_v11 = vadd.f32 %v1292_v8, %v3640_v42  ;;  %v1294_v57 = vpop.f32.mrb[23].mxu0 }
 0x1cb   : > { %v3718_v16 = vadd.f32 %v2548_v11, %v1517_v9  ;;  %v1562_v29 = vpop.f32.mrb[88].mxu1 }
 0x1cc   : > { %v1297_v3 = vpop.f32.mrb[24].mxu0  ;;  %v1564_v26 = vpop.f32.mrb[89].mxu1 }
 0x1cd   : > { %v2550_v20 = vadd.f32 %v1297_v3, %v3646_v51  ;;  %v1299_v21 = vpop.f32.mrb[25].mxu0 }
 0x1cf   : > { %v3721_v27 = vadd.f32 %v2550_v20, %v1522_v12  ;;  %v1567_v35 = vpop.f32.mrb[90].mxu1 }
 0x1d0   : > { %v1302_v30 = vpop.f32.mrb[26].mxu0  ;;  %v1569_v23 = vpop.f32.mrb[91].mxu1 }
 0x1d1   : > { %v2552_v31 = vadd.f32 %v1302_v30, %v3652_v58  ;;  %v1304_v40 = vpop.f32.mrb[27].mxu0 }
 0x1d3   : > { %v3724_v43 = vadd.f32 %v2552_v31, %v1527_v61  ;;  %v1572_v42 = vpop.f32.mrb[92].mxu1 }
 0x1d4   : > { %v1307_v34 = vpop.f32.mrb[28].mxu0  ;;  %v1574_v9 = vpop.f32.mrb[93].mxu1 }
 0x1d5   : > { %v2554_v50 = vadd.f32 %v1307_v34, %v3658_v1  ;;  %v1309_v60 = vpop.f32.mrb[29].mxu0 }
 0x1d7   : > { %v3727_v62 = vadd.f32 %v2554_v50, %v1532_v18  ;;  %v1577_v51 = vpop.f32.mrb[94].mxu1 }
 0x1d8   : > { %v1312_v0 = vpop.f32.mrb[30].mxu0  ;;  %v1579_v12 = vpop.f32.mrb[95].mxu1 }
 0x1d9   : > { %v2556_v47 = vadd.f32 %v1312_v0, %v3664_v37  ;;  %v1314_v8 = vpop.f32.mrb[31].mxu0 }
 0x1db   : > { %v3730_v5 = vadd.f32 %v2556_v47, %v1537_v10  ;;  %v1582_v58 = vpop.f32.mrb[96].mxu1 }
 0x1dc   : > { %v1317_v11 = vpop.f32.mrb[32].mxu0  ;;  %v1584_v61 = vpop.f32.mrb[97].mxu1 }
 0x1dd   : > { %v2558_v57 = vadd.f32 %v1317_v11, %v3670_v13  ;;  %v1319_v3 = vpop.f32.mrb[33].mxu0 }
 0x1df   : > { %v3733_v26 = vadd.f32 %v2558_v57, %v1542_v22  ;;  %v1587_v1 = vpop.f32.mrb[98].mxu1 }
 0x1e0   : > { %v1322_v20 = vpop.f32.mrb[34].mxu0  ;;  %v1589_v18 = vpop.f32.mrb[99].mxu1 }
 0x1e1   : > { %v2560_v21 = vadd.f32 %v1322_v20, %v3676_v19  ;;  %v1324_v30 = vpop.f32.mrb[35].mxu0 }
 0x1e3   : > { %v3736_v23 = vadd.f32 %v2560_v21, %v1547_v38  ;;  %v1592_v37 = vpop.f32.mrb[100].mxu1 }
 0x1e4   : > { %v1327_v31 = vpop.f32.mrb[36].mxu0  ;;  %v1594_v10 = vpop.f32.mrb[101].mxu1 }
 0x1e5   : > { %v2562_v40 = vadd.f32 %v1327_v31, %v3680_v25  ;;  %v1329_v34 = vpop.f32.mrb[37].mxu0 }
 0x1e7   : > { %v3739_v9 = vadd.f32 %v2562_v40, %v1552_v56  ;;  %v1597_v13 = vpop.f32.mrb[102].mxu1 }
 0x1e8   : > { %v1332_v50 = vpop.f32.mrb[38].mxu0  ;;  %v1599_v22 = vpop.f32.mrb[103].mxu1 }
 0x1e9   : > { %v2564_v60 = vadd.f32 %v1332_v50, %v3682_v28  ;;  %v1334_v0 = vpop.f32.mrb[39].mxu0 }
 0x1eb   : > { %v3742_v12 = vadd.f32 %v2564_v60, %v1557_v4  ;;  %v1602_v19 = vpop.f32.mrb[104].mxu1 }
 0x1ec   : > { %v1337_v47 = vpop.f32.mrb[40].mxu0  ;;  %v1604_v38 = vpop.f32.mrb[105].mxu1 }
 0x1ed   : > { %v2566_v8 = vadd.f32 %v1337_v47, %v3684_v14  ;;  %v1339_v11 = vpop.f32.mrb[41].mxu0 }
 0x1ef   : > { %v3745_v61 = vadd.f32 %v2566_v8, %v1562_v29  ;;  %v3747_v25 = vpop.f32.mrb[106].mxu1 }
 0x1f0   : > { %v1342_v56 = vpop.f32.mrb[42].mxu0  ;;  %v1609_v57 = vpop.f32.mrb[107].mxu1 }
 0x1f1   : > { %v2568_v3 = vadd.f32 %v1342_v56, %v3686_v32  ;;  %v1344_v20 = vpop.f32.mrb[43].mxu0 }
 0x1f3   : > { %v3750_v18 = vpop.f32.mrb[108].mxu1  ;;  %v3752_v28 = vadd.f32 %v2568_v3, %v1567_v35 }
 0x1f4   : > { %v1347_v4 = vpop.f32.mrb[44].mxu0  ;;  %v1614_v21 = vpop.f32.mrb[109].mxu1 }
 0x1f5   : > { %v2570_v30 = vadd.f32 %v1347_v4, %v3688_v36  ;;  %v1349_v31 = vpop.f32.mrb[45].mxu0 }
 0x1f7   : > { %v3755_v14 = vpop.f32.mrb[110].mxu1  ;;  %v3757_v29 = vadd.f32 %v2570_v30, %v1572_v42 }
 0x1f8   : > { %v1352_v10 = vpop.f32.mrb[46].mxu0  ;;  %v1619_v40 = vpop.f32.mrb[111].mxu1 }
 0x1f9   : > { %v2572_v34 = vadd.f32 %v1352_v10, %v3690_v24  ;;  %v1354_v50 = vpop.f32.mrb[47].mxu0 }
 0x1fb   : > { %v3760_v32 = vpop.f32.mrb[112].mxu1  ;;  %v3762_v22 = vadd.f32 %v2572_v34, %v1577_v51 }
 0x1fc   : > { %v1357_v35 = vpop.f32.mrb[48].mxu0  ;;  %v3764_v60 = vpop.f32.mrb[113].mxu1 }
 0x1fd   : > { %v2574_v0 = vadd.f32 %v1357_v35, %v3692_v41  ;;  %v1359_v36 = vpop.f32.mrb[49].mxu0 }
 0x1ff   : > { %v3767_v47 = vpop.f32.mrb[114].mxu1  ;;  %v3769_v42 = vadd.f32 %v2574_v0, %v1582_v58 }
 0x200   : > { %v1362_v38 = vpop.f32.mrb[50].mxu0  ;;  %v3771_v8 = vpop.f32.mrb[115].mxu1 }
 0x201   : > { %v2576_v24 = vadd.f32 %v1362_v38, %v3694_v45  ;;  %v1364_v11 = vpop.f32.mrb[51].mxu0 }
 0x203   : > { %v3774_v56 = vpop.f32.mrb[116].mxu1  ;;  %v3776_v51 = vadd.f32 %v2576_v24, %v1587_v1 }
 0x204   : > { %v1367_v57 = vpop.f32.mrb[52].mxu0  ;;  %v3778_v3 = vpop.f32.mrb[117].mxu1 }
 0x205   : > { %v2578_v41 = vadd.f32 %v1367_v57, %v3696_v48  ;;  %v1369_v20 = vpop.f32.mrb[53].mxu0 }
 0x207   : > { %v3781_v4 = vpop.f32.mrb[118].mxu1  ;;  %v3783_v58 = vadd.f32 %v2578_v41, %v1592_v37 }
 0x208   : > { %v1372_v21 = vpop.f32.mrb[54].mxu0  ;;  %v3785_v30 = vpop.f32.mrb[119].mxu1 }
 0x209   : > { %v2580_v45 = vadd.f32 %v1372_v21, %v3698_v52  ;;  %v1374_v31 = vpop.f32.mrb[55].mxu0 }
 0x20b   : > { %v2244_v48 = vpop.f32.mrb[120].mxu1  ;;  %v3794_v1 = vadd.f32 %v2580_v45, %v1597_v13 }
 0x20c   : > { %v1377_v10 = vpop.f32.mrb[56].mxu0  ;;  %v3797_v37 = vadd.f32 %v3712_v53, %v2244_v48  ;;  %v1727_v40 = vpop.f32.mrb[121].mxu1 }
 0x20d   : > { %v2582_v52 = vadd.f32 %v1377_v10, %v3700_v54  ;;  %v1379_v34 = vpop.f32.mrb[57].mxu0  ;;  %v3801_v50 = vadd.f32 %v3709_v33, %v1727_v40 }
 0x20e   : > { %1855 = vst [vmem:[%s3792_s5 + $0x48] sm:$0xff] %v3797_v37 }
 0x20f   : > { %1854 = vst [vmem:[%s3792_s5 + $0x40] sm:$0xff] %v3801_v50  ;;  %v2247_v35 = vpop.f32.mrb[122].mxu1  ;;  %v3807_v13 = vadd.f32 %v2582_v52, %v1602_v19 }
 0x210   : > { %v1382_v0 = vpop.f32.mrb[58].mxu0  ;;  %v3810_v53 = vadd.f32 %v3718_v16, %v2247_v35  ;;  %v1737_v36 = vpop.f32.mrb[123].mxu1 }
 0x211   : > { %v2584_v54 = vadd.f32 %v1382_v0, %v3702_v55  ;;  %v1384_v38 = vpop.f32.mrb[59].mxu0  ;;  %v3814_v33 = vadd.f32 %v3715_v6, %v1737_v36 }
 0x212   : > { %1857 = vst [vmem:[%s3792_s5 + $0x58] sm:$0xff] %v3810_v53 }
 0x213   : > { %1856 = vst [vmem:[%s3792_s5 + $0x50] sm:$0xff] %v3814_v33  ;;  %v2250_v24 = vpop.f32.mrb[124].mxu1  ;;  %v3821_v19 = vadd.f32 %v2584_v54, %v3747_v25 }
 0x214   : > { %v1387_v11 = vpop.f32.mrb[60].mxu0  ;;  %v3824_v16 = vadd.f32 %v3724_v43, %v2250_v24  ;;  %v1747_v57 = vpop.f32.mrb[125].mxu1 }
 0x215   : > { %v2586_v55 = vadd.f32 %v1387_v11, %v3704_v2  ;;  %v1389_v41 = vpop.f32.mrb[61].mxu0  ;;  %v3828_v6 = vadd.f32 %v3721_v27, %v1747_v57 }
 0x216   : > { %1859 = vst [vmem:[%s3792_s5 + $0x68] sm:$0xff] %v3824_v16 }
 0x217   : > { %1858 = vst [vmem:[%s3792_s5 + $0x60] sm:$0xff] %v3828_v6  ;;  %v2253_v20 = vpop.f32.mrb[126].mxu1  ;;  %v3835_v25 = vadd.f32 %v2586_v55, %v3750_v18 }
 0x218   : > { %v1392_v21 = vpop.f32.mrb[62].mxu0  ;;  %v3838_v43 = vadd.f32 %v3730_v5, %v2253_v20  ;;  %v1757_v45 = vpop.f32.mrb[127].mxu1 }
 0x219   : > { %v2588_v2 = vadd.f32 %v1392_v21, %v3706_v63  ;;  %v1394_v31 = vpop.f32.mrb[63].mxu0  ;;  %v3842_v27 = vadd.f32 %v3727_v62, %v1757_v45 }
 0x21a   : > { %1861 = vst [vmem:[%s3792_s5 + $0x78] sm:$0xff] %v3838_v43 }
 0x21b   : > { %1860 = vst [vmem:[%s3792_s5 + $0x70] sm:$0xff] %v3842_v27  ;;  %v2256_v18 = vpop.f32.mrb[128].mxu1  ;;  %v3849_v48 = vadd.f32 %v2588_v2, %v3755_v14 }
 0x21c   : > { %v1462_v10 = vpop.f32.mrb[0].mxu0  ;;  %v3852_v5 = vadd.f32 %v3736_v23, %v2256_v18  ;;  %v1767_v40 = vpop.f32.mrb[129].mxu1 }
 0x21d   : > { %v2534_v63 = vadd.f32 %v1462_v10, %v3574_v39  ;;  %v1464_v62 = vpop.f32.mrb[1].mxu0  ;;  %v3856_v52 = vadd.f32 %v3733_v26, %v1767_v40 }
 0x21e   : > { %1863 = vst [vmem:[%s3792_s5 + $0x88] sm:$0xff] %v3852_v5 }
 0x21f   : > { %v1688_v34 = vadd.f32 %v2534_v63, %v3764_v60  ;;  %1862 = vst [vmem:[%s3792_s5 + $0x80] sm:$0xff] %v3856_v52  ;;  %v2259_v14 = vpop.f32.mrb[130].mxu1 }
 0x220   : > { %v1467_v35 = vpop.f32.mrb[2].mxu0  ;;  %v3864_v23 = vadd.f32 %v3742_v12, %v2259_v14  ;;  %v1777_v0 = vpop.f32.mrb[131].mxu1 }
 0x221   : > { %1846 = vst [vmem:[%s3792_s5] sm:$0xff] %v1688_v34  ;;  %v2535_v39 = vadd.f32 %v1467_v35, %v3580_v46  ;;  %v1469_v36 = vpop.f32.mrb[3].mxu0  ;;  %v3869_v26 = vadd.f32 %v3739_v9, %v1777_v0  ;;  %v1909_v38 = vmul.f32 %v1688_v34, %v1688_v34 }
 0x222   : > { %1865 = vst [vmem:[%s3792_s5 + $0x98] sm:$0xff] %v3864_v23 }
 0x223   : > { %v1693_v60 = vadd.f32 %v2535_v39, %v3760_v32  ;;  %1864 = vst [vmem:[%s3792_s5 + $0x90] sm:$0xff] %v3869_v26  ;;  %v2262_v54 = vpop.f32.mrb[132].mxu1 }
 0x224   : > { %v1472_v12 = vpop.f32.mrb[4].mxu0  ;;  %v3877_v24 = vadd.f32 %v3752_v28, %v2262_v54  ;;  %v1787_v46 = vpop.f32.mrb[133].mxu1 }
 0x225   : > { %1847 = vst [vmem:[%s3792_s5 + $0x8] sm:$0xff] %v1693_v60  ;;  %v1878_v11 = vadd.f32 %v1693_v60, %v1688_v34  ;;  %v1910_v57 = vmul.f32 %v1693_v60, %v1693_v60  ;;  %v2536_v9 = vadd.f32 %v1472_v12, %v3586_v44  ;;  %v1474_v55 = vpop.f32.mrb[5].mxu0  ;;  %v3882_v32 = vadd.f32 %v3745_v61, %v1787_v46 }
 0x226   : > { %1867 = vst [vmem:[%s3792_s5 + $0xa8] sm:$0xff] %v3877_v24 }
 0x227   : > { %v1941_v41 = vadd.f32 %v1910_v57, %v1909_v38  ;;  %v1698_v20 = vadd.f32 %v2536_v9, %v3771_v8  ;;  %1866 = vst [vmem:[%s3792_s5 + $0xa0] sm:$0xff] %v3882_v32  ;;  %v2265_v28 = vpop.f32.mrb[134].mxu1 }
 0x228   : > { %v1477_v21 = vpop.f32.mrb[6].mxu0  ;;  %v3890_v45 = vadd.f32 %v3762_v22, %v2265_v28  ;;  %v1797_v44 = vpop.f32.mrb[135].mxu1 }
 0x229   : > { %1848 = vst [vmem:[%s3792_s5 + $0x10] sm:$0xff] %v1698_v20  ;;  %v1879_v2 = vadd.f32 %v1878_v11, %v1698_v20  ;;  %v1911_v31 = vmul.f32 %v1698_v20, %v1698_v20  ;;  %v2537_v61 = vadd.f32 %v1477_v21, %v3592_v59  ;;  %v1479_v18 = vpop.f32.mrb[7].mxu0  ;;  %v3895_v10 = vadd.f32 %v3757_v29, %v1797_v44 }
 0x22a   : > { %1869 = vst [vmem:[%s3792_s5 + $0xb8] sm:$0xff] %v3890_v45 }
 0x22b   : > { %v1942_v8 = vadd.f32 %v1941_v41, %v1911_v31  ;;  %v1703_v40 = vadd.f32 %v2537_v61, %v3767_v47  ;;  %1868 = vst [vmem:[%s3792_s5 + $0xb0] sm:$0xff] %v3895_v10  ;;  %v2268_v22 = vpop.f32.mrb[136].mxu1 }
 0x22c   : > { %v1482_v63 = vpop.f32.mrb[8].mxu0  ;;  %v3903_v62 = vadd.f32 %v3776_v51, %v2268_v22  ;;  %v1807_v59 = vpop.f32.mrb[137].mxu1 }
 0x22d   : > { %1849 = vst [vmem:[%s3792_s5 + $0x18] sm:$0xff] %v1703_v40  ;;  %v1880_v34 = vadd.f32 %v1879_v2, %v1703_v40  ;;  %v1912_v14 = vmul.f32 %v1703_v40, %v1703_v40  ;;  %v2538_v29 = vadd.f32 %v1482_v63, %v3598_v15  ;;  %v1484_v35 = vpop.f32.mrb[9].mxu0  ;;  %v3908_v0 = vadd.f32 %v3769_v42, %v1807_v59 }
 0x22e   : > { %1871 = vst [vmem:[%s3792_s5 + $0xc8] sm:$0xff] %v3903_v62  ;;  %v1917_v63 = vmul.f32 %v3801_v50, %v3801_v50 }
 0x22f   : > { %v1943_v47 = vadd.f32 %v1942_v8, %v1912_v14  ;;  %v1708_v39 = vadd.f32 %v2538_v29, %v3778_v3  ;;  %1870 = vst [vmem:[%s3792_s5 + $0xc0] sm:$0xff] %v3908_v0  ;;  %v2271_v51 = vpop.f32.mrb[138].mxu1 }
 0x230   : > { %v1487_v36 = vpop.f32.mrb[10].mxu0  ;;  %v3916_v60 = vadd.f32 %v3794_v1, %v2271_v51  ;;  %v1817_v15 = vpop.f32.mrb[139].mxu1 }
 0x231   : > { %1850 = vst [vmem:[%s3792_s5 + $0x20] sm:$0xff] %v1708_v39  ;;  %v1881_v54 = vadd.f32 %v1880_v34, %v1708_v39  ;;  %v1913_v38 = vmul.f32 %v1708_v39, %v1708_v39  ;;  %v2539_v42 = vadd.f32 %v1487_v36, %v3604_v7  ;;  %v1489_v12 = vpop.f32.mrb[11].mxu0  ;;  %v3921_v46 = vadd.f32 %v3783_v58, %v1817_v15 }
 0x232   : > { %1873 = vst [vmem:[%s3792_s5 + $0xd8] sm:$0xff] %v3916_v60 }
 0x233   : > { %v1944_v3 = vadd.f32 %v1943_v47, %v1913_v38  ;;  %v1713_v11 = vadd.f32 %v2539_v42, %v3774_v56  ;;  %1872 = vst [vmem:[%s3792_s5 + $0xd0] sm:$0xff] %v3921_v46  ;;  %v2274_v1 = vpop.f32.mrb[140].mxu1  ;;  %v1920_v47 = vmul.f32 %v3810_v53, %v3810_v53 }
 0x234   : > { %v1492_v57 = vpop.f32.mrb[12].mxu0  ;;  %v3929_v9 = vadd.f32 %v3821_v19, %v2274_v1  ;;  %v1827_v7 = vpop.f32.mrb[141].mxu1 }
 0x235   : > { %1851 = vst [vmem:[%s3792_s5 + $0x28] sm:$0xff] %v1713_v11  ;;  %v1882_v55 = vadd.f32 %v1881_v54, %v1713_v11  ;;  %v1914_v41 = vmul.f32 %v1713_v11, %v1713_v11  ;;  %v2540_v58 = vadd.f32 %v1492_v57, %v3610_v49  ;;  %v1494_v20 = vpop.f32.mrb[13].mxu0  ;;  %v3934_v28 = vadd.f32 %v3807_v13, %v1827_v7 }
 0x236   : > { %1875 = vst [vmem:[%s3792_s5 + $0xe8] sm:$0xff] %v3929_v9 }
 0x237   : > { %v1945_v56 = vadd.f32 %v1944_v3, %v1914_v41  ;;  %v1718_v21 = vadd.f32 %v2540_v58, %v3785_v30  ;;  %1874 = vst [vmem:[%s3792_s5 + $0xe0] sm:$0xff] %v3934_v28  ;;  %v2277_v19 = vpop.f32.mrb[142].mxu1 }
 0x238   : > { %v1497_v44 = vpop.f32.mrb[14].mxu0  ;;  %v3942_v2 = vadd.f32 %v3849_v48, %v2277_v19  ;;  %v1837_v49 = vpop.f32.mrb[143].mxu1 }
 0x239   : > { %1852 = vst [vmem:[%s3792_s5 + $0x30] sm:$0xff] %v1718_v21  ;;  %v1883_v31 = vadd.f32 %v1882_v55, %v1718_v21  ;;  %v1915_v61 = vmul.f32 %v1718_v21, %v1718_v21  ;;  %v2541_v13 = vadd.f32 %v1497_v44, %v3616_v17  ;;  %v1499_v18 = vpop.f32.mrb[15].mxu0  ;;  %v3947_v8 = vadd.f32 %v3835_v25, %v1837_v49 }
 0x23a   : > { %1877 = vst [vmem:[%s3792_s5 + $0xf8] sm:$0xff] %v3942_v2  ;;  %v1918_v25 = vmul.f32 %v3797_v37, %v3797_v37  ;;  %v1933_v18 = vmul.f32 %v3908_v0, %v3908_v0 }
 0x23b   : > { %v1946_v30 = vadd.f32 %v1945_v56, %v1915_v61  ;;  %v1723_v40 = vadd.f32 %v2541_v13, %v3781_v4  ;;  %1876 = vst [vmem:[%s3792_s5 + $0xf0] sm:$0xff] %v3947_v8  ;;  %v1919_v4 = vmul.f32 %v3814_v33, %v3814_v33  ;;  %v1932_v61 = vmul.f32 %v3890_v45, %v3890_v45 }
 0x23d   : > { %1853 = vst [vmem:[%s3792_s5 + $0x38] sm:$0xff] %v1723_v40  ;;  %v1884_v48 = vadd.f32 %v1883_v31, %v1723_v40  ;;  %v1916_v22 = vmul.f32 %v1723_v40, %v1723_v40  ;;  %v1934_v40 = vmul.f32 %v3903_v62, %v3903_v62 }
 0x23f   : > { %v1885_v59 = vadd.f32 %v1884_v48, %v3801_v50  ;;  %v1947_v17 = vadd.f32 %v1946_v30, %v1916_v22  ;;  %v1921_v50 = vmul.f32 %v3828_v6, %v3828_v6  ;;  %v1935_v22 = vmul.f32 %v3921_v46, %v3921_v46 }
 0x241   : > { %v1886_v34 = vadd.f32 %v1885_v59, %v3797_v37  ;;  %v1948_v14 = vadd.f32 %v1947_v17, %v1917_v63  ;;  %v1922_v37 = vmul.f32 %v3824_v16, %v3824_v16  ;;  %v1936_v59 = vmul.f32 %v3916_v60, %v3916_v60 }
 0x243   : > { %v1887_v29 = vadd.f32 %v1886_v34, %v3814_v33  ;;  %v1949_v35 = vadd.f32 %v1948_v14, %v1918_v25  ;;  %v1923_v33 = vmul.f32 %v3842_v27, %v3842_v27  ;;  %v1937_v25 = vmul.f32 %v3934_v28, %v3934_v28 }
 0x244   : > { %v1938_v14 = vmul.f32 %v3929_v9, %v3929_v9 }
 0x245   : > { %v1888_v39 = vadd.f32 %v1887_v29, %v3810_v53  ;;  %v1950_v51 = vadd.f32 %v1949_v35, %v1919_v4  ;;  %v1924_v53 = vmul.f32 %v3838_v43, %v3838_v43 }
 0x247   : > { %v1889_v36 = vadd.f32 %v1888_v39, %v3828_v6  ;;  %v1951_v15 = vadd.f32 %v1950_v51, %v1920_v47  ;;  %v1925_v6 = vmul.f32 %v3856_v52, %v3856_v52  ;;  %v1940_v47 = vmul.f32 %v3942_v2, %v3942_v2 }
 0x249   : > { %v1890_v54 = vadd.f32 %v1889_v36, %v3824_v16  ;;  %v1952_v38 = vadd.f32 %v1951_v15, %v1921_v50  ;;  %v1926_v16 = vmul.f32 %v3852_v5, %v3852_v5 }
 0x24b   : > { %v1891_v42 = vadd.f32 %v1890_v54, %v3842_v27  ;;  %v1953_v12 = vadd.f32 %v1952_v38, %v1922_v37  ;;  %v1927_v27 = vmul.f32 %v3869_v26, %v3869_v26 }
 0x24d   : > { %v1892_v3 = vadd.f32 %v1891_v42, %v3838_v43  ;;  %v1954_v11 = vadd.f32 %v1953_v12, %v1923_v33  ;;  %v1928_v43 = vmul.f32 %v3864_v23, %v3864_v23 }
 0x24f   : > { %v1893_v1 = vadd.f32 %v1892_v3, %v3856_v52  ;;  %v1955_v57 = vadd.f32 %v1954_v11, %v1924_v53  ;;  %v1929_v52 = vmul.f32 %v3882_v32, %v3882_v32 }
 0x251   : > { %v1894_v7 = vadd.f32 %v1893_v1, %v3852_v5  ;;  %v1956_v55 = vadd.f32 %v1955_v57, %v1925_v6  ;;  %v1930_v5 = vmul.f32 %v3877_v24, %v3877_v24 }
 0x253   : > { %v1957_v41 = vadd.f32 %v1956_v55, %v1926_v16  ;;  %v1895_v58 = vadd.f32 %v1894_v7, %v3869_v26  ;;  %v1931_v26 = vmul.f32 %v3895_v10, %v3895_v10 }
 0x255   : > { %v1896_v20 = vadd.f32 %v1895_v58, %v3864_v23  ;;  %v1958_v56 = vadd.f32 %v1957_v41, %v1927_v27 }
 0x257   : > { %v1897_v21 = vadd.f32 %v1896_v20, %v3882_v32  ;;  %v1959_v19 = vadd.f32 %v1958_v56, %v1928_v43 }
 0x259   : > { %v1898_v44 = vadd.f32 %v1897_v21, %v3877_v24  ;;  %v1960_v49 = vadd.f32 %v1959_v19, %v1929_v52 }
 0x25b   : > { %v1899_v31 = vadd.f32 %v1898_v44, %v3895_v10  ;;  %v1961_v23 = vadd.f32 %v1960_v49, %v1930_v5 }
 0x25d   : > { %v1900_v13 = vadd.f32 %v1899_v31, %v3890_v45  ;;  %v1962_v32 = vadd.f32 %v1961_v23, %v1931_v26 }
 0x25f   : > { %v1901_v30 = vadd.f32 %v1900_v13, %v3908_v0  ;;  %v1963_v24 = vadd.f32 %v1962_v32, %v1932_v61 }
 0x261   : > { %v1902_v48 = vadd.f32 %v1901_v30, %v3903_v62  ;;  %v1964_v10 = vadd.f32 %v1963_v24, %v1933_v18 }
 0x263   : > { %v1903_v45 = vadd.f32 %v1902_v48, %v3921_v46  ;;  %v1965_v63 = vadd.f32 %v1964_v10, %v1934_v40 }
 0x265   : > { %v1904_v17 = vadd.f32 %v1903_v45, %v3916_v60  ;;  %v1966_v0 = vadd.f32 %v1965_v63, %v1935_v22  ;;  %v1939_v60 = vmul.f32 %v3947_v8, %v3947_v8 }
 0x267   : > { %v1905_v62 = vadd.f32 %v1904_v17, %v3934_v28  ;;  %v1967_v34 = vadd.f32 %v1966_v0, %v1936_v59 }
 0x269   : > { %v1906_v4 = vadd.f32 %v1905_v62, %v3929_v9  ;;  %v1968_v46 = vadd.f32 %v1967_v34, %v1937_v25 }
 0x26b   : > { %v1907_v29 = vadd.f32 %v1906_v4, %v3947_v8  ;;  %v1969_v35 = vadd.f32 %v1968_v46, %v1938_v14 }
 0x26d   : > { %v1908_v39 = vadd.f32 %v1907_v29, %v3942_v2  ;;  %v1970_v28 = vadd.f32 %v1969_v35, %v1939_v60 }
 0x26f   : > { %v1971_v51 = vadd.f32 %v1970_v28, %v1940_v47  ;;  %1974 = vst [vmem:[%s276_s8] sm:$0xff] %v1908_v39 }
 0x271   : > { %1977 = vst [vmem:[%s280_s15] sm:$0xff] %v1971_v51 }
 0x272 PF: > { %s15_s17 = sadd.s32 1, %s2719_s17   ;;  %s4049_s15 = smov %s2715_s16 }
 0x273   : > { %p12_p6 = scmp.ge.s32.totalorder %s15_s17, 4   ;;  %s4050_s16 = smov %s4052_s18 }
 0x275   :  { %14 = sbr.rel (!%p12_p6) target bundleno = 2 (0x2), region = 89 }

// kernel: basic_block_forward.5
= control target key start
LH: loop header
LB: loop body
LE: loop exit
PB: predicated region body
PF: predicated region fallthrough
CT: control target
= control target key end

     0   :  { %s1141_s15 = smov 0   ;;  %s1143_s16 = smov 0   ;;  %s1355_s0 = inlined_call_operand.vmem [shape: f32[512,4], index: 0, kind: input, shape index: {}]   ;;  %s1356_s1 = inlined_call_operand.vmem [shape: f32[4,128], index: 1, kind: input, shape index: {}]   ;;  %s1357_s2 = inlined_call_operand.vmem [shape: f32[512,128], index: 2, kind: output, shape index: {0}]   ;;  %s1358_s3 = inlined_call_operand.vmem [shape: f32[16,128], index: 3, kind: output, shape index: {1}]   ;;  %s1359_s4 = inlined_call_operand.vmem [shape: f32[16,128], index: 4, kind: output, shape index: {2}]  }
   0x1   :  { %s1145_s17 = smov 0  }
   0x2 LB: > { %s34_s18 = sadd.s32 1, %s1110_s16  ;;  %p940_p0 = scmp.ge.s32.totalorder %s1114_s17, 1  ;;  %s1114_s17 = sphi %s1145_s17, %s15_s17   ;;  %s1110_s16 = sphi %s1143_s16, %s1361_s16   ;;  %s1106_s15 = sphi %s1141_s15, %s1360_s15  }
   0x3   : > { %p36_p1 = scmp.ge.s32.totalorder %s34_s18, 2  ;;  %p204_p2 = scmp.lt.s32.totalorder %s1114_s17, 3 }
   0x5   : > { %s1363_s18 = smov (%p36_p1, %s34_s18), 0  ;;  %p205_p3 = pnand %p940_p0, %p204_p2 }
   0x6   : > { %v318_v0 = vld [vmem:[%s1356_s1] sm:$0xf] (!%p205_p3)  ;;  %vm416_vm0 = vcmask (!%p205_p3), 1043456   ;;  %s941_s21 = sshll.u32 (!%p205_p3), %s1106_s15, 5  ;;  %vm319_vm1 = vcmask (!%p205_p3), 31744   ;;  %p270_p5 = scmp.lt.s32.totalorder (!%p205_p3), %s1106_s15, 1 }
   0x7   : > { %208 = sbr.rel (%p205_p3) target bundleno = 299 (0x12b), region = 28  ;;  %1015 = vmatprep.subr.msk.mxu0 (!%p205_p3), %vm416_vm0, %v318_v0  ;;  %p249_p4 = scmp.lt.s32.totalorder (!%p205_p3), %s941_s21, 63  ;;  %1065 = vmatprep.subr.msk.mxu1 (!%p205_p3), %vm416_vm0, %v318_v0 }
   0x8   : > { %1016 = vmatpush3.msk.msra.mxu0 (!%p205_p3), %vm416_vm0, %v318_v0  ;;  %1066 = vmatpush3.msk.msra.mxu1 (!%p205_p3), %vm416_vm0, %v318_v0 }
   0xe   : > { %s1365_s21 = smov (!%p249_p4, %s941_s21), 63  ;;  %s1367_s15 = smov (!%p270_p5, %s1106_s15), 1 }
   0xf   : > { %s942_s22 = sshll.u32 %s1365_s21, 3  ;;  %s945_s29 = sshll.u32 %s1367_s15, 3 }
  0x10   : > { %s1173_s25 = scalar_lea.vmem %s1355_s0, %s942_s22  ;;  %s1244_s28 = scalar_lea.vmem %s1357_s2, %s942_s22 }
  0x11   : > { %v286_v1 = vld [vmem:[%s1173_s25] sm:$0xff]  ;;  %v287_v2 = vld [vmem:[%s1173_s25 + $0x8] sm:$0xff]  ;;  %v288_v3 = vld [vmem:[%s1173_s25 + $0x10] sm:$0xff]  ;;  %s273_s6 = scalar_lea.vmem %s1358_s3, %s945_s29  ;;  %s277_s9 = scalar_lea.vmem %s1359_s4, %s945_s29 }
  0x12   : > { %1017 = vmatprep.mubr.msk.f32.mxu0 %vm319_vm1, %v286_v1  ;;  %v289_v4 = vld [vmem:[%s1173_s25 + $0x18] sm:$0xff]  ;;  %v290_v5 = vld [vmem:[%s1173_s25 + $0x20] sm:$0xff]  ;;  %v303_v7 = vld [vmem:[%s1173_s25 + $0x88] sm:$0xff] }
  0x13   : > { %1018 = vmatmul.mubr.msk.f32.vlgmr.msra.gmra.mrb[0].mxu0 %vm319_vm1, %v287_v2  ;;  %v302_v6 = vld [vmem:[%s1173_s25 + $0x80] sm:$0xff]  ;;  %v304_v8 = vld [vmem:[%s1173_s25 + $0x90] sm:$0xff]  ;;  %v291_v9 = vld [vmem:[%s1173_s25 + $0x28] sm:$0xff] }
  0x14   : > { %1020 = vmatprep.mubr.msk.f32.mxu0 %vm319_vm1, %v288_v3  ;;  %1041 = vmatprep.mubr.msk.f32.mxu1 %vm319_vm1, %v302_v6  ;;  %v292_v10 = vld [vmem:[%s1173_s25 + $0x30] sm:$0xff]  ;;  %v305_v11 = vld [vmem:[%s1173_s25 + $0x98] sm:$0xff]  ;;  %v306_v12 = vld [vmem:[%s1173_s25 + $0xa0] sm:$0xff] }
  0x15   : > { %1042 = vmatmul.mubr.msk.f32.vlgmr.msra.gmra.mrb[0].mxu1 %vm319_vm1, %v303_v7  ;;  %v293_v13 = vld [vmem:[%s1173_s25 + $0x38] sm:$0xff]  ;;  %v294_v14 = vld [vmem:[%s1173_s25 + $0x40] sm:$0xff]  ;;  %v307_v15 = vld [vmem:[%s1173_s25 + $0xa8] sm:$0xff] }
  0x16   : > { %1044 = vmatprep.mubr.msk.f32.mxu1 %vm319_vm1, %v304_v8  ;;  %v308_v16 = vld [vmem:[%s1173_s25 + $0xb0] sm:$0xff]  ;;  %v295_v17 = vld [vmem:[%s1173_s25 + $0x48] sm:$0xff]  ;;  %v309_v19 = vld [vmem:[%s1173_s25 + $0xb8] sm:$0xff] }
  0x17   : > { %1021 = vmatmul.mubr.msk.f32.gmra.mrb[2].mxu0 %vm319_vm1, %v289_v4  ;;  %v296_v18 = vld [vmem:[%s1173_s25 + $0x50] sm:$0xff]  ;;  %v310_v20 = vld [vmem:[%s1173_s25 + $0xc0] sm:$0xff]  ;;  %v297_v21 = vld [vmem:[%s1173_s25 + $0x58] sm:$0xff] }
  0x18   : > { %1023 = vmatprep.mubr.msk.f32.mxu0 %vm319_vm1, %v290_v5  ;;  %v298_v22 = vld [vmem:[%s1173_s25 + $0x60] sm:$0xff]  ;;  %v311_v23 = vld [vmem:[%s1173_s25 + $0xc8] sm:$0xff]  ;;  %v312_v24 = vld [vmem:[%s1173_s25 + $0xd0] sm:$0xff] }
  0x19   : > { %1045 = vmatmul.mubr.msk.f32.gmra.mrb[2].mxu1 %vm319_vm1, %v305_v11  ;;  %v299_v25 = vld [vmem:[%s1173_s25 + $0x68] sm:$0xff]  ;;  %v300_v26 = vld [vmem:[%s1173_s25 + $0x70] sm:$0xff]  ;;  %v313_v27 = vld [vmem:[%s1173_s25 + $0xd8] sm:$0xff] }
  0x1a   : > { %1047 = vmatprep.mubr.msk.f32.mxu1 %vm319_vm1, %v306_v12  ;;  %v314_v28 = vld [vmem:[%s1173_s25 + $0xe0] sm:$0xff]  ;;  %v301_v29 = vld [vmem:[%s1173_s25 + $0x78] sm:$0xff]  ;;  %v315_v30 = vld [vmem:[%s1173_s25 + $0xe8] sm:$0xff] }
  0x1b   : > { %1024 = vmatmul.mubr.msk.f32.gmra.mrb[4].mxu0 %vm319_vm1, %v291_v9  ;;  %v316_v31 = vld [vmem:[%s1173_s25 + $0xf0] sm:$0xff]  ;;  %v317_v32 = vld [vmem:[%s1173_s25 + $0xf8] sm:$0xff] }
  0x1c   : > { %1026 = vmatprep.mubr.msk.f32.mxu0 %vm319_vm1, %v292_v10 }
  0x1d   : > { %1048 = vmatmul.mubr.msk.f32.gmra.mrb[4].mxu1 %vm319_vm1, %v307_v15 }
  0x1e   : > { %1050 = vmatprep.mubr.msk.f32.mxu1 %vm319_vm1, %v308_v16 }
  0x1f   : > { %1027 = vmatmul.mubr.msk.f32.gmra.mrb[6].mxu0 %vm319_vm1, %v293_v13 }
  0x20   : > { %1029 = vmatprep.mubr.msk.f32.mxu0 %vm319_vm1, %v294_v14 }
  0x21   : > { %1051 = vmatmul.mubr.msk.f32.gmra.mrb[6].mxu1 %vm319_vm1, %v309_v19 }
  0x22   : > { %1053 = vmatprep.mubr.msk.f32.mxu1 %vm319_vm1, %v310_v20 }
  0x23   : > { %1030 = vmatmul.mubr.msk.f32.gmra.mrb[8].mxu0 %vm319_vm1, %v295_v17 }
  0x24   : > { %1032 = vmatprep.mubr.msk.f32.mxu0 %vm319_vm1, %v296_v18 }
  0x25   : > { %1054 = vmatmul.mubr.msk.f32.gmra.mrb[8].mxu1 %vm319_vm1, %v311_v23 }
  0x26   : > { %1056 = vmatprep.mubr.msk.f32.mxu1 %vm319_vm1, %v312_v24 }
  0x27   : > { %1033 = vmatmul.mubr.msk.f32.gmra.mrb[10].mxu0 %vm319_vm1, %v297_v21 }
  0x28   : > { %1035 = vmatprep.mubr.msk.f32.mxu0 %vm319_vm1, %v298_v22 }
  0x29   : > { %1057 = vmatmul.mubr.msk.f32.gmra.mrb[10].mxu1 %vm319_vm1, %v313_v27 }
  0x2a   : > { %1059 = vmatprep.mubr.msk.f32.mxu1 %vm319_vm1, %v314_v28 }
  0x2b   : > { %1036 = vmatmul.mubr.msk.f32.gmra.mrb[12].mxu0 %vm319_vm1, %v299_v25 }
  0x2c   : > { %1038 = vmatprep.mubr.msk.f32.mxu0 %vm319_vm1, %v300_v26 }
  0x2d   : > { %1060 = vmatmul.mubr.msk.f32.gmra.mrb[12].mxu1 %vm319_vm1, %v315_v30 }
  0x2e   : > { %1062 = vmatprep.mubr.msk.f32.mxu1 %vm319_vm1, %v316_v31 }
  0x2f   : > { %1039 = vmatmul.mubr.msk.f32.gmra.mrb[14].mxu0 %vm319_vm1, %v301_v29 }
  0x31   : > { %1063 = vmatmul.mubr.msk.f32.gmra.mrb[14].mxu1 %vm319_vm1, %v317_v32 }
  0xe6   : > { %v1019_v33 = vpop.f32.mrb[0].mxu0 }
  0xe7   : > { %646 = vst [vmem:[%s1244_s28 + $0x8] sm:$0xff] %v1019_v33  ;;  %v709_v34 = vmul.f32 %v1019_v33, %v1019_v33  ;;  %v486_v35 = vpop.f32.mrb[1].mxu0 }
  0xe8   : > { %645 = vst [vmem:[%s1244_s28] sm:$0xff] %v486_v35  ;;  %v677_v36 = vadd.f32 %v1019_v33, %v486_v35  ;;  %v708_v37 = vmul.f32 %v486_v35, %v486_v35  ;;  %v1249_v41 = vpop.f32.mrb[0].mxu1 }
  0xe9   : > { %662 = vst [vmem:[%s1244_s28 + $0x88] sm:$0xff] %v1249_v41  ;;  %v1254_v44 = vpop.f32.mrb[1].mxu1 }
  0xea   : > { %v740_v38 = vadd.f32 %v709_v34, %v708_v37  ;;  %v1022_v39 = vpop.f32.mrb[2].mxu0  ;;  %661 = vst [vmem:[%s1244_s28 + $0x80] sm:$0xff] %v1254_v44 }
  0xeb   : > { %648 = vst [vmem:[%s1244_s28 + $0x18] sm:$0xff] %v1022_v39  ;;  %v496_v40 = vpop.f32.mrb[3].mxu0  ;;  %v711_v45 = vmul.f32 %v1022_v39, %v1022_v39 }
  0xec   : > { %647 = vst [vmem:[%s1244_s28 + $0x10] sm:$0xff] %v496_v40  ;;  %v678_v42 = vadd.f32 %v677_v36, %v496_v40  ;;  %v710_v43 = vmul.f32 %v496_v40, %v496_v40  ;;  %v1259_v50 = vpop.f32.mrb[2].mxu1 }
  0xed   : > { %664 = vst [vmem:[%s1244_s28 + $0x98] sm:$0xff] %v1259_v50  ;;  %v1264_v54 = vpop.f32.mrb[3].mxu1 }
  0xee   : > { %v741_v46 = vadd.f32 %v740_v38, %v710_v43  ;;  %v1025_v47 = vpop.f32.mrb[4].mxu0  ;;  %v679_v48 = vadd.f32 %v1022_v39, %v678_v42  ;;  %663 = vst [vmem:[%s1244_s28 + $0x90] sm:$0xff] %v1264_v54 }
  0xef   : > { %650 = vst [vmem:[%s1244_s28 + $0x28] sm:$0xff] %v1025_v47  ;;  %v506_v49 = vpop.f32.mrb[5].mxu0  ;;  %v713_v55 = vmul.f32 %v1025_v47, %v1025_v47 }
  0xf0   : > { %649 = vst [vmem:[%s1244_s28 + $0x20] sm:$0xff] %v506_v49  ;;  %v680_v51 = vadd.f32 %v679_v48, %v506_v49  ;;  %v712_v52 = vmul.f32 %v506_v49, %v506_v49  ;;  %v742_v53 = vadd.f32 %v741_v46, %v711_v45  ;;  %v1269_v60 = vpop.f32.mrb[4].mxu1  ;;  %v724_v46 = vmul.f32 %v1254_v44, %v1254_v44 }
  0xf1   : > { %666 = vst [vmem:[%s1244_s28 + $0xa8] sm:$0xff] %v1269_v60  ;;  %v1274_v0 = vpop.f32.mrb[5].mxu1 }
  0xf2   : > { %v743_v56 = vadd.f32 %v742_v53, %v712_v52  ;;  %v1028_v57 = vpop.f32.mrb[6].mxu0  ;;  %v681_v58 = vadd.f32 %v1025_v47, %v680_v51  ;;  %665 = vst [vmem:[%s1244_s28 + $0xa0] sm:$0xff] %v1274_v0  ;;  %v725_v52 = vmul.f32 %v1249_v41, %v1249_v41 }
  0xf3   : > { %652 = vst [vmem:[%s1244_s28 + $0x38] sm:$0xff] %v1028_v57  ;;  %v516_v59 = vpop.f32.mrb[7].mxu0  ;;  %v715_v1 = vmul.f32 %v1028_v57, %v1028_v57 }
  0xf4   : > { %651 = vst [vmem:[%s1244_s28 + $0x30] sm:$0xff] %v516_v59  ;;  %v682_v61 = vadd.f32 %v681_v58, %v516_v59  ;;  %v714_v62 = vmul.f32 %v516_v59, %v516_v59  ;;  %v744_v63 = vadd.f32 %v743_v56, %v713_v55  ;;  %v1279_v6 = vpop.f32.mrb[6].mxu1  ;;  %v726_v56 = vmul.f32 %v1264_v54, %v1264_v54 }
  0xf5   : > { %668 = vst [vmem:[%s1244_s28 + $0xb8] sm:$0xff] %v1279_v6  ;;  %v1284_v10 = vpop.f32.mrb[7].mxu1  ;;  %v727_v59 = vmul.f32 %v1259_v50, %v1259_v50 }
  0xf6   : > { %v745_v2 = vadd.f32 %v744_v63, %v714_v62  ;;  %v1031_v3 = vpop.f32.mrb[8].mxu0  ;;  %v683_v4 = vadd.f32 %v1028_v57, %v682_v61  ;;  %667 = vst [vmem:[%s1244_s28 + $0xb0] sm:$0xff] %v1284_v10  ;;  %v728_v62 = vmul.f32 %v1274_v0, %v1274_v0 }
  0xf7   : > { %654 = vst [vmem:[%s1244_s28 + $0x48] sm:$0xff] %v1031_v3  ;;  %v526_v5 = vpop.f32.mrb[9].mxu0  ;;  %v717_v11 = vmul.f32 %v1031_v3, %v1031_v3 }
  0xf8   : > { %653 = vst [vmem:[%s1244_s28 + $0x40] sm:$0xff] %v526_v5  ;;  %v684_v7 = vadd.f32 %v683_v4, %v526_v5  ;;  %v716_v8 = vmul.f32 %v526_v5, %v526_v5  ;;  %v746_v9 = vadd.f32 %v745_v2, %v715_v1  ;;  %v1289_v16 = vpop.f32.mrb[8].mxu1 }
  0xf9   : > { %670 = vst [vmem:[%s1244_s28 + $0xc8] sm:$0xff] %v1289_v16  ;;  %v606_v20 = vpop.f32.mrb[9].mxu1 }
  0xfa   : > { %v747_v12 = vadd.f32 %v746_v9, %v716_v8  ;;  %v1034_v13 = vpop.f32.mrb[10].mxu0  ;;  %v685_v14 = vadd.f32 %v1031_v3, %v684_v7  ;;  %669 = vst [vmem:[%s1244_s28 + $0xc0] sm:$0xff] %v606_v20  ;;  %v732_v8 = vmul.f32 %v606_v20, %v606_v20 }
  0xfb   : > { %656 = vst [vmem:[%s1244_s28 + $0x58] sm:$0xff] %v1034_v13  ;;  %v536_v15 = vpop.f32.mrb[11].mxu0  ;;  %v719_v21 = vmul.f32 %v1034_v13, %v1034_v13 }
  0xfc   : > { %655 = vst [vmem:[%s1244_s28 + $0x50] sm:$0xff] %v536_v15  ;;  %v686_v17 = vadd.f32 %v685_v14, %v536_v15  ;;  %v718_v18 = vmul.f32 %v536_v15, %v536_v15  ;;  %v748_v19 = vadd.f32 %v747_v12, %v717_v11  ;;  %v1296_v26 = vpop.f32.mrb[10].mxu1 }
  0xfd   : > { %672 = vst [vmem:[%s1244_s28 + $0xd8] sm:$0xff] %v1296_v26  ;;  %v616_v30 = vpop.f32.mrb[11].mxu1 }
  0xfe   : > { %v749_v22 = vadd.f32 %v748_v19, %v718_v18  ;;  %v1037_v23 = vpop.f32.mrb[12].mxu0  ;;  %v687_v24 = vadd.f32 %v1034_v13, %v686_v17  ;;  %671 = vst [vmem:[%s1244_s28 + $0xd0] sm:$0xff] %v616_v30  ;;  %v734_v14 = vmul.f32 %v616_v30, %v616_v30  ;;  %v735_v17 = vmul.f32 %v1296_v26, %v1296_v26 }
  0xff   : > { %658 = vst [vmem:[%s1244_s28 + $0x68] sm:$0xff] %v1037_v23  ;;  %v546_v25 = vpop.f32.mrb[13].mxu0  ;;  %v721_v31 = vmul.f32 %v1037_v23, %v1037_v23 }
 0x100   : > { %657 = vst [vmem:[%s1244_s28 + $0x60] sm:$0xff] %v546_v25  ;;  %v688_v27 = vadd.f32 %v687_v24, %v546_v25  ;;  %v720_v28 = vmul.f32 %v546_v25, %v546_v25  ;;  %v750_v29 = vadd.f32 %v749_v22, %v719_v21  ;;  %v1061_v36 = vpop.f32.mrb[12].mxu1 }
 0x101   : > { %674 = vst [vmem:[%s1244_s28 + $0xe8] sm:$0xff] %v1061_v36  ;;  %v626_v40 = vpop.f32.mrb[13].mxu1  ;;  %v737_v22 = vmul.f32 %v1061_v36, %v1061_v36 }
 0x102   : > { %v751_v32 = vadd.f32 %v750_v29, %v720_v28  ;;  %v1040_v33 = vpop.f32.mrb[14].mxu0  ;;  %v689_v34 = vadd.f32 %v1037_v23, %v688_v27  ;;  %673 = vst [vmem:[%s1244_s28 + $0xe0] sm:$0xff] %v626_v40  ;;  %v736_v19 = vmul.f32 %v626_v40, %v626_v40 }
 0x103   : > { %660 = vst [vmem:[%s1244_s28 + $0x78] sm:$0xff] %v1040_v33  ;;  %v556_v35 = vpop.f32.mrb[15].mxu0  ;;  %v723_v42 = vmul.f32 %v1040_v33, %v1040_v33 }
 0x104   : > { %659 = vst [vmem:[%s1244_s28 + $0x70] sm:$0xff] %v556_v35  ;;  %v690_v37 = vadd.f32 %v689_v34, %v556_v35  ;;  %v722_v38 = vmul.f32 %v556_v35, %v556_v35  ;;  %v752_v39 = vadd.f32 %v751_v32, %v721_v31  ;;  %v1064_v47 = vpop.f32.mrb[14].mxu1 }
 0x105   : > { %676 = vst [vmem:[%s1244_s28 + $0xf8] sm:$0xff] %v1064_v47  ;;  %v636_v51 = vpop.f32.mrb[15].mxu1  ;;  %v739_v28 = vmul.f32 %v1064_v47, %v1064_v47 }
 0x106   : > { %v691_v43 = vadd.f32 %v1040_v33, %v690_v37  ;;  %v753_v45 = vadd.f32 %v752_v39, %v722_v38  ;;  %675 = vst [vmem:[%s1244_s28 + $0xf0] sm:$0xff] %v636_v51  ;;  %v738_v25 = vmul.f32 %v636_v51, %v636_v51 }
 0x108   : > { %v754_v48 = vadd.f32 %v753_v45, %v723_v42  ;;  %v692_v49 = vadd.f32 %v691_v43, %v1254_v44 }
 0x10a   : > { %v755_v53 = vadd.f32 %v754_v48, %v724_v46  ;;  %v693_v55 = vadd.f32 %v1249_v41, %v692_v49  ;;  %v729_v41 = vmul.f32 %v1269_v60, %v1269_v60 }
 0x10c   : > { %v694_v57 = vadd.f32 %v693_v55, %v1264_v54  ;;  %v756_v58 = vadd.f32 %v755_v53, %v725_v52  ;;  %v730_v54 = vmul.f32 %v1284_v10, %v1284_v10 }
 0x10e   : > { %v757_v61 = vadd.f32 %v756_v58, %v726_v56  ;;  %v695_v44 = vadd.f32 %v1259_v50, %v694_v57  ;;  %v731_v50 = vmul.f32 %v1279_v6, %v1279_v6 }
 0x110   : > { %v696_v63 = vadd.f32 %v695_v44, %v1274_v0  ;;  %v758_v1 = vadd.f32 %v757_v61, %v727_v59 }
 0x112   : > { %v759_v2 = vadd.f32 %v758_v1, %v728_v62  ;;  %v697_v3 = vadd.f32 %v1269_v60, %v696_v63  ;;  %v733_v60 = vmul.f32 %v1289_v16, %v1289_v16 }
 0x114   : > { %v698_v4 = vadd.f32 %v697_v3, %v1284_v10  ;;  %v760_v5 = vadd.f32 %v759_v2, %v729_v41 }
 0x116   : > { %v761_v7 = vadd.f32 %v760_v5, %v730_v54  ;;  %v699_v0 = vadd.f32 %v1279_v6, %v698_v4 }
 0x118   : > { %v700_v9 = vadd.f32 %v699_v0, %v606_v20  ;;  %v762_v11 = vadd.f32 %v761_v7, %v731_v50 }
 0x11a   : > { %v763_v12 = vadd.f32 %v762_v11, %v732_v8  ;;  %v701_v13 = vadd.f32 %v1289_v16, %v700_v9 }
 0x11c   : > { %v702_v15 = vadd.f32 %v701_v13, %v616_v30  ;;  %v764_v10 = vadd.f32 %v763_v12, %v733_v60 }
 0x11e   : > { %v765_v18 = vadd.f32 %v764_v10, %v734_v14  ;;  %v703_v6 = vadd.f32 %v1296_v26, %v702_v15 }
 0x120   : > { %v704_v21 = vadd.f32 %v703_v6, %v626_v40  ;;  %v766_v20 = vadd.f32 %v765_v18, %v735_v17 }
 0x122   : > { %v767_v23 = vadd.f32 %v766_v20, %v736_v19  ;;  %v705_v24 = vadd.f32 %v1061_v36, %v704_v21 }
 0x124   : > { %v706_v16 = vadd.f32 %v705_v24, %v636_v51  ;;  %v768_v27 = vadd.f32 %v767_v23, %v737_v22 }
 0x126   : > { %v707_v29 = vadd.f32 %v1064_v47, %v706_v16  ;;  %v769_v30 = vadd.f32 %v768_v27, %v738_v25 }
 0x128   : > { %v770_v31 = vadd.f32 %v769_v30, %v739_v28  ;;  %773 = vst [vmem:[%s273_s6] sm:$0xff] %v707_v29 }
 0x12a   : > { %776 = vst [vmem:[%s277_s9] sm:$0xff] %v770_v31 }
 0x12b PF: > { %s15_s17 = sadd.s32 1, %s1114_s17   ;;  %s1360_s15 = smov %s1110_s16 }
 0x12c   : > { %p12_p6 = scmp.ge.s32.totalorder %s15_s17, 4   ;;  %s1361_s16 = smov %s1363_s18 }
 0x12e   :  { %14 = sbr.rel (!%p12_p6) target bundleno = 2 (0x2), region = 89 }

// kernel: basic_block_forward.7
= control target key start
LH: loop header
LB: loop body
LE: loop exit
PB: predicated region body
PF: predicated region fallthrough
CT: control target
= control target key end

     0   :  { %s1511_s0 = inlined_call_operand.vmem [shape: f32[512,128], index: 0, kind: input, shape index: {}]   ;;  %s1512_s1 = inlined_call_operand.vmem [shape: f32[1,128], index: 1, kind: input, shape index: {}]   ;;  %s1513_s2 = inlined_call_operand.vmem [shape: f32[1,128], index: 2, kind: input, shape index: {}]   ;;  %s1514_s3 = inlined_call_operand.vmem [shape: f32[512,128], index: 3, kind: input, shape index: {}]   ;;  %s1515_s4 = inlined_call_operand.vmem [shape: f32[1,128], index: 4, kind: input, shape index: {}]   ;;  %s1516_s5 = inlined_call_operand.vmem [shape: f32[1,128], index: 5, kind: input, shape index: {}]   ;;  %s1517_s6 = inlined_call_operand.vmem [shape: f32[512,128], index: 6, kind: output, shape index: {}]  }
   0x1   :  { %v23_v0 = vld [vmem:[%s1511_s0] sm:$0xff]  ;;  %v24_v8 = vld [vmem:[%s1511_s0 + $0x8] sm:$0xff]  ;;  %v25_v10 = vld [vmem:[%s1511_s0 + $0x10] sm:$0xff] }
   0x2   :  { %v680_v1 = vld [vmem:[%s1512_s1] ss:$0 sm:$0xff]  ;;  %v230_v9 = vld [vmem:[%s1514_s3 + $0x8] sm:$0xff]  ;;  %v231_v15 = vld [vmem:[%s1514_s3 + $0x10] sm:$0xff] }
   0x3   :  { %v685_v2 = vld [vmem:[%s1513_s2] ss:$0 sm:$0xff]  ;;  %v94_v3 = vmul.f32 %v680_v1, %v23_v0  ;;  %v95_v12 = vmul.f32 %v680_v1, %v24_v8  ;;  %v96_v14 = vmul.f32 %v680_v1, %v25_v10  ;;  %v26_v16 = vld [vmem:[%s1511_s0 + $0x18] sm:$0xff]  ;;  %v28_v24 = vld [vmem:[%s1511_s0 + $0x28] sm:$0xff] }
   0x4   :  { %v229_v4 = vld [vmem:[%s1514_s3] sm:$0xff]  ;;  %v232_v17 = vld [vmem:[%s1514_s3 + $0x18] sm:$0xff]  ;;  %v97_v20 = vmul.f32 %v680_v1, %v26_v16  ;;  %v234_v29 = vld [vmem:[%s1514_s3 + $0x28] sm:$0xff]  ;;  %v99_v38 = vmul.f32 %v680_v1, %v28_v24 }
   0x5   :  { %v694_v5 = vld [vmem:[%s1515_s4] ss:$0 sm:$0xff]  ;;  %v165_v11 = vadd.f32 %v685_v2, %v94_v3  ;;  %v166_v25 = vadd.f32 %v685_v2, %v95_v12  ;;  %v167_v27 = vadd.f32 %v685_v2, %v96_v14  ;;  %v29_v34 = vld [vmem:[%s1511_s0 + $0x30] sm:$0xff]  ;;  %v30_v44 = vld [vmem:[%s1511_s0 + $0x38] sm:$0xff] }
   0x6   :  { %v699_v6 = vld [vmem:[%s1516_s5] ss:$0 sm:$0xff]  ;;  %v300_v7 = vmul.f32 %v694_v5, %v229_v4  ;;  %v301_v13 = vmul.f32 %v694_v5, %v230_v9  ;;  %v302_v19 = vmul.f32 %v694_v5, %v231_v15  ;;  %v303_v21 = vmul.f32 %v694_v5, %v232_v17  ;;  %v235_v39 = vld [vmem:[%s1514_s3 + $0x30] sm:$0xff]  ;;  %v236_v45 = vld [vmem:[%s1514_s3 + $0x38] sm:$0xff] }
   0x7   :  { %v27_v22 = vld [vmem:[%s1511_s0 + $0x20] sm:$0xff]  ;;  %v168_v32 = vadd.f32 %v685_v2, %v97_v20  ;;  %v305_v43 = vmul.f32 %v694_v5, %v234_v29  ;;  %v170_v48 = vadd.f32 %v685_v2, %v99_v38  ;;  %v100_v49 = vmul.f32 %v680_v1, %v29_v34  ;;  %v32_v56 = vld [vmem:[%s1511_s0 + $0x48] sm:$0xff]  ;;  %v33_v4 = vld [vmem:[%s1511_s0 + $0x50] sm:$0xff] }
   0x8   :  { %v371_v18 = vadd.f32 %v699_v6, %v300_v7  ;;  %v233_v23 = vld [vmem:[%s1514_s3 + $0x20] sm:$0xff]  ;;  %v372_v26 = vadd.f32 %v699_v6, %v301_v13  ;;  %v98_v28 = vmul.f32 %v680_v1, %v27_v22  ;;  %v373_v31 = vadd.f32 %v699_v6, %v302_v19  ;;  %v238_v3 = vld [vmem:[%s1514_s3 + $0x48] sm:$0xff]  ;;  %v34_v12 = vld [vmem:[%s1511_s0 + $0x58] sm:$0xff] }
   0x9   :  { %v374_v33 = vadd.f32 %v699_v6, %v303_v21  ;;  %v304_v37 = vmul.f32 %v694_v5, %v233_v23  ;;  %v31_v50 = vld [vmem:[%s1511_s0 + $0x40] sm:$0xff]  ;;  %v376_v54 = vadd.f32 %v699_v6, %v305_v43  ;;  %v306_v55 = vmul.f32 %v694_v5, %v235_v39  ;;  %v240_v17 = vld [vmem:[%s1514_s3 + $0x58] sm:$0xff]  ;;  %v37_v34 = vld [vmem:[%s1511_s0 + $0x70] sm:$0xff] }
   0xa   :  { %v435_v30 = vadd.f32 %v371_v18, %v165_v11  ;;  %v436_v35 = vadd.f32 %v372_v26, %v166_v25  ;;  %v169_v36 = vadd.f32 %v685_v2, %v98_v28  ;;  %v437_v41 = vadd.f32 %v373_v31, %v167_v27  ;;  %v237_v51 = vld [vmem:[%s1514_s3 + $0x40] sm:$0xff]  ;;  %v239_v11 = vld [vmem:[%s1514_s3 + $0x50] sm:$0xff]  ;;  %v36_v28 = vld [vmem:[%s1511_s0 + $0x68] sm:$0xff] }
   0xb   :  { %v438_v42 = vadd.f32 %v374_v33, %v168_v32  ;;  %v375_v47 = vadd.f32 %v699_v6, %v304_v37  ;;  %v171_v58 = vadd.f32 %v685_v2, %v100_v49  ;;  %v101_v59 = vmul.f32 %v680_v1, %v30_v44  ;;  %v35_v22 = vld [vmem:[%s1511_s0 + $0x60] sm:$0xff]  ;;  %v242_v33 = vld [vmem:[%s1514_s3 + $0x68] sm:$0xff]  ;;  %v243_v43 = vld [vmem:[%s1514_s3 + $0x70] sm:$0xff] }
   0xc   :  { %v499_v40 = vmax.f32 %v435_v30, 0.0  ;;  %v500_v46 = vmax.f32 %v436_v35, 0.0  ;;  %v501_v52 = vmax.f32 %v437_v41, 0.0  ;;  %v307_v60 = vmul.f32 %v694_v5, %v236_v45  ;;  %v241_v27 = vld [vmem:[%s1514_s3 + $0x60] sm:$0xff]  ;;  %v244_v49 = vld [vmem:[%s1514_s3 + $0x78] sm:$0xff] }
   0xd   :  { %v502_v53 = vmax.f32 %v438_v42, 0.0  ;;  %v439_v57 = vadd.f32 %v375_v47, %v169_v36  ;;  %v440_v61 = vadd.f32 %v376_v54, %v170_v48  ;;  %v377_v62 = vadd.f32 %v699_v6, %v306_v55  ;;  %v38_v48 = vld [vmem:[%s1511_s0 + $0x78] sm:$0xff]  ;;  %v39_v54 = vld [vmem:[%s1511_s0 + $0x80] sm:$0xff] }
   0xe   :  { %563 = vst [vmem:[%s1517_s6] sm:$0xff] %v499_v40  ;;  %564 = vst [vmem:[%s1517_s6 + $0x8] sm:$0xff] %v500_v46  ;;  %v102_v63 = vmul.f32 %v680_v1, %v31_v50  ;;  %v308_v0 = vmul.f32 %v694_v5, %v237_v51  ;;  %v172_v8 = vadd.f32 %v685_v2, %v101_v59  ;;  %v245_v55 = vld [vmem:[%s1514_s3 + $0x80] sm:$0xff] }
   0xf   :  { %565 = vst [vmem:[%s1517_s6 + $0x10] sm:$0xff] %v501_v52  ;;  %566 = vst [vmem:[%s1517_s6 + $0x18] sm:$0xff] %v502_v53  ;;  %v503_v7 = vmax.f32 %v439_v57, 0.0  ;;  %v378_v9 = vadd.f32 %v699_v6, %v307_v60  ;;  %v103_v10 = vmul.f32 %v680_v1, %v32_v56  ;;  %v504_v13 = vmax.f32 %v440_v61, 0.0  ;;  %v40_v60 = vld [vmem:[%s1511_s0 + $0x88] sm:$0xff] }
  0x10   :  { %v441_v14 = vadd.f32 %v377_v62, %v171_v58  ;;  %v173_v15 = vadd.f32 %v685_v2, %v102_v63  ;;  %v379_v16 = vadd.f32 %v699_v6, %v308_v0  ;;  %v309_v20 = vmul.f32 %v694_v5, %v238_v3 }
  0x11   :  { %567 = vst [vmem:[%s1517_s6 + $0x20] sm:$0xff] %v503_v7  ;;  %v442_v18 = vadd.f32 %v378_v9, %v172_v8  ;;  %v174_v19 = vadd.f32 %v685_v2, %v103_v10  ;;  %v104_v21 = vmul.f32 %v680_v1, %v33_v4  ;;  %568 = vst [vmem:[%s1517_s6 + $0x28] sm:$0xff] %v504_v13  ;;  %v246_v9 = vld [vmem:[%s1514_s3 + $0x88] sm:$0xff]  ;;  %v41_v10 = vld [vmem:[%s1511_s0 + $0x90] sm:$0xff] }
  0x12   :  { %v505_v23 = vmax.f32 %v441_v14, 0.0  ;;  %v443_v24 = vadd.f32 %v379_v16, %v173_v15  ;;  %v310_v25 = vmul.f32 %v694_v5, %v239_v11  ;;  %v105_v26 = vmul.f32 %v680_v1, %v34_v12  ;;  %v247_v15 = vld [vmem:[%s1514_s3 + $0x90] sm:$0xff]  ;;  %v42_v16 = vld [vmem:[%s1511_s0 + $0x98] sm:$0xff] }
  0x13   :  { %v506_v29 = vmax.f32 %v442_v18, 0.0  ;;  %v380_v30 = vadd.f32 %v699_v6, %v309_v20  ;;  %v175_v31 = vadd.f32 %v685_v2, %v104_v21  ;;  %v311_v32 = vmul.f32 %v694_v5, %v240_v17  ;;  %v248_v21 = vld [vmem:[%s1514_s3 + $0x98] sm:$0xff] }
  0x14   :  { %569 = vst [vmem:[%s1517_s6 + $0x30] sm:$0xff] %v505_v23  ;;  %v507_v35 = vmax.f32 %v443_v24, 0.0  ;;  %v381_v36 = vadd.f32 %v699_v6, %v310_v25  ;;  %v176_v37 = vadd.f32 %v685_v2, %v105_v26  ;;  %v106_v38 = vmul.f32 %v680_v1, %v35_v22  ;;  %v43_v26 = vld [vmem:[%s1511_s0 + $0xa0] sm:$0xff] }
  0x15   :  { %570 = vst [vmem:[%s1517_s6 + $0x38] sm:$0xff] %v506_v29  ;;  %v444_v39 = vadd.f32 %v380_v30, %v174_v19  ;;  %v382_v40 = vadd.f32 %v699_v6, %v311_v32  ;;  %v312_v41 = vmul.f32 %v694_v5, %v241_v27  ;;  %v107_v42 = vmul.f32 %v680_v1, %v36_v28  ;;  %v44_v32 = vld [vmem:[%s1511_s0 + $0xa8] sm:$0xff] }
  0x16   :  { %571 = vst [vmem:[%s1517_s6 + $0x40] sm:$0xff] %v507_v35  ;;  %v445_v44 = vadd.f32 %v381_v36, %v175_v31  ;;  %v177_v45 = vadd.f32 %v685_v2, %v106_v38  ;;  %v313_v46 = vmul.f32 %v694_v5, %v242_v33  ;;  %v108_v47 = vmul.f32 %v680_v1, %v37_v34  ;;  %v249_v31 = vld [vmem:[%s1514_s3 + $0xa0] sm:$0xff]  ;;  %v45_v38 = vld [vmem:[%s1511_s0 + $0xb0] sm:$0xff] }
  0x17   :  { %v508_v50 = vmax.f32 %v444_v39, 0.0  ;;  %v446_v51 = vadd.f32 %v382_v40, %v176_v37  ;;  %v383_v52 = vadd.f32 %v699_v6, %v312_v41  ;;  %v178_v53 = vadd.f32 %v685_v2, %v107_v42  ;;  %v250_v37 = vld [vmem:[%s1514_s3 + $0xa8] sm:$0xff] }
  0x18   :  { %v509_v56 = vmax.f32 %v445_v44, 0.0  ;;  %v384_v57 = vadd.f32 %v699_v6, %v313_v46  ;;  %v179_v58 = vadd.f32 %v685_v2, %v108_v47  ;;  %v314_v59 = vmul.f32 %v694_v5, %v243_v43  ;;  %v251_v47 = vld [vmem:[%s1514_s3 + $0xb0] sm:$0xff] }
  0x19   :  { %572 = vst [vmem:[%s1517_s6 + $0x48] sm:$0xff] %v508_v50  ;;  %v510_v61 = vmax.f32 %v446_v51, 0.0  ;;  %v447_v62 = vadd.f32 %v383_v52, %v177_v45  ;;  %v109_v63 = vmul.f32 %v680_v1, %v38_v48  ;;  %v315_v0 = vmul.f32 %v694_v5, %v244_v49  ;;  %v46_v52 = vld [vmem:[%s1511_s0 + $0xb8] sm:$0xff] }
  0x1a   :  { %573 = vst [vmem:[%s1517_s6 + $0x50] sm:$0xff] %v509_v56  ;;  %v448_v3 = vadd.f32 %v384_v57, %v178_v53  ;;  %v385_v4 = vadd.f32 %v699_v6, %v314_v59  ;;  %v110_v7 = vmul.f32 %v680_v1, %v39_v54  ;;  %v316_v8 = vmul.f32 %v694_v5, %v245_v55  ;;  %v252_v53 = vld [vmem:[%s1514_s3 + $0xb8] sm:$0xff]  ;;  %v253_v59 = vld [vmem:[%s1514_s3 + $0xc0] sm:$0xff] }
  0x1b   :  { %574 = vst [vmem:[%s1517_s6 + $0x58] sm:$0xff] %v510_v61  ;;  %v511_v11 = vmax.f32 %v447_v62, 0.0  ;;  %v180_v12 = vadd.f32 %v685_v2, %v109_v63  ;;  %v386_v13 = vadd.f32 %v699_v6, %v315_v0  ;;  %v111_v14 = vmul.f32 %v680_v1, %v40_v60  ;;  %v48_v0 = vld [vmem:[%s1511_s0 + $0xc8] sm:$0xff] }
  0x1c   :  { %v512_v17 = vmax.f32 %v448_v3, 0.0  ;;  %v449_v18 = vadd.f32 %v385_v4, %v179_v58  ;;  %v181_v19 = vadd.f32 %v685_v2, %v110_v7  ;;  %v387_v20 = vadd.f32 %v699_v6, %v316_v8  ;;  %v47_v58 = vld [vmem:[%s1511_s0 + $0xc0] sm:$0xff] }
  0x1d   :  { %575 = vst [vmem:[%s1517_s6 + $0x60] sm:$0xff] %v511_v11  ;;  %v450_v22 = vadd.f32 %v386_v13, %v180_v12  ;;  %v182_v23 = vadd.f32 %v685_v2, %v111_v14  ;;  %v317_v24 = vmul.f32 %v694_v5, %v246_v9  ;;  %v112_v25 = vmul.f32 %v680_v1, %v41_v10  ;;  %v254_v13 = vld [vmem:[%s1514_s3 + $0xc8] sm:$0xff]  ;;  %v49_v14 = vld [vmem:[%s1511_s0 + $0xd0] sm:$0xff] }
  0x1e   :  { %576 = vst [vmem:[%s1517_s6 + $0x68] sm:$0xff] %v512_v17  ;;  %v513_v27 = vmax.f32 %v449_v18, 0.0  ;;  %v451_v28 = vadd.f32 %v387_v20, %v181_v19  ;;  %v318_v29 = vmul.f32 %v694_v5, %v247_v15  ;;  %v113_v30 = vmul.f32 %v680_v1, %v42_v16  ;;  %v255_v19 = vld [vmem:[%s1514_s3 + $0xd0] sm:$0xff]  ;;  %v50_v20 = vld [vmem:[%s1511_s0 + $0xd8] sm:$0xff] }
  0x1f   :  { %v514_v33 = vmax.f32 %v450_v22, 0.0  ;;  %v388_v34 = vadd.f32 %v699_v6, %v317_v24  ;;  %v183_v35 = vadd.f32 %v685_v2, %v112_v25  ;;  %v319_v36 = vmul.f32 %v694_v5, %v248_v21  ;;  %v256_v25 = vld [vmem:[%s1514_s3 + $0xd8] sm:$0xff] }
  0x20   :  { %577 = vst [vmem:[%s1517_s6 + $0x70] sm:$0xff] %v513_v27  ;;  %v515_v39 = vmax.f32 %v451_v28, 0.0  ;;  %v389_v40 = vadd.f32 %v699_v6, %v318_v29  ;;  %v184_v41 = vadd.f32 %v685_v2, %v113_v30  ;;  %v114_v42 = vmul.f32 %v680_v1, %v43_v26  ;;  %v51_v30 = vld [vmem:[%s1511_s0 + $0xe0] sm:$0xff] }
  0x21   :  { %578 = vst [vmem:[%s1517_s6 + $0x78] sm:$0xff] %v514_v33  ;;  %v452_v43 = vadd.f32 %v388_v34, %v182_v23  ;;  %v390_v44 = vadd.f32 %v699_v6, %v319_v36  ;;  %v320_v45 = vmul.f32 %v694_v5, %v249_v31  ;;  %v115_v46 = vmul.f32 %v680_v1, %v44_v32  ;;  %v52_v36 = vld [vmem:[%s1511_s0 + $0xe8] sm:$0xff] }
  0x22   :  { %579 = vst [vmem:[%s1517_s6 + $0x80] sm:$0xff] %v515_v39  ;;  %v453_v48 = vadd.f32 %v389_v40, %v183_v35  ;;  %v185_v49 = vadd.f32 %v685_v2, %v114_v42  ;;  %v321_v50 = vmul.f32 %v694_v5, %v250_v37  ;;  %v116_v51 = vmul.f32 %v680_v1, %v45_v38  ;;  %v257_v35 = vld [vmem:[%s1514_s3 + $0xe0] sm:$0xff]  ;;  %v53_v42 = vld [vmem:[%s1511_s0 + $0xf0] sm:$0xff] }
  0x23   :  { %v516_v54 = vmax.f32 %v452_v43, 0.0  ;;  %v454_v55 = vadd.f32 %v390_v44, %v184_v41  ;;  %v391_v56 = vadd.f32 %v699_v6, %v320_v45  ;;  %v186_v57 = vadd.f32 %v685_v2, %v115_v46  ;;  %v258_v41 = vld [vmem:[%s1514_s3 + $0xe8] sm:$0xff] }
  0x24   :  { %v517_v60 = vmax.f32 %v453_v48, 0.0  ;;  %v392_v61 = vadd.f32 %v699_v6, %v321_v50  ;;  %v187_v62 = vadd.f32 %v685_v2, %v116_v51  ;;  %v322_v63 = vmul.f32 %v694_v5, %v251_v47  ;;  %v259_v51 = vld [vmem:[%s1514_s3 + $0xf0] sm:$0xff] }
  0x25   :  { %580 = vst [vmem:[%s1517_s6 + $0x88] sm:$0xff] %v516_v54  ;;  %v518_v3 = vmax.f32 %v454_v55, 0.0  ;;  %v455_v4 = vadd.f32 %v391_v56, %v185_v49  ;;  %v117_v7 = vmul.f32 %v680_v1, %v46_v52  ;;  %v323_v8 = vmul.f32 %v694_v5, %v252_v53  ;;  %v54_v56 = vld [vmem:[%s1511_s0 + $0xf8] sm:$0xff] }
  0x26   :  { %581 = vst [vmem:[%s1517_s6 + $0x90] sm:$0xff] %v517_v60  ;;  %v456_v9 = vadd.f32 %v392_v61, %v186_v57  ;;  %v393_v10 = vadd.f32 %v699_v6, %v322_v63  ;;  %v118_v11 = vmul.f32 %v680_v1, %v47_v58  ;;  %v324_v12 = vmul.f32 %v694_v5, %v253_v59  ;;  %v260_v57 = vld [vmem:[%s1514_s3 + $0xf8] sm:$0xff]  ;;  %v261_v63 = vld [vmem:[%s1514_s3 + $0x100] sm:$0xff] }
  0x27   :  { %582 = vst [vmem:[%s1517_s6 + $0x98] sm:$0xff] %v518_v3  ;;  %v519_v15 = vmax.f32 %v455_v4, 0.0  ;;  %v188_v16 = vadd.f32 %v685_v2, %v117_v7  ;;  %v394_v17 = vadd.f32 %v699_v6, %v323_v8  ;;  %v119_v18 = vmul.f32 %v680_v1, %v48_v0  ;;  %v56_v8 = vld [vmem:[%s1511_s0 + $0x108] sm:$0xff] }
  0x28   :  { %v520_v21 = vmax.f32 %v456_v9, 0.0  ;;  %v457_v22 = vadd.f32 %v393_v10, %v187_v62  ;;  %v189_v23 = vadd.f32 %v685_v2, %v118_v11  ;;  %v395_v24 = vadd.f32 %v699_v6, %v324_v12  ;;  %v55_v62 = vld [vmem:[%s1511_s0 + $0x100] sm:$0xff] }
  0x29   :  { %583 = vst [vmem:[%s1517_s6 + $0xa0] sm:$0xff] %v519_v15  ;;  %v458_v26 = vadd.f32 %v394_v17, %v188_v16  ;;  %v190_v27 = vadd.f32 %v685_v2, %v119_v18  ;;  %v325_v28 = vmul.f32 %v694_v5, %v254_v13  ;;  %v120_v29 = vmul.f32 %v680_v1, %v49_v14  ;;  %v262_v17 = vld [vmem:[%s1514_s3 + $0x108] sm:$0xff]  ;;  %v57_v18 = vld [vmem:[%s1511_s0 + $0x110] sm:$0xff] }
  0x2a   :  { %584 = vst [vmem:[%s1517_s6 + $0xa8] sm:$0xff] %v520_v21  ;;  %v521_v31 = vmax.f32 %v457_v22, 0.0  ;;  %v459_v32 = vadd.f32 %v395_v24, %v189_v23  ;;  %v326_v33 = vmul.f32 %v694_v5, %v255_v19  ;;  %v121_v34 = vmul.f32 %v680_v1, %v50_v20  ;;  %v263_v23 = vld [vmem:[%s1514_s3 + $0x110] sm:$0xff]  ;;  %v58_v24 = vld [vmem:[%s1511_s0 + $0x118] sm:$0xff] }
  0x2b   :  { %v522_v37 = vmax.f32 %v458_v26, 0.0  ;;  %v396_v38 = vadd.f32 %v699_v6, %v325_v28  ;;  %v191_v39 = vadd.f32 %v685_v2, %v120_v29  ;;  %v327_v40 = vmul.f32 %v694_v5, %v256_v25  ;;  %v264_v29 = vld [vmem:[%s1514_s3 + $0x118] sm:$0xff] }
  0x2c   :  { %585 = vst [vmem:[%s1517_s6 + $0xb0] sm:$0xff] %v521_v31  ;;  %v523_v43 = vmax.f32 %v459_v32, 0.0  ;;  %v397_v44 = vadd.f32 %v699_v6, %v326_v33  ;;  %v192_v45 = vadd.f32 %v685_v2, %v121_v34  ;;  %v122_v46 = vmul.f32 %v680_v1, %v51_v30  ;;  %v59_v34 = vld [vmem:[%s1511_s0 + $0x120] sm:$0xff] }
  0x2d   :  { %586 = vst [vmem:[%s1517_s6 + $0xb8] sm:$0xff] %v522_v37  ;;  %v460_v47 = vadd.f32 %v396_v38, %v190_v27  ;;  %v398_v48 = vadd.f32 %v699_v6, %v327_v40  ;;  %v328_v49 = vmul.f32 %v694_v5, %v257_v35  ;;  %v123_v50 = vmul.f32 %v680_v1, %v52_v36  ;;  %v60_v40 = vld [vmem:[%s1511_s0 + $0x128] sm:$0xff] }
  0x2e   :  { %587 = vst [vmem:[%s1517_s6 + $0xc0] sm:$0xff] %v523_v43  ;;  %v461_v52 = vadd.f32 %v397_v44, %v191_v39  ;;  %v193_v53 = vadd.f32 %v685_v2, %v122_v46  ;;  %v329_v54 = vmul.f32 %v694_v5, %v258_v41  ;;  %v124_v55 = vmul.f32 %v680_v1, %v53_v42  ;;  %v265_v39 = vld [vmem:[%s1514_s3 + $0x120] sm:$0xff]  ;;  %v61_v46 = vld [vmem:[%s1511_s0 + $0x130] sm:$0xff] }
  0x2f   :  { %v524_v58 = vmax.f32 %v460_v47, 0.0  ;;  %v462_v59 = vadd.f32 %v398_v48, %v192_v45  ;;  %v399_v60 = vadd.f32 %v699_v6, %v328_v49  ;;  %v194_v61 = vadd.f32 %v685_v2, %v123_v50  ;;  %v266_v45 = vld [vmem:[%s1514_s3 + $0x128] sm:$0xff] }
  0x30   :  { %v525_v0 = vmax.f32 %v461_v52, 0.0  ;;  %v400_v3 = vadd.f32 %v699_v6, %v329_v54  ;;  %v195_v4 = vadd.f32 %v685_v2, %v124_v55  ;;  %v330_v7 = vmul.f32 %v694_v5, %v259_v51  ;;  %v267_v55 = vld [vmem:[%s1514_s3 + $0x130] sm:$0xff] }
  0x31   :  { %588 = vst [vmem:[%s1517_s6 + $0xc8] sm:$0xff] %v524_v58  ;;  %v526_v9 = vmax.f32 %v462_v59, 0.0  ;;  %v463_v10 = vadd.f32 %v399_v60, %v193_v53  ;;  %v125_v11 = vmul.f32 %v680_v1, %v54_v56  ;;  %v331_v12 = vmul.f32 %v694_v5, %v260_v57  ;;  %v62_v60 = vld [vmem:[%s1511_s0 + $0x138] sm:$0xff] }
  0x32   :  { %589 = vst [vmem:[%s1517_s6 + $0xd0] sm:$0xff] %v525_v0  ;;  %v464_v13 = vadd.f32 %v400_v3, %v194_v61  ;;  %v401_v14 = vadd.f32 %v699_v6, %v330_v7  ;;  %v126_v15 = vmul.f32 %v680_v1, %v55_v62  ;;  %v332_v16 = vmul.f32 %v694_v5, %v261_v63  ;;  %v268_v61 = vld [vmem:[%s1514_s3 + $0x138] sm:$0xff]  ;;  %v269_v7 = vld [vmem:[%s1514_s3 + $0x140] sm:$0xff] }
  0x33   :  { %590 = vst [vmem:[%s1517_s6 + $0xd8] sm:$0xff] %v526_v9  ;;  %v527_v19 = vmax.f32 %v463_v10, 0.0  ;;  %v196_v20 = vadd.f32 %v685_v2, %v125_v11  ;;  %v402_v21 = vadd.f32 %v699_v6, %v331_v12  ;;  %v127_v22 = vmul.f32 %v680_v1, %v56_v8  ;;  %v64_v12 = vld [vmem:[%s1511_s0 + $0x148] sm:$0xff] }
  0x34   :  { %v528_v25 = vmax.f32 %v464_v13, 0.0  ;;  %v465_v26 = vadd.f32 %v401_v14, %v195_v4  ;;  %v197_v27 = vadd.f32 %v685_v2, %v126_v15  ;;  %v403_v28 = vadd.f32 %v699_v6, %v332_v16  ;;  %v63_v4 = vld [vmem:[%s1511_s0 + $0x140] sm:$0xff] }
  0x35   :  { %591 = vst [vmem:[%s1517_s6 + $0xe0] sm:$0xff] %v527_v19  ;;  %v466_v30 = vadd.f32 %v402_v21, %v196_v20  ;;  %v198_v31 = vadd.f32 %v685_v2, %v127_v22  ;;  %v333_v32 = vmul.f32 %v694_v5, %v262_v17  ;;  %v128_v33 = vmul.f32 %v680_v1, %v57_v18  ;;  %v270_v21 = vld [vmem:[%s1514_s3 + $0x148] sm:$0xff]  ;;  %v65_v22 = vld [vmem:[%s1511_s0 + $0x150] sm:$0xff] }
  0x36   :  { %592 = vst [vmem:[%s1517_s6 + $0xe8] sm:$0xff] %v528_v25  ;;  %v529_v35 = vmax.f32 %v465_v26, 0.0  ;;  %v467_v36 = vadd.f32 %v403_v28, %v197_v27  ;;  %v334_v37 = vmul.f32 %v694_v5, %v263_v23  ;;  %v129_v38 = vmul.f32 %v680_v1, %v58_v24  ;;  %v271_v27 = vld [vmem:[%s1514_s3 + $0x150] sm:$0xff]  ;;  %v66_v28 = vld [vmem:[%s1511_s0 + $0x158] sm:$0xff] }
  0x37   :  { %v530_v41 = vmax.f32 %v466_v30, 0.0  ;;  %v404_v42 = vadd.f32 %v699_v6, %v333_v32  ;;  %v199_v43 = vadd.f32 %v685_v2, %v128_v33  ;;  %v335_v44 = vmul.f32 %v694_v5, %v264_v29  ;;  %v272_v33 = vld [vmem:[%s1514_s3 + $0x158] sm:$0xff] }
  0x38   :  { %593 = vst [vmem:[%s1517_s6 + $0xf0] sm:$0xff] %v529_v35  ;;  %v531_v47 = vmax.f32 %v467_v36, 0.0  ;;  %v405_v48 = vadd.f32 %v699_v6, %v334_v37  ;;  %v200_v49 = vadd.f32 %v685_v2, %v129_v38  ;;  %v130_v50 = vmul.f32 %v680_v1, %v59_v34  ;;  %v67_v38 = vld [vmem:[%s1511_s0 + $0x160] sm:$0xff] }
  0x39   :  { %594 = vst [vmem:[%s1517_s6 + $0xf8] sm:$0xff] %v530_v41  ;;  %v468_v51 = vadd.f32 %v404_v42, %v198_v31  ;;  %v406_v52 = vadd.f32 %v699_v6, %v335_v44  ;;  %v336_v53 = vmul.f32 %v694_v5, %v265_v39  ;;  %v131_v54 = vmul.f32 %v680_v1, %v60_v40  ;;  %v68_v44 = vld [vmem:[%s1511_s0 + $0x168] sm:$0xff] }
  0x3a   :  { %595 = vst [vmem:[%s1517_s6 + $0x100] sm:$0xff] %v531_v47  ;;  %v469_v56 = vadd.f32 %v405_v48, %v199_v43  ;;  %v201_v57 = vadd.f32 %v685_v2, %v130_v50  ;;  %v337_v58 = vmul.f32 %v694_v5, %v266_v45  ;;  %v132_v59 = vmul.f32 %v680_v1, %v61_v46  ;;  %v273_v43 = vld [vmem:[%s1514_s3 + $0x160] sm:$0xff]  ;;  %v69_v50 = vld [vmem:[%s1511_s0 + $0x170] sm:$0xff] }
  0x3b   :  { %v532_v62 = vmax.f32 %v468_v51, 0.0  ;;  %v470_v63 = vadd.f32 %v406_v52, %v200_v49  ;;  %v407_v0 = vadd.f32 %v699_v6, %v336_v53  ;;  %v202_v3 = vadd.f32 %v685_v2, %v131_v54  ;;  %v274_v49 = vld [vmem:[%s1514_s3 + $0x168] sm:$0xff] }
  0x3c   :  { %v533_v8 = vmax.f32 %v469_v56, 0.0  ;;  %v408_v9 = vadd.f32 %v699_v6, %v337_v58  ;;  %v203_v10 = vadd.f32 %v685_v2, %v132_v59  ;;  %v338_v11 = vmul.f32 %v694_v5, %v267_v55  ;;  %v275_v59 = vld [vmem:[%s1514_s3 + $0x170] sm:$0xff] }
  0x3d   :  { %596 = vst [vmem:[%s1517_s6 + $0x108] sm:$0xff] %v532_v62  ;;  %v534_v13 = vmax.f32 %v470_v63, 0.0  ;;  %v471_v14 = vadd.f32 %v407_v0, %v201_v57  ;;  %v133_v15 = vmul.f32 %v680_v1, %v62_v60  ;;  %v339_v16 = vmul.f32 %v694_v5, %v268_v61  ;;  %v70_v0 = vld [vmem:[%s1511_s0 + $0x178] sm:$0xff] }
  0x3e   :  { %597 = vst [vmem:[%s1517_s6 + $0x110] sm:$0xff] %v533_v8  ;;  %v472_v17 = vadd.f32 %v408_v9, %v202_v3  ;;  %v409_v18 = vadd.f32 %v699_v6, %v338_v11  ;;  %v134_v19 = vmul.f32 %v680_v1, %v63_v4  ;;  %v340_v20 = vmul.f32 %v694_v5, %v269_v7  ;;  %v276_v3 = vld [vmem:[%s1514_s3 + $0x178] sm:$0xff]  ;;  %v277_v11 = vld [vmem:[%s1514_s3 + $0x180] sm:$0xff] }
  0x3f   :  { %598 = vst [vmem:[%s1517_s6 + $0x118] sm:$0xff] %v534_v13  ;;  %v535_v23 = vmax.f32 %v471_v14, 0.0  ;;  %v204_v24 = vadd.f32 %v685_v2, %v133_v15  ;;  %v410_v25 = vadd.f32 %v699_v6, %v339_v16  ;;  %v135_v26 = vmul.f32 %v680_v1, %v64_v12  ;;  %v72_v16 = vld [vmem:[%s1511_s0 + $0x188] sm:$0xff] }
  0x40   :  { %v536_v29 = vmax.f32 %v472_v17, 0.0  ;;  %v473_v30 = vadd.f32 %v409_v18, %v203_v10  ;;  %v205_v31 = vadd.f32 %v685_v2, %v134_v19  ;;  %v411_v32 = vadd.f32 %v699_v6, %v340_v20  ;;  %v71_v10 = vld [vmem:[%s1511_s0 + $0x180] sm:$0xff] }
  0x41   :  { %599 = vst [vmem:[%s1517_s6 + $0x120] sm:$0xff] %v535_v23  ;;  %v474_v34 = vadd.f32 %v410_v25, %v204_v24  ;;  %v206_v35 = vadd.f32 %v685_v2, %v135_v26  ;;  %v341_v36 = vmul.f32 %v694_v5, %v270_v21  ;;  %v136_v37 = vmul.f32 %v680_v1, %v65_v22  ;;  %v278_v25 = vld [vmem:[%s1514_s3 + $0x188] sm:$0xff]  ;;  %v73_v26 = vld [vmem:[%s1511_s0 + $0x190] sm:$0xff] }
  0x42   :  { %600 = vst [vmem:[%s1517_s6 + $0x128] sm:$0xff] %v536_v29  ;;  %v537_v39 = vmax.f32 %v473_v30, 0.0  ;;  %v475_v40 = vadd.f32 %v411_v32, %v205_v31  ;;  %v342_v41 = vmul.f32 %v694_v5, %v271_v27  ;;  %v137_v42 = vmul.f32 %v680_v1, %v66_v28  ;;  %v279_v31 = vld [vmem:[%s1514_s3 + $0x190] sm:$0xff]  ;;  %v74_v32 = vld [vmem:[%s1511_s0 + $0x198] sm:$0xff] }
  0x43   :  { %v538_v45 = vmax.f32 %v474_v34, 0.0  ;;  %v412_v46 = vadd.f32 %v699_v6, %v341_v36  ;;  %v207_v47 = vadd.f32 %v685_v2, %v136_v37  ;;  %v343_v48 = vmul.f32 %v694_v5, %v272_v33  ;;  %v280_v37 = vld [vmem:[%s1514_s3 + $0x198] sm:$0xff] }
  0x44   :  { %601 = vst [vmem:[%s1517_s6 + $0x130] sm:$0xff] %v537_v39  ;;  %v539_v51 = vmax.f32 %v475_v40, 0.0  ;;  %v413_v52 = vadd.f32 %v699_v6, %v342_v41  ;;  %v208_v53 = vadd.f32 %v685_v2, %v137_v42  ;;  %v138_v54 = vmul.f32 %v680_v1, %v67_v38  ;;  %v75_v42 = vld [vmem:[%s1511_s0 + $0x1a0] sm:$0xff] }
  0x45   :  { %602 = vst [vmem:[%s1517_s6 + $0x138] sm:$0xff] %v538_v45  ;;  %v476_v55 = vadd.f32 %v412_v46, %v206_v35  ;;  %v414_v56 = vadd.f32 %v699_v6, %v343_v48  ;;  %v344_v57 = vmul.f32 %v694_v5, %v273_v43  ;;  %v139_v58 = vmul.f32 %v680_v1, %v68_v44  ;;  %v76_v48 = vld [vmem:[%s1511_s0 + $0x1a8] sm:$0xff] }
  0x46   :  { %603 = vst [vmem:[%s1517_s6 + $0x140] sm:$0xff] %v539_v51  ;;  %v477_v60 = vadd.f32 %v413_v52, %v207_v47  ;;  %v209_v61 = vadd.f32 %v685_v2, %v138_v54  ;;  %v345_v62 = vmul.f32 %v694_v5, %v274_v49  ;;  %v140_v63 = vmul.f32 %v680_v1, %v69_v50  ;;  %v281_v47 = vld [vmem:[%s1514_s3 + $0x1a0] sm:$0xff]  ;;  %v77_v54 = vld [vmem:[%s1511_s0 + $0x1b0] sm:$0xff] }
  0x47   :  { %v540_v4 = vmax.f32 %v476_v55, 0.0  ;;  %v478_v7 = vadd.f32 %v414_v56, %v208_v53  ;;  %v415_v8 = vadd.f32 %v699_v6, %v344_v57  ;;  %v210_v9 = vadd.f32 %v685_v2, %v139_v58  ;;  %v282_v53 = vld [vmem:[%s1514_s3 + $0x1a8] sm:$0xff] }
  0x48   :  { %v541_v12 = vmax.f32 %v477_v60, 0.0  ;;  %v416_v13 = vadd.f32 %v699_v6, %v345_v62  ;;  %v211_v14 = vadd.f32 %v685_v2, %v140_v63  ;;  %v346_v15 = vmul.f32 %v694_v5, %v275_v59  ;;  %v283_v63 = vld [vmem:[%s1514_s3 + $0x1b0] sm:$0xff] }
  0x49   :  { %604 = vst [vmem:[%s1517_s6 + $0x148] sm:$0xff] %v540_v4  ;;  %v542_v17 = vmax.f32 %v478_v7, 0.0  ;;  %v479_v18 = vadd.f32 %v415_v8, %v209_v61  ;;  %v141_v19 = vmul.f32 %v680_v1, %v70_v0  ;;  %v347_v20 = vmul.f32 %v694_v5, %v276_v3  ;;  %v78_v8 = vld [vmem:[%s1511_s0 + $0x1b8] sm:$0xff] }
  0x4a   :  { %605 = vst [vmem:[%s1517_s6 + $0x150] sm:$0xff] %v541_v12  ;;  %v480_v21 = vadd.f32 %v416_v13, %v210_v9  ;;  %v417_v22 = vadd.f32 %v699_v6, %v346_v15  ;;  %v142_v23 = vmul.f32 %v680_v1, %v71_v10  ;;  %v348_v24 = vmul.f32 %v694_v5, %v277_v11  ;;  %v284_v9 = vld [vmem:[%s1514_s3 + $0x1b8] sm:$0xff]  ;;  %v285_v15 = vld [vmem:[%s1514_s3 + $0x1c0] sm:$0xff] }
  0x4b   :  { %606 = vst [vmem:[%s1517_s6 + $0x158] sm:$0xff] %v542_v17  ;;  %v543_v27 = vmax.f32 %v479_v18, 0.0  ;;  %v212_v28 = vadd.f32 %v685_v2, %v141_v19  ;;  %v418_v29 = vadd.f32 %v699_v6, %v347_v20  ;;  %v143_v30 = vmul.f32 %v680_v1, %v72_v16  ;;  %v80_v20 = vld [vmem:[%s1511_s0 + $0x1c8] sm:$0xff] }
  0x4c   :  { %v544_v33 = vmax.f32 %v480_v21, 0.0  ;;  %v481_v34 = vadd.f32 %v417_v22, %v211_v14  ;;  %v213_v35 = vadd.f32 %v685_v2, %v142_v23  ;;  %v419_v36 = vadd.f32 %v699_v6, %v348_v24  ;;  %v79_v14 = vld [vmem:[%s1511_s0 + $0x1c0] sm:$0xff] }
  0x4d   :  { %607 = vst [vmem:[%s1517_s6 + $0x160] sm:$0xff] %v543_v27  ;;  %v482_v38 = vadd.f32 %v418_v29, %v212_v28  ;;  %v214_v39 = vadd.f32 %v685_v2, %v143_v30  ;;  %v349_v40 = vmul.f32 %v694_v5, %v278_v25  ;;  %v144_v41 = vmul.f32 %v680_v1, %v73_v26  ;;  %v286_v29 = vld [vmem:[%s1514_s3 + $0x1c8] sm:$0xff]  ;;  %v81_v30 = vld [vmem:[%s1511_s0 + $0x1d0] sm:$0xff] }
  0x4e   :  { %608 = vst [vmem:[%s1517_s6 + $0x168] sm:$0xff] %v544_v33  ;;  %v545_v43 = vmax.f32 %v481_v34, 0.0  ;;  %v483_v44 = vadd.f32 %v419_v36, %v213_v35  ;;  %v350_v45 = vmul.f32 %v694_v5, %v279_v31  ;;  %v145_v46 = vmul.f32 %v680_v1, %v74_v32  ;;  %v82_v35 = vld [vmem:[%s1511_s0 + $0x1d8] sm:$0xff] }
  0x4f   :  { %v546_v49 = vmax.f32 %v482_v38, 0.0  ;;  %v420_v50 = vadd.f32 %v699_v6, %v349_v40  ;;  %v215_v51 = vadd.f32 %v685_v2, %v144_v41  ;;  %v351_v52 = vmul.f32 %v694_v5, %v280_v37  ;;  %v288_v40 = vld [vmem:[%s1514_s3 + $0x1d8] sm:$0xff]  ;;  %v635_v41 = vld [vmem:[%s1513_s2] ss:$0 sm:$0xff] }
  0x50   :  { %609 = vst [vmem:[%s1517_s6 + $0x170] sm:$0xff] %v545_v43  ;;  %v547_v55 = vmax.f32 %v483_v44, 0.0  ;;  %v421_v56 = vadd.f32 %v699_v6, %v350_v45  ;;  %v216_v57 = vadd.f32 %v685_v2, %v145_v46  ;;  %v146_v58 = vmul.f32 %v680_v1, %v75_v42  ;;  %v83_v45 = vld [vmem:[%s1511_s0 + $0x1e0] sm:$0xff] }
  0x51   :  { %610 = vst [vmem:[%s1517_s6 + $0x178] sm:$0xff] %v546_v49  ;;  %v484_v59 = vadd.f32 %v420_v50, %v214_v39  ;;  %v422_v60 = vadd.f32 %v699_v6, %v351_v52  ;;  %v352_v61 = vmul.f32 %v694_v5, %v281_v47  ;;  %v147_v62 = vmul.f32 %v680_v1, %v76_v48  ;;  %v289_v50 = vld [vmem:[%s1514_s3 + $0x1e0] sm:$0xff] }
  0x52   :  { %611 = vst [vmem:[%s1517_s6 + $0x180] sm:$0xff] %v547_v55  ;;  %v485_v0 = vadd.f32 %v421_v56, %v215_v51  ;;  %v217_v3 = vadd.f32 %v685_v2, %v146_v58  ;;  %v353_v4 = vmul.f32 %v694_v5, %v282_v53  ;;  %v148_v7 = vmul.f32 %v680_v1, %v77_v54  ;;  %v84_v51 = vld [vmem:[%s1511_s0 + $0x1e8] sm:$0xff]  ;;  %v638_v53 = vld [vmem:[%s1516_s5] ss:$0 sm:$0xff]  ;;  %v85_v58 = vld [vmem:[%s1511_s0 + $0x1f0] sm:$0xff] }
  0x53   :  { %v548_v10 = vmax.f32 %v484_v59, 0.0  ;;  %v486_v11 = vadd.f32 %v422_v60, %v216_v57  ;;  %v423_v12 = vadd.f32 %v699_v6, %v352_v61  ;;  %v218_v13 = vadd.f32 %v685_v2, %v147_v62  ;;  %v290_v57 = vld [vmem:[%s1514_s3 + $0x1e8] sm:$0xff] }
  0x54   :  { %v549_v16 = vmax.f32 %v485_v0, 0.0  ;;  %v424_v17 = vadd.f32 %v699_v6, %v353_v4  ;;  %v219_v18 = vadd.f32 %v685_v2, %v148_v7  ;;  %v354_v19 = vmul.f32 %v694_v5, %v283_v63  ;;  %v291_v7 = vld [vmem:[%s1514_s3 + $0x1f0] sm:$0xff] }
  0x55   :  { %612 = vst [vmem:[%s1517_s6 + $0x188] sm:$0xff] %v548_v10  ;;  %v550_v21 = vmax.f32 %v486_v11, 0.0  ;;  %v487_v22 = vadd.f32 %v423_v12, %v217_v3  ;;  %v149_v23 = vmul.f32 %v680_v1, %v78_v8  ;;  %v355_v24 = vmul.f32 %v694_v5, %v284_v9  ;;  %v86_v12 = vld [vmem:[%s1511_s0 + $0x1f8] sm:$0xff] }
  0x56   :  { %613 = vst [vmem:[%s1517_s6 + $0x190] sm:$0xff] %v549_v16  ;;  %v488_v25 = vadd.f32 %v424_v17, %v218_v13  ;;  %v425_v26 = vadd.f32 %v699_v6, %v354_v19  ;;  %v150_v27 = vmul.f32 %v680_v1, %v79_v14  ;;  %v356_v28 = vmul.f32 %v694_v5, %v285_v15  ;;  %v287_v5 = vld [vmem:[%s1514_s3 + $0x1d0] sm:$0xff]  ;;  %v292_v13 = vld [vmem:[%s1514_s3 + $0x1f8] sm:$0xff] }
  0x57   :  { %614 = vst [vmem:[%s1517_s6 + $0x198] sm:$0xff] %v550_v21  ;;  %v551_v31 = vmax.f32 %v487_v22, 0.0  ;;  %v220_v32 = vadd.f32 %v685_v2, %v149_v23  ;;  %v426_v33 = vadd.f32 %v699_v6, %v355_v24  ;;  %v151_v34 = vmul.f32 %v680_v1, %v80_v20 }
  0x58   :  { %v552_v36 = vmax.f32 %v488_v25, 0.0  ;;  %v489_v37 = vadd.f32 %v425_v26, %v219_v18  ;;  %v221_v38 = vadd.f32 %v685_v2, %v150_v27  ;;  %v427_v39 = vadd.f32 %v699_v6, %v356_v28  ;;  %v636_v2 = vld [vmem:[%s1515_s4] ss:$0 sm:$0xff] }
  0x59   :  { %615 = vst [vmem:[%s1517_s6 + $0x1a0] sm:$0xff] %v551_v31  ;;  %v490_v1 = vadd.f32 %v426_v33, %v220_v32  ;;  %v222_v42 = vadd.f32 %v635_v41, %v151_v34  ;;  %v357_v43 = vmul.f32 %v636_v2, %v286_v29  ;;  %v637_v6 = vld [vmem:[%s1512_s1] ss:$0 sm:$0xff]  ;;  %v358_v48 = vmul.f32 %v636_v2, %v287_v5 }
  0x5a   :  { %v152_v44 = vmul.f32 %v637_v6, %v81_v30  ;;  %616 = vst [vmem:[%s1517_s6 + $0x1a8] sm:$0xff] %v552_v36  ;;  %v553_v46 = vmax.f32 %v489_v37, 0.0  ;;  %v491_v47 = vadd.f32 %v427_v39, %v221_v38  ;;  %v153_v49 = vmul.f32 %v637_v6, %v82_v35 }
  0x5b   :  { %v554_v52 = vmax.f32 %v490_v1, 0.0  ;;  %v428_v54 = vadd.f32 %v638_v53, %v357_v43  ;;  %v359_v56 = vmul.f32 %v636_v2, %v288_v40  ;;  %v429_v60 = vadd.f32 %v638_v53, %v358_v48 }
  0x5c   :  { %v223_v55 = vadd.f32 %v635_v41, %v152_v44  ;;  %617 = vst [vmem:[%s1517_s6 + $0x1b0] sm:$0xff] %v553_v46  ;;  %v555_v59 = vmax.f32 %v491_v47, 0.0  ;;  %v224_v61 = vadd.f32 %v635_v41, %v153_v49  ;;  %v154_v62 = vmul.f32 %v637_v6, %v83_v45 }
  0x5d   :  { %618 = vst [vmem:[%s1517_s6 + $0x1b8] sm:$0xff] %v554_v52  ;;  %v492_v63 = vadd.f32 %v428_v54, %v222_v42  ;;  %v430_v0 = vadd.f32 %v638_v53, %v359_v56  ;;  %v360_v3 = vmul.f32 %v636_v2, %v289_v50  ;;  %v155_v4 = vmul.f32 %v637_v6, %v84_v51 }
  0x5e   :  { %619 = vst [vmem:[%s1517_s6 + $0x1c0] sm:$0xff] %v555_v59  ;;  %v493_v8 = vadd.f32 %v429_v60, %v223_v55  ;;  %v225_v9 = vadd.f32 %v635_v41, %v154_v62  ;;  %v361_v10 = vmul.f32 %v636_v2, %v290_v57  ;;  %v156_v11 = vmul.f32 %v637_v6, %v85_v58 }
  0x5f   :  { %v556_v14 = vmax.f32 %v492_v63, 0.0  ;;  %v494_v15 = vadd.f32 %v430_v0, %v224_v61  ;;  %v431_v16 = vadd.f32 %v638_v53, %v360_v3  ;;  %v226_v17 = vadd.f32 %v635_v41, %v155_v4 }
  0x60   :  { %v557_v18 = vmax.f32 %v493_v8, 0.0  ;;  %v432_v19 = vadd.f32 %v638_v53, %v361_v10  ;;  %v227_v20 = vadd.f32 %v635_v41, %v156_v11  ;;  %v362_v21 = vmul.f32 %v636_v2, %v291_v7 }
  0x61   :  { %620 = vst [vmem:[%s1517_s6 + $0x1c8] sm:$0xff] %v556_v14  ;;  %v558_v22 = vmax.f32 %v494_v15, 0.0  ;;  %v495_v23 = vadd.f32 %v431_v16, %v225_v9  ;;  %v157_v24 = vmul.f32 %v637_v6, %v86_v12  ;;  %v363_v25 = vmul.f32 %v636_v2, %v292_v13 }
  0x62   :  { %621 = vst [vmem:[%s1517_s6 + $0x1d0] sm:$0xff] %v557_v18  ;;  %v496_v26 = vadd.f32 %v432_v19, %v226_v17  ;;  %v433_v27 = vadd.f32 %v638_v53, %v362_v21 }
  0x63   :  { %622 = vst [vmem:[%s1517_s6 + $0x1d8] sm:$0xff] %v558_v22  ;;  %v559_v28 = vmax.f32 %v495_v23, 0.0  ;;  %v228_v29 = vadd.f32 %v635_v41, %v157_v24  ;;  %v434_v30 = vadd.f32 %v638_v53, %v363_v25 }
  0x64   :  { %v560_v31 = vmax.f32 %v496_v26, 0.0  ;;  %v497_v32 = vadd.f32 %v433_v27, %v227_v20 }
  0x65   :  { %623 = vst [vmem:[%s1517_s6 + $0x1e0] sm:$0xff] %v559_v28  ;;  %v498_v33 = vadd.f32 %v434_v30, %v228_v29 }
  0x66   :  { %624 = vst [vmem:[%s1517_s6 + $0x1e8] sm:$0xff] %v560_v31  ;;  %v561_v34 = vmax.f32 %v497_v32, 0.0 }
  0x67   :  { %v562_v5 = vmax.f32 %v498_v33, 0.0 }
  0x68   :  { %625 = vst [vmem:[%s1517_s6 + $0x1f0] sm:$0xff] %v561_v34 }
  0x69   :  { %626 = vst [vmem:[%s1517_s6 + $0x1f8] sm:$0xff] %v562_v5 }

</bundles_post_ra>
